<compile_context>
chip_gen: v6e
topology: v6e:2x2x1
jax: 0.10.0
libtpu: 0.0.40
codegen_flags: <defaults>
</compile_context>

<pallas_src>
import jax
import jax.numpy as jnp
from jax import lax
from jax.experimental import pallas as pl
from jax.experimental.pallas import tpu as pltpu

BN_EPS = 1e-5  # PyTorch BatchNorm1d default


def _round_up(n, m):
    return ((n + m - 1) // m) * m


def _largest_divisor_leq(n, cap):
    for d in range(min(cap, n), 0, -1):
        if n % d == 0:
            return d
    return 1


def _pick_b_tile(B, HW, C, itemsize, budget_bytes=24 << 20):
    """Largest batch tile whose double-buffered x tiles fit the budget.

    Uses PADDED byte counts (sublane pack for the dtype, lanes to 128) and
    keeps the out-block sublane dim aligned (multiple of 8, or the full B).
    Budget default sized so the streaming buffers fit v7x's 64 MiB VMEM with
    room for the resident weight / scratch / output blocks.
    """
    sub = 16 if itemsize == 2 else 8
    per_row = _round_up(HW, sub) * _round_up(C, 128) * itemsize
    cap = min(max(1, budget_bytes // (2 * per_row)), 256)
    if B <= cap:
        return B  # full batch in one tile (block == full dims, always legal)
    for d in range(cap, 7, -1):
        if B % d == 0 and d % 8 == 0:
            return d
    return B  # no aligned divisor fits; fall back to a single full-batch tile


def _make_pool_fc_kernel(hw_chunk, c_chunk, inv_hw):
    def kernel(x_ref, w_ref, b_ref, y_ref, pooled_ref):
        """Fused global avg-pool over HW + Linear, per batch tile.

        x_ref:      (b_tile, HW, C) bf16  NHWC feature-map tile (C on lanes)
        w_ref:      (C, E) bf16           fc weight (VMEM-resident, const idx)
        b_ref:      (1, E) f32            fc bias   (VMEM-resident, const idx)
        y_ref:      (b_tile, E) f32       pre-BN output tile
        pooled_ref: (b_tile, C) f32       scratch: pooled features of this tile
        """
        HW = x_ref.shape[1]
        C = x_ref.shape[2]
        n_hw = HW // hw_chunk
        n_c = C // c_chunk

        # AdaptiveAvgPool2d((1,1)) + .squeeze() == mean over HW (axis 1).
        # Accumulate per (hw_chunk, c_chunk) slab straight into the scratch
        # ref: static slices are free and the read-modify-write chain bounds
        # the live vreg set (no spills). C stays lane-dense throughout.
        for ci in range(n_c):
            c_lo = ci * c_chunk
            pooled_ref[:, c_lo:c_lo + c_chunk] = jnp.sum(
                x_ref[:, 0:hw_chunk, c_lo:c_lo + c_chunk].astype(jnp.float32),
                axis=1)
            for hi in range(1, n_hw):
                h_lo = hi * hw_chunk
                pooled_ref[:, c_lo:c_lo + c_chunk] += jnp.sum(
                    x_ref[:, h_lo:h_lo + hw_chunk, c_lo:c_lo + c_chunk]
                    .astype(jnp.float32), axis=1)

        # fc: Linear(C_feat, E) on the MXU (bf16 in, f32 accumulate).
        pooled = (pooled_ref[...] * inv_hw).astype(w_ref.dtype)
        y = jnp.dot(pooled, w_ref[...], preferred_element_type=jnp.float32)
        y_ref[...] = y + b_ref[...]

    return kernel


def _bn_kernel(y_ref, g_ref, beta_ref, o_ref):
    """BatchNorm1d, train mode (biased variance) over the full batch (B, E)."""
    y = y_ref[...]
    mu = jnp.mean(y, axis=0, keepdims=True)
    var = jnp.mean((y - mu) * (y - mu), axis=0, keepdims=True)
    # Hoisted scale: one (1, E) multiply instead of a (B, E) one.
    scale = g_ref[...] * lax.rsqrt(var + BN_EPS)
    o_ref[...] = (y - mu) * scale + beta_ref[...]


def _pool_fc(x, w_t, b_fc, *, b_tile):
    """x: (B, HW, C) bf16; w_t: (C, E) bf16; b_fc: (E,) f32 -> (B, E) f32."""
    B, HW, C = x.shape
    E = w_t.shape[1]

    hw_chunk = _largest_divisor_leq(HW, 8)
    if C % 256 == 0:
        c_chunk = 256
    elif C % 128 == 0:
        c_chunk = 128
    else:
        c_chunk = C

    kernel = _make_pool_fc_kernel(hw_chunk, c_chunk, 1.0 / HW)

    # VMEM budget from PADDED shapes (sublane pack for dtype, lanes to 128).
    sub_x = 16 if x.dtype.itemsize == 2 else 8
    sub_w = 16 if w_t.dtype.itemsize == 2 else 8
    x_tile_b = b_tile * _round_up(HW, sub_x) * _round_up(C, 128) * x.dtype.itemsize
    w_b = _round_up(C, sub_w) * _round_up(E, 128) * w_t.dtype.itemsize
    bias_b = 8 * _round_up(E, 128) * 4
    y_tile_b = _round_up(b_tile, 8) * _round_up(E, 128) * 4
    pooled_b = _round_up(b_tile, 8) * _round_up(C, 128) * 4
    vmem_limit = int(1.25 * (2 * (x_tile_b + w_b + bias_b + y_tile_b) + pooled_b)) + (2 << 20)
    vmem_limit = max(vmem_limit, 16 << 20)

    cost = pl.CostEstimate(
        flops=B * HW * C + 2 * B * C * E + B * E,
        transcendentals=0,
        bytes_accessed=(B * HW * C * x.dtype.itemsize
                        + C * E * w_t.dtype.itemsize
                        + B * E * 4 + E * 4),
    )

    return pl.pallas_call(
        kernel,
        out_shape=jax.ShapeDtypeStruct((B, E), jnp.float32),
        grid_spec=pltpu.PrefetchScalarGridSpec(
            num_scalar_prefetch=0,
            grid=(B // b_tile,),
            in_specs=[
                # streamed per batch tile (double-buffered by the pipeline)
                pl.BlockSpec((b_tile, HW, C), lambda i: (i, 0, 0)),
                # constant block index => VMEM-resident, DMA'd once
                pl.BlockSpec((C, E), lambda i: (0, 0)),
                pl.BlockSpec((1, E), lambda i: (0, 0)),
            ],
            out_specs=pl.BlockSpec((b_tile, E), lambda i: (i, 0)),
            scratch_shapes=[pltpu.VMEM((b_tile, C), jnp.float32)],
        ),
        # Each grid step writes its own output tile and fully rewrites its
        # scratch -> safe to shard the batch axis across TensorCores.
        compiler_params=pltpu.CompilerParams(
            dimension_semantics=("parallel",),
            vmem_limit_bytes=vmem_limit,
        ),
        cost_estimate=cost,
    )(x, w_t, b_fc.reshape(1, E).astype(jnp.float32))


def _batchnorm1d(y, gamma, beta):
    """Train-mode BatchNorm1d over (B, E) pre-BN activations (f32)."""
    B, E = y.shape
    return pl.pallas_call(
        _bn_kernel,
        out_shape=jax.ShapeDtypeStruct((B, E), jnp.float32),
        grid_spec=pltpu.PrefetchScalarGridSpec(
            num_scalar_prefetch=0,
            grid=(1,),
            in_specs=[
                pl.BlockSpec((B, E), lambda i: (0, 0)),
                pl.BlockSpec((1, E), lambda i: (0, 0)),
                pl.BlockSpec((1, E), lambda i: (0, 0)),
            ],
            out_specs=pl.BlockSpec((B, E), lambda i: (0, 0)),
        ),
        compiler_params=pltpu.CompilerParams(
            dimension_semantics=("arbitrary",)),
    )(y,
      gamma.reshape(1, E).astype(jnp.float32),
      beta.reshape(1, E).astype(jnp.float32))


def encoder_cnn_head(feat_nhwc, w_fc, b_fc, gamma, beta, *, b_tile=None):
    """feat_nhwc: (B, H, W, C_feat) trunk output in NHWC (bf16 recommended).
    w_fc: (E, C_feat) PyTorch Linear weight; b_fc/gamma/beta: (E,).
    Returns (B, E) float32 == bn(fc(avgpool(feat).squeeze())) in train mode.
    """
    B, H, W, C = feat_nhwc.shape
    E = w_fc.shape[0]
    HW = H * W

    # NHWC -> (B, HW, C): pure reshape, lane axis stays C (no HBM transpose).
    x = feat_nhwc.reshape(B, HW, C)

    # Keep the embed dim lane-dense (multiple of 128): pad params, slice after.
    E_pad = _round_up(E, 128)
    w_t = jnp.transpose(w_fc)  # (C, E) — tiny one-off; store pre-transposed in real pipelines.
    if E_pad != E:
        w_t = jnp.pad(w_t, ((0, 0), (0, E_pad - E)))
        b_p = jnp.pad(b_fc, (0, E_pad - E))
        g_p = jnp.pad(gamma, (0, E_pad - E), constant_values=1.0)
        beta_p = jnp.pad(beta, (0, E_pad - E))
    else:
        b_p, g_p, beta_p = b_fc, gamma, beta

    if b_tile is None:
        b_tile = _pick_b_tile(B, HW, C, x.dtype.itemsize)
    assert B % b_tile == 0, "batch must be divisible by the batch tile"

    y = _pool_fc(x, w_t, b_p, b_tile=b_tile)     # (B, E_pad) pre-BN, parallel over batch tiles
    out = _batchnorm1d(y, g_p, beta_p)           # full-batch train-mode BN
    return out[:, :E] if E_pad != E else out


if __name__ == "__main__":
    key = jax.random.PRNGKey(0)
    k_img, k_stem, k_w, k_b = jax.random.split(key, 4)

    # Small shapes standing in for the real module
    # (real: C_feat = resnet50.fc.in_features = 2048, HW = 7*7 = 49).
    B, H, W, C_in = 16, 8, 8, 3
    C_feat, E = 256, 128

    # NHWC images (TPU-native conv layout; the real frozen trunk should run
    # NHWC so its output feeds this head with zero transposes).
    images = jax.random.normal(k_img, (B, H, W, C_in), jnp.float32)

    # TODO(synk): stand-in for the frozen pretrained ResNet-50 trunk
    # (conv1..layer4): deterministic 1x1 conv + ReLU -> (B, H, W, C_feat) NHWC.
    w_stem = jax.random.normal(k_stem, (C_in, C_feat), jnp.float32) * 0.1
    feat = jax.nn.relu(jnp.einsum("bhwc,co->bhwo", images, w_stem))

    # Deterministic parameter init matching nn.Linear / nn.BatchNorm1d defaults.
    bound = 1.0 / (C_feat ** 0.5)
    w_fc = jax.random.uniform(k_w, (E, C_feat), jnp.float32, -bound, bound)
    b_fc = jax.random.uniform(k_b, (E,), jnp.float32, -bound, bound)
    gamma = jnp.ones((E,), jnp.float32)   # bn.weight
    beta = jnp.zeros((E,), jnp.float32)   # bn.bias

    # bf16 feature maps / fc weight (halves HBM bytes of the dominant input);
    # all accumulation inside the kernels is f32.
    feat_bf16 = feat.astype(jnp.bfloat16)
    w_bf16 = w_fc.astype(jnp.bfloat16)

    out = jax.block_until_ready(
        encoder_cnn_head(feat_bf16, w_bf16, b_fc, gamma, beta))

    # Pure-JAX reference of the same head with the same precision path
    # (avgpool -> squeeze -> fc(bf16 in, f32 acc) -> bn train-mode).
    pooled_ref = feat_bf16.astype(jnp.float32).reshape(B, H * W, C_feat).mean(axis=1)
    y_ref = jnp.dot(pooled_ref.astype(jnp.bfloat16), w_bf16.T,
                    preferred_element_type=jnp.float32) + b_fc
    mu = y_ref.mean(axis=0, keepdims=True)
    var = ((y_ref - mu) ** 2).mean(axis=0, keepdims=True)
    ref = gamma * (y_ref - mu) * jax.lax.rsqrt(var + BN_EPS) + beta

    assert out.shape == (B, E), out.shape
    err = float(jnp.abs(out - ref).max())
    assert jnp.allclose(out, ref, atol=1e-2, rtol=1e-2), err
    print("KERNEL_OK")
</pallas_src>

<mosaic_0001>
module attributes {stable_mosaic.version = 11 : i64} {
  func.func @kernel(%arg0: i32, %arg1: memref<16x64x256xbf16, #tpu.memory_space<vmem>>, %arg2: memref<256x128xbf16, #tpu.memory_space<vmem>>, %arg3: memref<1x128xf32, #tpu.memory_space<vmem>>, %arg4: memref<16x128xf32, #tpu.memory_space<vmem>>, %arg5: memref<16x256xf32, #tpu.memory_space<vmem>>) attributes {dimension_semantics = [#tpu.dimension_semantics<parallel>], iteration_bounds = array<i64: 1>, scalar_prefetch = 0 : i64, scratch_operands = 1 : i64, tpu.core_type = #tpu.core_type<tc>, window_params = [{transform_indices = @transform_0, window_bounds = array<i64: 16, 64, 256>}, {pipeline_mode = #tpu.pipeline_mode<synchronous>, transform_indices = @transform_1, window_bounds = array<i64: 256, 128>}, {pipeline_mode = #tpu.pipeline_mode<synchronous>, transform_indices = @transform_2, window_bounds = array<i64: 1, 128>}, {transform_indices = @transform_3, window_bounds = array<i64: 16, 128>}]} {
    %c0 = arith.constant 0 : index
    %c0_0 = arith.constant 0 : index
    %c0_1 = arith.constant 0 : index
    %0 = vector.load %arg1[%c0, %c0_0, %c0_1] : memref<16x64x256xbf16, #tpu.memory_space<vmem>>, vector<16x8x256xbf16>
    %1 = arith.extf %0 : vector<16x8x256xbf16> to vector<16x8x256xf32>
    %cst = arith.constant dense<0.000000e+00> : vector<16x256xf32>
    %2 = vector.multi_reduction <add>, %1, %cst [1] : vector<16x8x256xf32> to vector<16x256xf32>
    %c0_2 = arith.constant 0 : index
    %c0_3 = arith.constant 0 : index
    %3 = vector.load %arg5[%c0_2, %c0_3] : memref<16x256xf32, #tpu.memory_space<vmem>>, vector<16x256xf32>
    tpu.vector_store %arg5[%c0_2, %c0_3], %2 {strides = array<i32>} : memref<16x256xf32, #tpu.memory_space<vmem>>, vector<16x256xf32>,
    %c0_4 = arith.constant 0 : index
    %c0_5 = arith.constant 0 : index
    %4 = vector.load %arg5[%c0_4, %c0_5] : memref<16x256xf32, #tpu.memory_space<vmem>>, vector<16x256xf32>
    %c0_6 = arith.constant 0 : index
    %c8 = arith.constant 8 : index
    %c0_7 = arith.constant 0 : index
    %5 = vector.load %arg1[%c0_6, %c8, %c0_7] : memref<16x64x256xbf16, #tpu.memory_space<vmem>>, vector<16x8x256xbf16>
    %6 = arith.extf %5 : vector<16x8x256xbf16> to vector<16x8x256xf32>
    %cst_8 = arith.constant dense<0.000000e+00> : vector<16x256xf32>
    %7 = vector.multi_reduction <add>, %6, %cst_8 [1] : vector<16x8x256xf32> to vector<16x256xf32>
    %8 = arith.addf %4, %7 : vector<16x256xf32>
    %c0_9 = arith.constant 0 : index
    %c0_10 = arith.constant 0 : index
    %9 = vector.load %arg5[%c0_9, %c0_10] : memref<16x256xf32, #tpu.memory_space<vmem>>, vector<16x256xf32>
    tpu.vector_store %arg5[%c0_9, %c0_10], %8 {strides = array<i32>} : memref<16x256xf32, #tpu.memory_space<vmem>>, vector<16x256xf32>,
    %c0_11 = arith.constant 0 : index
    %c0_12 = arith.constant 0 : index
    %10 = vector.load %arg5[%c0_11, %c0_12] : memref<16x256xf32, #tpu.memory_space<vmem>>, vector<16x256xf32>
    %c0_13 = arith.constant 0 : index
    %c16 = arith.constant 16 : index
    %c0_14 = arith.constant 0 : index
    %11 = vector.load %arg1[%c0_13, %c16, %c0_14] : memref<16x64x256xbf16, #tpu.memory_space<vmem>>, vector<16x8x256xbf16>
    %12 = arith.extf %11 : vector<16x8x256xbf16> to vector<16x8x256xf32>
    %cst_15 = arith.constant dense<0.000000e+00> : vector<16x256xf32>
    %13 = vector.multi_reduction <add>, %12, %cst_15 [1] : vector<16x8x256xf32> to vector<16x256xf32>
    %14 = arith.addf %10, %13 : vector<16x256xf32>
    %c0_16 = arith.constant 0 : index
    %c0_17 = arith.constant 0 : index
    %15 = vector.load %arg5[%c0_16, %c0_17] : memref<16x256xf32, #tpu.memory_space<vmem>>, vector<16x256xf32>
    tpu.vector_store %arg5[%c0_16, %c0_17], %14 {strides = array<i32>} : memref<16x256xf32, #tpu.memory_space<vmem>>, vector<16x256xf32>,
    %c0_18 = arith.constant 0 : index
    %c0_19 = arith.constant 0 : index
    %16 = vector.load %arg5[%c0_18, %c0_19] : memref<16x256xf32, #tpu.memory_space<vmem>>, vector<16x256xf32>
    %c0_20 = arith.constant 0 : index
    %c24 = arith.constant 24 : index
    %c0_21 = arith.constant 0 : index
    %17 = vector.load %arg1[%c0_20, %c24, %c0_21] : memref<16x64x256xbf16, #tpu.memory_space<vmem>>, vector<16x8x256xbf16>
    %18 = arith.extf %17 : vector<16x8x256xbf16> to vector<16x8x256xf32>
    %cst_22 = arith.constant dense<0.000000e+00> : vector<16x256xf32>
    %19 = vector.multi_reduction <add>, %18, %cst_22 [1] : vector<16x8x256xf32> to vector<16x256xf32>
    %20 = arith.addf %16, %19 : vector<16x256xf32>
    %c0_23 = arith.constant 0 : index
    %c0_24 = arith.constant 0 : index
    %21 = vector.load %arg5[%c0_23, %c0_24] : memref<16x256xf32, #tpu.memory_space<vmem>>, vector<16x256xf32>
    tpu.vector_store %arg5[%c0_23, %c0_24], %20 {strides = array<i32>} : memref<16x256xf32, #tpu.memory_space<vmem>>, vector<16x256xf32>,
    %c0_25 = arith.constant 0 : index
    %c0_26 = arith.constant 0 : index
    %22 = vector.load %arg5[%c0_25, %c0_26] : memref<16x256xf32, #tpu.memory_space<vmem>>, vector<16x256xf32>
    %c0_27 = arith.constant 0 : index
    %c32 = arith.constant 32 : index
    %c0_28 = arith.constant 0 : index
    %23 = vector.load %arg1[%c0_27, %c32, %c0_28] : memref<16x64x256xbf16, #tpu.memory_space<vmem>>, vector<16x8x256xbf16>
    %24 = arith.extf %23 : vector<16x8x256xbf16> to vector<16x8x256xf32>
    %cst_29 = arith.constant dense<0.000000e+00> : vector<16x256xf32>
    %25 = vector.multi_reduction <add>, %24, %cst_29 [1] : vector<16x8x256xf32> to vector<16x256xf32>
    %26 = arith.addf %22, %25 : vector<16x256xf32>
    %c0_30 = arith.constant 0 : index
    %c0_31 = arith.constant 0 : index
    %27 = vector.load %arg5[%c0_30, %c0_31] : memref<16x256xf32, #tpu.memory_space<vmem>>, vector<16x256xf32>
    tpu.vector_store %arg5[%c0_30, %c0_31], %26 {strides = array<i32>} : memref<16x256xf32, #tpu.memory_space<vmem>>, vector<16x256xf32>,
    %c0_32 = arith.constant 0 : index
    %c0_33 = arith.constant 0 : index
    %28 = vector.load %arg5[%c0_32, %c0_33] : memref<16x256xf32, #tpu.memory_space<vmem>>, vector<16x256xf32>
    %c0_34 = arith.constant 0 : index
    %c40 = arith.constant 40 : index
    %c0_35 = arith.constant 0 : index
    %29 = vector.load %arg1[%c0_34, %c40, %c0_35] : memref<16x64x256xbf16, #tpu.memory_space<vmem>>, vector<16x8x256xbf16>
    %30 = arith.extf %29 : vector<16x8x256xbf16> to vector<16x8x256xf32>
    %cst_36 = arith.constant dense<0.000000e+00> : vector<16x256xf32>
    %31 = vector.multi_reduction <add>, %30, %cst_36 [1] : vector<16x8x256xf32> to vector<16x256xf32>
    %32 = arith.addf %28, %31 : vector<16x256xf32>
    %c0_37 = arith.constant 0 : index
    %c0_38 = arith.constant 0 : index
    %33 = vector.load %arg5[%c0_37, %c0_38] : memref<16x256xf32, #tpu.memory_space<vmem>>, vector<16x256xf32>
    tpu.vector_store %arg5[%c0_37, %c0_38], %32 {strides = array<i32>} : memref<16x256xf32, #tpu.memory_space<vmem>>, vector<16x256xf32>,
    %c0_39 = arith.constant 0 : index
    %c0_40 = arith.constant 0 : index
    %34 = vector.load %arg5[%c0_39, %c0_40] : memref<16x256xf32, #tpu.memory_space<vmem>>, vector<16x256xf32>
    %c0_41 = arith.constant 0 : index
    %c48 = arith.constant 48 : index
    %c0_42 = arith.constant 0 : index
    %35 = vector.load %arg1[%c0_41, %c48, %c0_42] : memref<16x64x256xbf16, #tpu.memory_space<vmem>>, vector<16x8x256xbf16>
    %36 = arith.extf %35 : vector<16x8x256xbf16> to vector<16x8x256xf32>
    %cst_43 = arith.constant dense<0.000000e+00> : vector<16x256xf32>
    %37 = vector.multi_reduction <add>, %36, %cst_43 [1] : vector<16x8x256xf32> to vector<16x256xf32>
    %38 = arith.addf %34, %37 : vector<16x256xf32>
    %c0_44 = arith.constant 0 : index
    %c0_45 = arith.constant 0 : index
    %39 = vector.load %arg5[%c0_44, %c0_45] : memref<16x256xf32, #tpu.memory_space<vmem>>, vector<16x256xf32>
    tpu.vector_store %arg5[%c0_44, %c0_45], %38 {strides = array<i32>} : memref<16x256xf32, #tpu.memory_space<vmem>>, vector<16x256xf32>,
    %c0_46 = arith.constant 0 : index
    %c0_47 = arith.constant 0 : index
    %40 = vector.load %arg5[%c0_46, %c0_47] : memref<16x256xf32, #tpu.memory_space<vmem>>, vector<16x256xf32>
    %c0_48 = arith.constant 0 : index
    %c56 = arith.constant 56 : index
    %c0_49 = arith.constant 0 : index
    %41 = vector.load %arg1[%c0_48, %c56, %c0_49] : memref<16x64x256xbf16, #tpu.memory_space<vmem>>, vector<16x8x256xbf16>
    %42 = arith.extf %41 : vector<16x8x256xbf16> to vector<16x8x256xf32>
    %cst_50 = arith.constant dense<0.000000e+00> : vector<16x256xf32>
    %43 = vector.multi_reduction <add>, %42, %cst_50 [1] : vector<16x8x256xf32> to vector<16x256xf32>
    %44 = arith.addf %40, %43 : vector<16x256xf32>
    %c0_51 = arith.constant 0 : index
    %c0_52 = arith.constant 0 : index
    %45 = vector.load %arg5[%c0_51, %c0_52] : memref<16x256xf32, #tpu.memory_space<vmem>>, vector<16x256xf32>
    tpu.vector_store %arg5[%c0_51, %c0_52], %44 {strides = array<i32>} : memref<16x256xf32, #tpu.memory_space<vmem>>, vector<16x256xf32>,
    %c0_53 = arith.constant 0 : index
    %c0_54 = arith.constant 0 : index
    %46 = vector.load %arg5[%c0_53, %c0_54] : memref<16x256xf32, #tpu.memory_space<vmem>>, vector<16x256xf32>
    %cst_55 = arith.constant 1.562500e-02 : f32
    %47 = vector.broadcast %cst_55 : f32 to vector<16x256xf32>
    %48 = arith.mulf %46, %47 : vector<16x256xf32>
    %49 = arith.truncf %48 : vector<16x256xf32> to vector<16x256xbf16>
    %c0_56 = arith.constant 0 : index
    %c0_57 = arith.constant 0 : index
    %50 = vector.load %arg2[%c0_56, %c0_57] : memref<256x128xbf16, #tpu.memory_space<vmem>>, vector<256x128xbf16>
    %cst_58 = arith.constant dense<0.000000e+00> : vector<16x128xf32>
    %51 = tpu.matmul %49, %50, %cst_58 {dimension_numbers = #tpu.dot_dimension_numbers<[1], [0], [0], [1], [0, 0, 1, 1], [], []>} : vector<16x256xbf16>, vector<256x128xbf16>, vector<16x128xf32> -> vector<16x128xf32>
    %c0_59 = arith.constant 0 : index
    %c0_60 = arith.constant 0 : index
    %52 = vector.load %arg3[%c0_59, %c0_60] : memref<1x128xf32, #tpu.memory_space<vmem>>, vector<1x128xf32>
    %53 = vector.broadcast %52 : vector<1x128xf32> to vector<16x128xf32>
    %54 = arith.addf %51, %53 : vector<16x128xf32>
    %c0_61 = arith.constant 0 : index
    %c0_62 = arith.constant 0 : index
    %55 = vector.load %arg4[%c0_61, %c0_62] : memref<16x128xf32, #tpu.memory_space<vmem>>, vector<16x128xf32>
    tpu.vector_store %arg4[%c0_61, %c0_62], %54 {strides = array<i32>} : memref<16x128xf32, #tpu.memory_space<vmem>>, vector<16x128xf32>,
    return
  }
  func.func @transform_0(%arg0: i32) -> (i32, i32, i32) {
    %c0_i32 = arith.constant 0 : i32
    %c0_i32_0 = arith.constant 0 : i32
    %c0_i32_1 = arith.constant 0 : i32
    return %arg0, %c0_i32, %c0_i32_0 : i32, i32, i32
  }
  func.func @transform_1(%arg0: i32) -> (i32, i32) {
    %c0_i32 = arith.constant 0 : i32
    %c0_i32_0 = arith.constant 0 : i32
    %c0_i32_1 = arith.constant 0 : i32
    return %c0_i32, %c0_i32_0 : i32, i32
  }
  func.func @transform_2(%arg0: i32) -> (i32, i32) {
    %c0_i32 = arith.constant 0 : i32
    %c0_i32_0 = arith.constant 0 : i32
    %c0_i32_1 = arith.constant 0 : i32
    return %c0_i32, %c0_i32_0 : i32, i32
  }
  func.func @transform_3(%arg0: i32) -> (i32, i32) {
    %c0_i32 = arith.constant 0 : i32
    %c0_i32_0 = arith.constant 0 : i32
    return %arg0, %c0_i32 : i32, i32
  }
}

</mosaic_0001>

<bundles_post_ra>
// kernel: tpu_custom_call.1
= control target key start
LH: loop header
LB: loop body
LE: loop exit
PB: predicated region body
PF: predicated region fallthrough
CT: control target
= control target key end

     0   :  { %8 = vsyncpa [#allocation4], 0  ;;  %s4954_s0 = inlined_call_operand.hbm [shape: bf16[16,64,256], index: 0, kind: input, shape index: {}]   ;;  %s4955_s1 = inlined_call_operand.hbm [shape: bf16[256,128], index: 1, kind: input, shape index: {}]   ;;  %s4956_s2 = inlined_call_operand.vmem [shape: f32[1,128], index: 2, kind: input, shape index: {}]   ;;  %s4957_s3 = inlined_call_operand.hbm [shape: f32[16,128], index: 3, kind: output, shape index: {}]  }
   0x1   :  { %9 = vsyncpa [#allocation7], 0 }
   0x2   :  { %10 = vsyncpa [#allocation5], 0  ;;  %s2905_s12 = smov [#allocation3]  }
   0x3   :  { %s16_s13 = sshll.u32 %s2905_s12, 4  ;;  %s17_s13 = int_to_ptr.vmem [resolvable:$true] %s16_s13 }
   0x4   :  { %s2847_s14 = scalar_lea.vmem %s17_s13, 16384  ;;  %p2852_p1 = scmp.lt.s32.totalorder %s17_s13, %s17_s13 }
   0x5   :  { %p2848_p0 = scmp.ne.s32.totalorder %s17_s13, %s2847_s14  ;;  %p2853_p2 = scmp.lt.s32.totalorder %s2847_s14, %s2847_s14 }
   0x7   :  { %p2854_p3 = por %p2853_p2, %p2852_p1 }
   0x9   :  { %p2855_p4 = pnand %p2854_p3, %p2848_p0 }
   0xb   :  { %2858 = shalt.err (!%p2855_p4)
}
   0xc   :  { %s2906_s15 = smov 128   ;;  %s2907_s16 = smov 8  }
   0xd   :  { %22 = dma.hbm_to_vmem [thread:$0]  %s4954_s0, 16384, %s17_s13, [#allocation4], %s2906_s15, %s2906_s15, %s2907_s16  }
   0xe   :  { %s2908_s19 = smov [#allocation6]  }
   0xf   :  { %s28_s20 = sshll.u32 %s2908_s19, 4  ;;  %s29_s20 = int_to_ptr.vmem [resolvable:$true] %s28_s20 }
  0x10   :  { %s2867_s21 = scalar_lea.vmem %s29_s20, 2048  ;;  %p2872_p6 = scmp.lt.s32.totalorder %s29_s20, %s29_s20 }
  0x11   :  { %p2868_p5 = scmp.ne.s32.totalorder %s29_s20, %s2867_s21  ;;  %p2873_p7 = scmp.lt.s32.totalorder %s2867_s21, %s2867_s21 }
  0x13   :  { %p2874_p8 = por %p2873_p7, %p2872_p6 }
  0x15   :  { %p2875_p9 = pnand %p2874_p8, %p2868_p5 }
  0x17   :  { %2878 = shalt.err (!%p2875_p9)
}
  0x18   :  { %s2909_s22 = smov 64   ;;  %s2910_s23 = smov 4  }
  0x19   :  { %34 = dma.hbm_to_vmem [thread:$0]  %s4955_s1, 2048, %s29_s20, [#allocation7], %s2909_s22, %s2909_s22, %s2910_s23  }
  0x1a   :  { %2899 = dma.done.wait [#allocation4], 16384  }
  0x1b   :  { %2900 = vsyncadd [#allocation4], 4294950912 }
  0x1c   :  { %2901 = dma.done.wait [#allocation7], 2048  }
  0x1d   :  { %2902 = vsyncadd [#allocation7], 4294965248  ;;  %v44_v0 = vld [vmem:[#allocation3] sm:$0xff]  ;;  %vm316_vm0 = vcmask 1041409   ;;  %vm318_vm1 = vcmask 1042434   ;;  %vm320_vm2 = vcmask 1043459  }
  0x1e   :  { %v45_v1 = vld [vmem:[#allocation3 + $0x40] sm:$0xff]  ;;  %v60_v6 = vunpack.c.l.bf16 %v44_v0  ;;  %v61_v7 = vunpack.c.h.bf16 %v44_v0  ;;  %vm322_vm3 = vcmask 1044484   ;;  %vm324_vm4 = vcmask 1045509   ;;  %s2911_s26 = smov [#allocation8]  }
  0x1f   :  { %v46_v2 = vld [vmem:[#allocation3 + $0x80] sm:$0xff]  ;;  %v62_v8 = vunpack.c.l.bf16 %v45_v1  ;;  %v63_v9 = vunpack.c.h.bf16 %v45_v1  ;;  %vm326_vm5 = vcmask 1046534   ;;  %vm328_vm6 = vcmask 1047559   ;;  %s2764_s27 = sshll.u32 %s2911_s26, 4  ;;  %s2765_s27 = int_to_ptr.vmem [resolvable:$true] %s2764_s27 }
  0x20   :  { %v47_v3 = vld [vmem:[#allocation3 + $0xc0] sm:$0xff]  ;;  %v64_v13 = vunpack.c.l.bf16 %v46_v2  ;;  %v65_v14 = vunpack.c.h.bf16 %v46_v2  ;;  %v92_v48 = vrot.slane %v60_v6, 4  ;;  %v98_v49 = vrot.slane %v61_v7, 4  ;;  %s2879_s28 = scalar_lea.vmem %s2765_s27, 256  ;;  %p2884_p11 = scmp.lt.s32.totalorder %s2765_s27, %s2765_s27 }
  0x21   :  { %v2941_v4 = vld [vmem:[#allocation3 + $0x100] sm:$0xff]  ;;  %v66_v15 = vunpack.c.l.bf16 %v47_v3  ;;  %v67_v16 = vunpack.c.h.bf16 %v47_v3  ;;  %v104_v50 = vrot.slane %v62_v8, 4  ;;  %v110_v51 = vrot.slane %v63_v9, 4  ;;  %p2880_p10 = scmp.ne.s32.totalorder %s2765_s27, %s2879_s28  ;;  %p2885_p12 = scmp.lt.s32.totalorder %s2879_s28, %s2879_s28 }
  0x22   :  { %v2943_v5 = vld [vmem:[#allocation3 + $0x140] sm:$0xff]  ;;  %v68_v20 = vunpack.c.l.bf16 %v2941_v4  ;;  %v69_v21 = vunpack.c.h.bf16 %v2941_v4  ;;  %v116_v52 = vrot.slane %v64_v13, 4  ;;  %v122_v53 = vrot.slane %v65_v14, 4 }
  0x23   :  { %v2945_v10 = vld [vmem:[#allocation3 + $0x180] sm:$0xff]  ;;  %v70_v22 = vunpack.c.l.bf16 %v2943_v5  ;;  %v71_v23 = vunpack.c.h.bf16 %v2943_v5  ;;  %v128_v54 = vrot.slane %v66_v15, 4  ;;  %v134_v55 = vrot.slane %v67_v16, 4  ;;  %p2886_p13 = por %p2885_p12, %p2884_p11 }
  0x24   :  { %v2947_v11 = vld [vmem:[#allocation3 + $0x1c0] sm:$0xff]  ;;  %v72_v26 = vunpack.c.l.bf16 %v2945_v10  ;;  %v73_v27 = vunpack.c.h.bf16 %v2945_v10  ;;  %v93_v56 = vadd.f32 %v92_v48, %v60_v6  ;;  %v99_v57 = vadd.f32 %v98_v49, %v61_v7 }
  0x25   :  { %v2949_v12 = vld [vmem:[#allocation3 + $0x200] sm:$0xff]  ;;  %v74_v28 = vunpack.c.l.bf16 %v2947_v11  ;;  %v75_v29 = vunpack.c.h.bf16 %v2947_v11  ;;  %v105_v58 = vadd.f32 %v104_v50, %v62_v8  ;;  %v111_v59 = vadd.f32 %v110_v51, %v63_v9  ;;  %p2887_p0 = pnand %p2886_p13, %p2880_p10 }
  0x26   :  { %v2951_v17 = vld [vmem:[#allocation3 + $0x240] sm:$0xff]  ;;  %v76_v32 = vunpack.c.l.bf16 %v2949_v12  ;;  %v77_v33 = vunpack.c.h.bf16 %v2949_v12  ;;  %v117_v60 = vadd.f32 %v116_v52, %v64_v13  ;;  %v123_v61 = vadd.f32 %v122_v53, %v65_v14 }
  0x27   :  { %v2953_v18 = vld [vmem:[#allocation3 + $0x280] sm:$0xff]  ;;  %v78_v34 = vunpack.c.l.bf16 %v2951_v17  ;;  %v79_v35 = vunpack.c.h.bf16 %v2951_v17  ;;  %v129_v62 = vadd.f32 %v128_v54, %v66_v15  ;;  %v135_v63 = vadd.f32 %v134_v55, %v67_v16 }
  0x28   :  { %v2955_v19 = vld [vmem:[#allocation3 + $0x2c0] sm:$0xff]  ;;  %v80_v36 = vunpack.c.l.bf16 %v2953_v18  ;;  %v81_v37 = vunpack.c.h.bf16 %v2953_v18  ;;  %v94_v0 = vrot.slane %v93_v56, 2  ;;  %v100_v1 = vrot.slane %v99_v57, 2 }
  0x29   :  { %v2961_v24 = vld [vmem:[#allocation3 + $0x300] sm:$0xff]  ;;  %v82_v38 = vunpack.c.l.bf16 %v2955_v19  ;;  %v83_v39 = vunpack.c.h.bf16 %v2955_v19  ;;  %v106_v2 = vrot.slane %v105_v58, 2  ;;  %v112_v3 = vrot.slane %v111_v59, 2 }
  0x2a   :  { %v2963_v25 = vld [vmem:[#allocation3 + $0x340] sm:$0xff]  ;;  %v118_v47 = vrot.slane %v117_v60, 2  ;;  %v124_v46 = vrot.slane %v123_v61, 2  ;;  %v130_v45 = vrot.slane %v129_v62, 2  ;;  %v136_v44 = vrot.slane %v135_v63, 2 }
  0x2b   :  { %v2969_v30 = vld [vmem:[#allocation3 + $0x380] sm:$0xff]  ;;  %v95_v43 = vadd.f32 %v94_v0, %v93_v56  ;;  %v101_v42 = vadd.f32 %v100_v1, %v99_v57  ;;  %v107_v41 = vadd.f32 %v106_v2, %v105_v58  ;;  %v113_v40 = vadd.f32 %v112_v3, %v111_v59 }
  0x2c   :  { %v2971_v31 = vld [vmem:[#allocation3 + $0x3c0] sm:$0xff]  ;;  %v119_v6 = vadd.f32 %v118_v47, %v117_v60  ;;  %v125_v7 = vadd.f32 %v124_v46, %v123_v61  ;;  %v131_v8 = vadd.f32 %v130_v45, %v129_v62  ;;  %v137_v9 = vadd.f32 %v136_v44, %v135_v63 }
  0x2d   :  { %v96_v13 = vrot.slane %v95_v43, 1  ;;  %v102_v14 = vrot.slane %v101_v42, 1  ;;  %v108_v15 = vrot.slane %v107_v41, 1  ;;  %v114_v16 = vrot.slane %v113_v40, 1 }
  0x2e   :  { %v120_v48 = vrot.slane %v119_v6, 1  ;;  %v126_v49 = vrot.slane %v125_v7, 1  ;;  %v132_v50 = vrot.slane %v131_v8, 1  ;;  %v138_v51 = vrot.slane %v137_v9, 1 }
  0x2f   :  { %v2989_v52 = vadd.f32 %v96_v13, %v95_v43  ;;  %v2991_v53 = vadd.f32 %v102_v14, %v101_v42  ;;  %v2993_v54 = vadd.f32 %v108_v15, %v107_v41  ;;  %v2995_v55 = vadd.f32 %v114_v16, %v113_v40 }
  0x30   :  { %v2997_v47 = vadd.f32 %v120_v48, %v119_v6  ;;  %v2999_v45 = vadd.f32 %v126_v49, %v125_v7  ;;  %v3001_v44 = vadd.f32 %v132_v50, %v131_v8  ;;  %v3003_v46 = vadd.f32 %v138_v51, %v137_v9 }
  0x31   :  { %v140_v56 = vrot.slane %v68_v20, 4  ;;  %v146_v43 = vrot.slane %v69_v21, 4  ;;  %v152_v41 = vrot.slane %v70_v22, 4  ;;  %v158_v40 = vrot.slane %v71_v23, 4 }
  0x32   :  { %v164_v42 = vrot.slane %v72_v26, 4  ;;  %v170_v57 = vrot.slane %v73_v27, 4  ;;  %v176_v58 = vrot.slane %v74_v28, 4  ;;  %v182_v59 = vrot.slane %v75_v29, 4 }
  0x33   :  { %v141_v60 = vadd.f32 %v140_v56, %v68_v20  ;;  %v147_v61 = vadd.f32 %v146_v43, %v69_v21  ;;  %v153_v62 = vadd.f32 %v152_v41, %v70_v22  ;;  %v159_v63 = vadd.f32 %v158_v40, %v71_v23 }
  0x34   :  { %v165_v0 = vadd.f32 %v164_v42, %v72_v26  ;;  %v171_v1 = vadd.f32 %v170_v57, %v73_v27  ;;  %v177_v2 = vadd.f32 %v176_v58, %v74_v28  ;;  %v183_v20 = vadd.f32 %v182_v59, %v75_v29 }
  0x35   :  { %v142_v4 = vrot.slane %v141_v60, 2  ;;  %v148_v21 = vrot.slane %v147_v61, 2  ;;  %v154_v3 = vrot.slane %v153_v62, 2  ;;  %v160_v6 = vrot.slane %v159_v63, 2 }
  0x36   :  { %v166_v22 = vrot.slane %v165_v0, 2  ;;  %v172_v7 = vrot.slane %v171_v1, 2  ;;  %v178_v5 = vrot.slane %v177_v2, 2  ;;  %v184_v23 = vrot.slane %v183_v20, 2 }
  0x37   :  { %v143_v8 = vadd.f32 %v142_v4, %v141_v60  ;;  %v149_v9 = vadd.f32 %v148_v21, %v147_v61  ;;  %v155_v26 = vadd.f32 %v154_v3, %v153_v62  ;;  %v161_v13 = vadd.f32 %v160_v6, %v159_v63 }
  0x38   :  { %v167_v10 = vadd.f32 %v166_v22, %v165_v0  ;;  %v173_v27 = vadd.f32 %v172_v7, %v171_v1  ;;  %v179_v14 = vadd.f32 %v178_v5, %v177_v2  ;;  %v185_v15 = vadd.f32 %v184_v23, %v183_v20 }
  0x39   :  { %v144_v28 = vrot.slane %v143_v8, 1  ;;  %v150_v16 = vrot.slane %v149_v9, 1  ;;  %v156_v11 = vrot.slane %v155_v26, 1  ;;  %v162_v29 = vrot.slane %v161_v13, 1 }
  0x3a   :  { %v168_v48 = vrot.slane %v167_v10, 1  ;;  %v174_v49 = vrot.slane %v173_v27, 1  ;;  %v180_v50 = vrot.slane %v179_v14, 1  ;;  %v186_v51 = vrot.slane %v185_v15, 1 }
  0x3b   :  { %v3037_v56 = vadd.f32 %v144_v28, %v143_v8  ;;  %v3039_v43 = vadd.f32 %v150_v16, %v149_v9  ;;  %v3041_v41 = vadd.f32 %v156_v11, %v155_v26  ;;  %v3043_v40 = vadd.f32 %v162_v29, %v161_v13 }
  0x3c   :  { %v3045_v42 = vadd.f32 %v168_v48, %v167_v10  ;;  %v3047_v57 = vadd.f32 %v174_v49, %v173_v27  ;;  %v3049_v58 = vadd.f32 %v180_v50, %v179_v14  ;;  %v3051_v59 = vadd.f32 %v186_v51, %v185_v15 }
  0x3d   :  { %v188_v60 = vrot.slane %v76_v32, 4  ;;  %v194_v61 = vrot.slane %v77_v33, 4  ;;  %v200_v62 = vrot.slane %v78_v34, 4  ;;  %v206_v63 = vrot.slane %v79_v35, 4 }
  0x3e   :  { %v212_v0 = vrot.slane %v80_v36, 4  ;;  %v218_v1 = vrot.slane %v81_v37, 4  ;;  %v224_v2 = vrot.slane %v82_v38, 4  ;;  %v230_v20 = vrot.slane %v83_v39, 4 }
  0x3f   :  { %v189_v4 = vadd.f32 %v188_v60, %v76_v32  ;;  %v195_v21 = vadd.f32 %v194_v61, %v77_v33  ;;  %v201_v3 = vadd.f32 %v200_v62, %v78_v34  ;;  %v207_v6 = vadd.f32 %v206_v63, %v79_v35 }
  0x40   :  { %v213_v22 = vadd.f32 %v212_v0, %v80_v36  ;;  %v219_v7 = vadd.f32 %v218_v1, %v81_v37  ;;  %v225_v5 = vadd.f32 %v224_v2, %v82_v38  ;;  %v231_v32 = vadd.f32 %v230_v20, %v83_v39 }
  0x41   :  { %v190_v12 = vrot.slane %v189_v4, 2  ;;  %v196_v33 = vrot.slane %v195_v21, 2  ;;  %v202_v23 = vrot.slane %v201_v3, 2  ;;  %v208_v8 = vrot.slane %v207_v6, 2 }
  0x42   :  { %v214_v34 = vrot.slane %v213_v22, 2  ;;  %v220_v9 = vrot.slane %v219_v7, 2  ;;  %v226_v17 = vrot.slane %v225_v5, 2  ;;  %v232_v35 = vrot.slane %v231_v32, 2 }
  0x43   :  { %v191_v26 = vadd.f32 %v190_v12, %v189_v4  ;;  %v197_v13 = vadd.f32 %v196_v33, %v195_v21  ;;  %v203_v36 = vadd.f32 %v202_v23, %v201_v3  ;;  %v209_v10 = vadd.f32 %v208_v8, %v207_v6 }
  0x44   :  { %v215_v18 = vadd.f32 %v214_v34, %v213_v22  ;;  %v221_v37 = vadd.f32 %v220_v9, %v219_v7  ;;  %v227_v27 = vadd.f32 %v226_v17, %v225_v5  ;;  %v233_v14 = vadd.f32 %v232_v35, %v231_v32 }
  0x45   :  { %v192_v38 = vrot.slane %v191_v26, 1  ;;  %v198_v15 = vrot.slane %v197_v13, 1  ;;  %v204_v19 = vrot.slane %v203_v36, 1  ;;  %v210_v39 = vrot.slane %v209_v10, 1 }
  0x46   :  { %v216_v28 = vrot.slane %v215_v18, 1  ;;  %v222_v16 = vrot.slane %v221_v37, 1  ;;  %v228_v11 = vrot.slane %v227_v27, 1  ;;  %v234_v29 = vrot.slane %v233_v14, 1 }
  0x47   :  { %v3085_v48 = vadd.f32 %v192_v38, %v191_v26  ;;  %v3087_v49 = vadd.f32 %v198_v15, %v197_v13  ;;  %v3089_v50 = vadd.f32 %v204_v19, %v203_v36  ;;  %v3091_v51 = vadd.f32 %v210_v39, %v209_v10 }
  0x48   :  { %v3093_v60 = vadd.f32 %v216_v28, %v215_v18  ;;  %v3095_v61 = vadd.f32 %v222_v16, %v221_v37  ;;  %v3097_v62 = vadd.f32 %v228_v11, %v227_v27  ;;  %v3099_v63 = vadd.f32 %v234_v29, %v233_v14 }
  0x49   :  { %v4958_v0 = vunpack.c.l.bf16 %v2961_v24  ;;  %v4959_v2 = vunpack.c.h.bf16 %v2961_v24  ;;  %v4960_v4 = vunpack.c.l.bf16 %v2963_v25  ;;  %v4961_v3 = vunpack.c.h.bf16 %v2963_v25 }
  0x4a   :  { %v4962_v22 = vunpack.c.l.bf16 %v2969_v30  ;;  %v4963_v5 = vunpack.c.h.bf16 %v2969_v30  ;;  %v4964_v12 = vunpack.c.l.bf16 %v2971_v31  ;;  %v4965_v23 = vunpack.c.h.bf16 %v2971_v31 }
  0x4b   :  { %v236_v1 = vrot.slane %v4958_v0, 4  ;;  %v242_v20 = vrot.slane %v4959_v2, 4  ;;  %v248_v21 = vrot.slane %v4960_v4, 4  ;;  %v254_v6 = vrot.slane %v4961_v3, 4 }
  0x4c   :  { %v260_v7 = vrot.slane %v4962_v22, 4  ;;  %v266_v32 = vrot.slane %v4963_v5, 4  ;;  %v272_v33 = vrot.slane %v4964_v12, 4  ;;  %v278_v8 = vrot.slane %v4965_v23, 4 }
  0x4d   :  { %v4966_v34 = vmov %v4958_v0  ;;  %v4967_v17 = vmov %v4959_v2  ;;  %v4968_v26 = vmov %v4960_v4  ;;  %v4969_v36 = vmov %v4961_v3 }
  0x4e   :  { %v237_v9 = vadd.f32 %v236_v1, %v4966_v34  ;;  %v243_v35 = vadd.f32 %v242_v20, %v4967_v17  ;;  %v249_v13 = vadd.f32 %v248_v21, %v4968_v26  ;;  %v255_v10 = vadd.f32 %v254_v6, %v4969_v36 }
  0x4f   :  { %v4970_v18 = vmov %v4962_v22  ;;  %v4971_v27 = vmov %v4963_v5  ;;  %v4972_v38 = vmov %v4964_v12  ;;  %v4973_v19 = vmov %v4965_v23 }
  0x50   :  { %v261_v37 = vadd.f32 %v260_v7, %v4970_v18  ;;  %v267_v14 = vadd.f32 %v266_v32, %v4971_v27  ;;  %v273_v15 = vadd.f32 %v272_v33, %v4972_v38  ;;  %v279_v24 = vadd.f32 %v278_v8, %v4973_v19 }
  0x51   :  { %v238_v39 = vrot.slane %v237_v9, 2  ;;  %v244_v28 = vrot.slane %v243_v35, 2  ;;  %v250_v16 = vrot.slane %v249_v13, 2  ;;  %v256_v11 = vrot.slane %v255_v10, 2 }
  0x52   :  { %v262_v25 = vrot.slane %v261_v37, 2  ;;  %v268_v29 = vrot.slane %v267_v14, 2  ;;  %v274_v0 = vrot.slane %v273_v15, 2  ;;  %v280_v1 = vrot.slane %v279_v24, 2 }
  0x53   :  { %v239_v2 = vadd.f32 %v238_v39, %v237_v9  ;;  %v245_v30 = vadd.f32 %v244_v28, %v243_v35  ;;  %v251_v20 = vadd.f32 %v250_v16, %v249_v13  ;;  %v257_v4 = vadd.f32 %v256_v11, %v255_v10  ;;  %v3201_v16 = vld [vmem:[#allocation3 + $0x108] sm:$0xff] }
  0x54   :  { %v263_v21 = vadd.f32 %v262_v25, %v261_v37  ;;  %v269_v3 = vadd.f32 %v268_v29, %v267_v14  ;;  %v275_v31 = vadd.f32 %v274_v0, %v273_v15  ;;  %v281_v6 = vadd.f32 %v280_v1, %v279_v24  ;;  %v3183_v24 = vld [vmem:[#allocation3 + $0x88] sm:$0xff] }
  0x55   :  { %v240_v22 = vrot.slane %v239_v2, 1  ;;  %v246_v7 = vrot.slane %v245_v30, 1  ;;  %v252_v5 = vrot.slane %v251_v20, 1  ;;  %v258_v32 = vrot.slane %v257_v4, 1  ;;  %v3203_v11 = vld [vmem:[#allocation3 + $0x148] sm:$0xff] }
  0x56   :  { %v264_v12 = vrot.slane %v263_v21, 1  ;;  %v270_v33 = vrot.slane %v269_v3, 1  ;;  %v276_v23 = vrot.slane %v275_v31, 1  ;;  %v282_v8 = vrot.slane %v281_v6, 1  ;;  %v3205_v25 = vld [vmem:[#allocation3 + $0x188] sm:$0xff] }
  0x57   :  { %v241_v34 = vadd.f32 %v240_v22, %v239_v2  ;;  %v247_v17 = vadd.f32 %v246_v7, %v245_v30  ;;  %v253_v9 = vadd.f32 %v252_v5, %v251_v20  ;;  %v259_v35 = vadd.f32 %v258_v32, %v257_v4  ;;  %v3207_v29 = vld [vmem:[#allocation3 + $0x1c8] sm:$0xff] }
  0x58   :  { %v265_v26 = vadd.f32 %v264_v12, %v263_v21  ;;  %v271_v13 = vadd.f32 %v270_v33, %v269_v3  ;;  %v277_v36 = vadd.f32 %v276_v23, %v275_v31  ;;  %v283_v10 = vadd.f32 %v282_v8, %v281_v6  ;;  %v3213_v2 = vld [vmem:[#allocation3 + $0x208] sm:$0xff] }
  0x59   :  { %v317_v18 = vsel %vm316_vm0, %v2993_v54, %v2989_v52  ;;  %v330_v37 = vsel %vm316_vm0, %v2995_v55, %v2991_v53  ;;  %v337_v27 = vsel %vm316_vm0, %v3089_v50, %v3085_v48  ;;  %v344_v14 = vsel %vm316_vm0, %v3091_v51, %v3087_v49  ;;  %v3215_v30 = vld [vmem:[#allocation3 + $0x248] sm:$0xff] }
  0x5a   :  { %v319_v38 = vsel %vm318_vm1, %v2997_v47, %v317_v18  ;;  %v331_v15 = vsel %vm318_vm1, %v2999_v45, %v330_v37  ;;  %v338_v52 = vsel %vm318_vm1, %v3093_v60, %v337_v27  ;;  %v345_v53 = vsel %vm318_vm1, %v3095_v61, %v344_v14  ;;  %v3221_v31 = vld [vmem:[#allocation3 + $0x288] sm:$0xff] }
  0x5b   :  { %v321_v54 = vsel %vm320_vm2, %v3001_v44, %v319_v38  ;;  %v332_v55 = vsel %vm320_vm2, %v3003_v46, %v331_v15  ;;  %v339_v48 = vsel %vm320_vm2, %v3097_v62, %v338_v52  ;;  %v346_v47 = vsel %vm320_vm2, %v3099_v63, %v345_v53  ;;  %v3173_v62 = vld [vmem:[#allocation3 + $0x8] sm:$0xff] }
  0x5c   :  { %v323_v45 = vsel %vm322_vm3, %v3037_v56, %v321_v54  ;;  %v333_v49 = vsel %vm322_vm3, %v3039_v43, %v332_v55  ;;  %v340_v50 = vsel %vm322_vm3, %v241_v34, %v339_v48  ;;  %v347_v51 = vsel %vm322_vm3, %v247_v17, %v346_v47  ;;  %v3175_v56 = vld [vmem:[#allocation3 + $0x48] sm:$0xff] }
  0x5d   :  { %v325_v44 = vsel %vm324_vm4, %v3041_v41, %v323_v45  ;;  %v334_v46 = vsel %vm324_vm4, %v3043_v40, %v333_v49  ;;  %v341_v60 = vsel %vm324_vm4, %v253_v9, %v340_v50  ;;  %v348_v61 = vsel %vm324_vm4, %v259_v35, %v347_v51  ;;  %v3185_v40 = vld [vmem:[#allocation3 + $0xc8] sm:$0xff] }
  0x5e   :  { %v327_v43 = vsel %vm326_vm5, %v3045_v42, %v325_v44  ;;  %v335_v63 = vsel %vm326_vm5, %v3047_v57, %v334_v46  ;;  %v342_v19 = vsel %vm326_vm5, %v265_v26, %v341_v60  ;;  %v349_v41 = vsel %vm326_vm5, %v271_v13, %v348_v61  ;;  %v3223_v6 = vld [vmem:[#allocation3 + $0x2c8] sm:$0xff] }
  0x5f   :  { %v3189_v39 = vsel %vm328_vm6, %v3049_v58, %v327_v43  ;;  %v3193_v28 = vsel %vm328_vm6, %v3051_v59, %v335_v63  ;;  %v3196_v42 = vsel %vm328_vm6, %v277_v36, %v342_v19  ;;  %v3199_v57 = vsel %vm328_vm6, %v283_v10, %v349_v41  ;;  %v3229_v12 = vld [vmem:[#allocation3 + $0x308] sm:$0xff] }
  0x60   :  { %v379_v58 = vunpack.c.l.bf16 %v3173_v62  ;;  %v380_v0 = vunpack.c.h.bf16 %v3173_v62  ;;  %v381_v59 = vunpack.c.l.bf16 %v3175_v56  ;;  %v382_v1 = vunpack.c.h.bf16 %v3175_v56  ;;  %v3231_v33 = vld [vmem:[#allocation3 + $0x348] sm:$0xff] }
  0x61   :  { %v383_v20 = vunpack.c.l.bf16 %v3183_v24  ;;  %v384_v4 = vunpack.c.h.bf16 %v3183_v24  ;;  %v385_v21 = vunpack.c.l.bf16 %v3185_v40  ;;  %v386_v3 = vunpack.c.h.bf16 %v3185_v40  ;;  %v3237_v9 = vld [vmem:[#allocation3 + $0x388] sm:$0xff] }
  0x62   :  { %v387_v22 = vunpack.c.l.bf16 %v3201_v16  ;;  %v388_v7 = vunpack.c.h.bf16 %v3201_v16  ;;  %v389_v5 = vunpack.c.l.bf16 %v3203_v11  ;;  %v390_v32 = vunpack.c.h.bf16 %v3203_v11  ;;  %v3239_v35 = vld [vmem:[#allocation3 + $0x3c8] sm:$0xff] }
  0x63   :  { %v391_v23 = vunpack.c.l.bf16 %v3205_v25  ;;  %v392_v8 = vunpack.c.h.bf16 %v3205_v25  ;;  %v393_v34 = vunpack.c.l.bf16 %v3207_v29  ;;  %v394_v17 = vunpack.c.h.bf16 %v3207_v29 }
  0x64   :  { %v395_v26 = vunpack.c.l.bf16 %v3213_v2  ;;  %v396_v13 = vunpack.c.h.bf16 %v3213_v2  ;;  %v397_v36 = vunpack.c.l.bf16 %v3215_v30  ;;  %v398_v10 = vunpack.c.h.bf16 %v3215_v30 }
  0x65   :  { %v411_v45 = vrot.slane %v379_v58, 4  ;;  %v417_v49 = vrot.slane %v380_v0, 4  ;;  %v423_v50 = vrot.slane %v381_v59, 4  ;;  %v429_v51 = vrot.slane %v382_v1, 4 }
  0x66   :  { %v435_v44 = vrot.slane %v383_v20, 4  ;;  %v441_v46 = vrot.slane %v384_v4, 4  ;;  %v447_v60 = vrot.slane %v385_v21, 4  ;;  %v453_v61 = vrot.slane %v386_v3, 4 }
  0x67   :  { %v412_v62 = vadd.f32 %v411_v45, %v379_v58  ;;  %v418_v56 = vadd.f32 %v417_v49, %v380_v0  ;;  %v424_v43 = vadd.f32 %v423_v50, %v381_v59  ;;  %v430_v63 = vadd.f32 %v429_v51, %v382_v1 }
  0x68   :  { %v436_v19 = vadd.f32 %v435_v44, %v383_v20  ;;  %v442_v41 = vadd.f32 %v441_v46, %v384_v4  ;;  %v448_v24 = vadd.f32 %v447_v60, %v385_v21  ;;  %v454_v40 = vadd.f32 %v453_v61, %v386_v3 }
  0x69   :  { %v413_v55 = vrot.slane %v412_v62, 2  ;;  %v419_v48 = vrot.slane %v418_v56, 2  ;;  %v425_v54 = vrot.slane %v424_v43, 2  ;;  %v431_v47 = vrot.slane %v430_v63, 2 }
  0x6a   :  { %v437_v53 = vrot.slane %v436_v19, 2  ;;  %v443_v52 = vrot.slane %v442_v41, 2  ;;  %v449_v15 = vrot.slane %v448_v24, 2  ;;  %v455_v38 = vrot.slane %v454_v40, 2 }
  0x6b   :  { %v414_v14 = vadd.f32 %v413_v55, %v412_v62  ;;  %v420_v27 = vadd.f32 %v419_v48, %v418_v56  ;;  %v426_v37 = vadd.f32 %v425_v54, %v424_v43  ;;  %v432_v18 = vadd.f32 %v431_v47, %v430_v63 }
  0x6c   :  { %v438_v58 = vadd.f32 %v437_v53, %v436_v19  ;;  %v444_v0 = vadd.f32 %v443_v52, %v442_v41  ;;  %v450_v59 = vadd.f32 %v449_v15, %v448_v24  ;;  %v456_v1 = vadd.f32 %v455_v38, %v454_v40 }
  0x6d   :  { %v415_v20 = vrot.slane %v414_v14, 1  ;;  %v421_v4 = vrot.slane %v420_v27, 1  ;;  %v427_v21 = vrot.slane %v426_v37, 1  ;;  %v433_v3 = vrot.slane %v432_v18, 1 }
  0x6e   :  { %v439_v45 = vrot.slane %v438_v58, 1  ;;  %v445_v49 = vrot.slane %v444_v0, 1  ;;  %v451_v50 = vrot.slane %v450_v59, 1  ;;  %v457_v51 = vrot.slane %v456_v1, 1 }
  0x6f   :  { %v3257_v44 = vadd.f32 %v415_v20, %v414_v14  ;;  %v3259_v46 = vadd.f32 %v421_v4, %v420_v27  ;;  %v3261_v55 = vadd.f32 %v427_v21, %v426_v37  ;;  %v3263_v54 = vadd.f32 %v433_v3, %v432_v18 }
  0x70   :  { %v3265_v53 = vadd.f32 %v439_v45, %v438_v58  ;;  %v3267_v15 = vadd.f32 %v445_v49, %v444_v0  ;;  %v3269_v38 = vadd.f32 %v451_v50, %v450_v59  ;;  %v3271_v52 = vadd.f32 %v457_v51, %v456_v1 }
  0x71   :  { %v459_v48 = vrot.slane %v387_v22, 4  ;;  %v465_v14 = vrot.slane %v388_v7, 4  ;;  %v471_v37 = vrot.slane %v389_v5, 4  ;;  %v477_v18 = vrot.slane %v390_v32, 4 }
  0x72   :  { %v483_v27 = vrot.slane %v391_v23, 4  ;;  %v489_v47 = vrot.slane %v392_v8, 4  ;;  %v495_v60 = vrot.slane %v393_v34, 4  ;;  %v501_v61 = vrot.slane %v394_v17, 4 }
  0x73   :  { %v460_v62 = vadd.f32 %v459_v48, %v387_v22  ;;  %v466_v56 = vadd.f32 %v465_v14, %v388_v7  ;;  %v472_v43 = vadd.f32 %v471_v37, %v389_v5  ;;  %v478_v63 = vadd.f32 %v477_v18, %v390_v32 }
  0x74   :  { %v484_v19 = vadd.f32 %v483_v27, %v391_v23  ;;  %v490_v41 = vadd.f32 %v489_v47, %v392_v8  ;;  %v496_v24 = vadd.f32 %v495_v60, %v393_v34  ;;  %v502_v22 = vadd.f32 %v501_v61, %v394_v17 }
  0x75   :  { %v461_v16 = vrot.slane %v460_v62, 2  ;;  %v467_v7 = vrot.slane %v466_v56, 2  ;;  %v473_v40 = vrot.slane %v472_v43, 2  ;;  %v479_v58 = vrot.slane %v478_v63, 2 }
  0x76   :  { %v485_v5 = vrot.slane %v484_v19, 2  ;;  %v491_v0 = vrot.slane %v490_v41, 2  ;;  %v497_v11 = vrot.slane %v496_v24, 2  ;;  %v503_v32 = vrot.slane %v502_v22, 2 }
  0x77   :  { %v462_v59 = vadd.f32 %v461_v16, %v460_v62  ;;  %v468_v1 = vadd.f32 %v467_v7, %v466_v56  ;;  %v474_v23 = vadd.f32 %v473_v40, %v472_v43  ;;  %v480_v20 = vadd.f32 %v479_v58, %v478_v63 }
  0x78   :  { %v486_v25 = vadd.f32 %v485_v5, %v484_v19  ;;  %v492_v8 = vadd.f32 %v491_v0, %v490_v41  ;;  %v498_v4 = vadd.f32 %v497_v11, %v496_v24  ;;  %v504_v21 = vadd.f32 %v503_v32, %v502_v22 }
  0x79   :  { %v463_v34 = vrot.slane %v462_v59, 1  ;;  %v469_v3 = vrot.slane %v468_v1, 1  ;;  %v475_v29 = vrot.slane %v474_v23, 1  ;;  %v481_v17 = vrot.slane %v480_v20, 1 }
  0x7a   :  { %v487_v45 = vrot.slane %v486_v25, 1  ;;  %v493_v49 = vrot.slane %v492_v8, 1  ;;  %v499_v50 = vrot.slane %v498_v4, 1  ;;  %v505_v51 = vrot.slane %v504_v21, 1 }
  0x7b   :  { %v3305_v48 = vadd.f32 %v463_v34, %v462_v59  ;;  %v3307_v14 = vadd.f32 %v469_v3, %v468_v1  ;;  %v3309_v37 = vadd.f32 %v475_v29, %v474_v23  ;;  %v3311_v18 = vadd.f32 %v481_v17, %v480_v20 }
  0x7c   :  { %v3313_v27 = vadd.f32 %v487_v45, %v486_v25  ;;  %v3315_v47 = vadd.f32 %v493_v49, %v492_v8  ;;  %v3317_v60 = vadd.f32 %v499_v50, %v498_v4  ;;  %v3319_v61 = vadd.f32 %v505_v51, %v504_v21 }
  0x7d   :  { %v507_v62 = vrot.slane %v395_v26, 4  ;;  %v513_v56 = vrot.slane %v396_v13, 4  ;;  %v519_v43 = vrot.slane %v397_v36, 4  ;;  %v525_v63 = vrot.slane %v398_v10, 4 }
  0x7e   :  { %v4974_v19 = vunpack.c.l.bf16 %v3221_v31  ;;  %v4975_v24 = vunpack.c.h.bf16 %v3221_v31  ;;  %v4976_v16 = vunpack.c.l.bf16 %v3223_v6  ;;  %v4977_v40 = vunpack.c.h.bf16 %v3223_v6 }
  0x7f   :  { %v508_v5 = vadd.f32 %v507_v62, %v395_v26  ;;  %v514_v0 = vadd.f32 %v513_v56, %v396_v13  ;;  %v520_v11 = vadd.f32 %v519_v43, %v397_v36  ;;  %v526_v32 = vadd.f32 %v525_v63, %v398_v10 }
  0x80   :  { %v531_v41 = vrot.slane %v4974_v19, 4  ;;  %v537_v22 = vrot.slane %v4975_v24, 4  ;;  %v543_v7 = vrot.slane %v4976_v16, 4  ;;  %v549_v58 = vrot.slane %v4977_v40, 4 }
  0x81   :  { %v4978_v59 = vmov %v4974_v19  ;;  %v4979_v23 = vmov %v4975_v24  ;;  %v4980_v25 = vmov %v4976_v16  ;;  %v4981_v26 = vmov %v4977_v40 }
  0x82   :  { %v532_v1 = vadd.f32 %v531_v41, %v4978_v59  ;;  %v538_v20 = vadd.f32 %v537_v22, %v4979_v23  ;;  %v544_v8 = vadd.f32 %v543_v7, %v4980_v25  ;;  %v550_v4 = vadd.f32 %v549_v58, %v4981_v26 }
  0x83   :  { %v509_v2 = vrot.slane %v508_v5, 2  ;;  %v515_v13 = vrot.slane %v514_v0, 2  ;;  %v521_v21 = vrot.slane %v520_v11, 2  ;;  %v527_v34 = vrot.slane %v526_v32, 2 }
  0x84   :  { %v533_v36 = vrot.slane %v532_v1, 2  ;;  %v539_v3 = vrot.slane %v538_v20, 2  ;;  %v545_v30 = vrot.slane %v544_v8, 2  ;;  %v551_v10 = vrot.slane %v550_v4, 2 }
  0x85   :  { %v510_v29 = vadd.f32 %v509_v2, %v508_v5  ;;  %v516_v17 = vadd.f32 %v515_v13, %v514_v0  ;;  %v522_v45 = vadd.f32 %v521_v21, %v520_v11  ;;  %v528_v49 = vadd.f32 %v527_v34, %v526_v32 }
  0x86   :  { %v534_v31 = vadd.f32 %v533_v36, %v532_v1  ;;  %v540_v50 = vadd.f32 %v539_v3, %v538_v20  ;;  %v546_v51 = vadd.f32 %v545_v30, %v544_v8  ;;  %v552_v62 = vadd.f32 %v551_v10, %v550_v4 }
  0x87   :  { %v511_v56 = vrot.slane %v510_v29, 1  ;;  %v517_v43 = vrot.slane %v516_v17, 1  ;;  %v523_v6 = vrot.slane %v522_v45, 1  ;;  %v529_v63 = vrot.slane %v528_v49, 1 }
  0x88   :  { %v535_v19 = vrot.slane %v534_v31, 1  ;;  %v541_v41 = vrot.slane %v540_v50, 1  ;;  %v547_v24 = vrot.slane %v546_v51, 1  ;;  %v553_v22 = vrot.slane %v552_v62, 1 }
  0x89   :  { %v512_v16 = vadd.f32 %v511_v56, %v510_v29  ;;  %v518_v7 = vadd.f32 %v517_v43, %v516_v17  ;;  %v524_v40 = vadd.f32 %v523_v6, %v522_v45  ;;  %v530_v58 = vadd.f32 %v529_v63, %v528_v49 }
  0x8a   :  { %v536_v5 = vadd.f32 %v535_v19, %v534_v31  ;;  %v542_v0 = vadd.f32 %v541_v41, %v540_v50  ;;  %v548_v11 = vadd.f32 %v547_v24, %v546_v51  ;;  %v554_v32 = vadd.f32 %v553_v22, %v552_v62 }
  0x8b   :  { %v4982_v59 = vunpack.c.l.bf16 %v3229_v12  ;;  %v4983_v23 = vunpack.c.h.bf16 %v3229_v12  ;;  %v4984_v25 = vunpack.c.l.bf16 %v3231_v33  ;;  %v4985_v26 = vunpack.c.h.bf16 %v3231_v33 }
  0x8c   :  { %v4986_v2 = vunpack.c.l.bf16 %v3237_v9  ;;  %v4987_v21 = vunpack.c.h.bf16 %v3237_v9  ;;  %v4988_v36 = vunpack.c.l.bf16 %v3239_v35  ;;  %v4989_v30 = vunpack.c.h.bf16 %v3239_v35 }
  0x8d   :  { %v555_v1 = vrot.slane %v4982_v59, 4  ;;  %v561_v20 = vrot.slane %v4983_v23, 4  ;;  %v567_v8 = vrot.slane %v4984_v25, 4  ;;  %v573_v4 = vrot.slane %v4985_v26, 4 }
  0x8e   :  { %v579_v13 = vrot.slane %v4986_v2, 4  ;;  %v585_v34 = vrot.slane %v4987_v21, 4  ;;  %v591_v3 = vrot.slane %v4988_v36, 4  ;;  %v597_v10 = vrot.slane %v4989_v30, 4 }
  0x8f   :  { %v4990_v29 = vmov %v4982_v59  ;;  %v4991_v45 = vmov %v4983_v23  ;;  %v4992_v31 = vmov %v4984_v25  ;;  %v4993_v51 = vmov %v4985_v26 }
  0x90   :  { %v556_v17 = vadd.f32 %v555_v1, %v4990_v29  ;;  %v562_v49 = vadd.f32 %v561_v20, %v4991_v45  ;;  %v568_v50 = vadd.f32 %v567_v8, %v4992_v31  ;;  %v574_v62 = vadd.f32 %v573_v4, %v4993_v51 }
  0x91   :  { %v4994_v56 = vmov %v4986_v2  ;;  %v4995_v6 = vmov %v4987_v21  ;;  %v4996_v19 = vmov %v4988_v36  ;;  %v4997_v24 = vmov %v4989_v30 }
  0x92   :  { %v580_v43 = vadd.f32 %v579_v13, %v4994_v56  ;;  %v586_v63 = vadd.f32 %v585_v34, %v4995_v6  ;;  %v592_v41 = vadd.f32 %v591_v3, %v4996_v19  ;;  %v598_v22 = vadd.f32 %v597_v10, %v4997_v24 }
  0x93   :  { %v557_v12 = vrot.slane %v556_v17, 2  ;;  %v563_v59 = vrot.slane %v562_v49, 2  ;;  %v569_v1 = vrot.slane %v568_v50, 2  ;;  %v575_v23 = vrot.slane %v574_v62, 2 }
  0x94   :  { %v581_v20 = vrot.slane %v580_v43, 2  ;;  %v587_v25 = vrot.slane %v586_v63, 2  ;;  %v593_v33 = vrot.slane %v592_v41, 2  ;;  %v599_v8 = vrot.slane %v598_v22, 2 }
  0x95   :  { %v558_v26 = vadd.f32 %v557_v12, %v556_v17  ;;  %v564_v4 = vadd.f32 %v563_v59, %v562_v49  ;;  %v570_v2 = vadd.f32 %v569_v1, %v568_v50  ;;  %v576_v13 = vadd.f32 %v575_v23, %v574_v62 }
  0x96   :  { %v582_v9 = vadd.f32 %v581_v20, %v580_v43  ;;  %v588_v21 = vadd.f32 %v587_v25, %v586_v63  ;;  %v594_v34 = vadd.f32 %v593_v33, %v592_v41  ;;  %v600_v36 = vadd.f32 %v599_v8, %v598_v22  ;;  %v3433_v25 = vld [vmem:[#allocation3 + $0x90] sm:$0xff] }
  0x97   :  { %v559_v3 = vrot.slane %v558_v26, 1  ;;  %v565_v30 = vrot.slane %v564_v4, 1  ;;  %v571_v35 = vrot.slane %v570_v2, 1  ;;  %v577_v10 = vrot.slane %v576_v13, 1 }
  0x98   :  { %v583_v29 = vrot.slane %v582_v9, 1  ;;  %v589_v45 = vrot.slane %v588_v21, 1  ;;  %v595_v31 = vrot.slane %v594_v34, 1  ;;  %v601_v51 = vrot.slane %v600_v36, 1 }
  0x99   :  { %v560_v56 = vadd.f32 %v559_v3, %v558_v26  ;;  %v566_v6 = vadd.f32 %v565_v30, %v564_v4  ;;  %v572_v19 = vadd.f32 %v571_v35, %v570_v2  ;;  %v578_v24 = vadd.f32 %v577_v10, %v576_v13  ;;  %v3451_v4 = vld [vmem:[#allocation3 + $0x150] sm:$0xff] }
  0x9a   :  { %v584_v17 = vadd.f32 %v583_v29, %v582_v9  ;;  %v590_v49 = vadd.f32 %v589_v45, %v588_v21  ;;  %v596_v50 = vadd.f32 %v595_v31, %v594_v34  ;;  %v602_v62 = vadd.f32 %v601_v51, %v600_v36  ;;  %v3453_v2 = vld [vmem:[#allocation3 + $0x190] sm:$0xff] }
  0x9b   :  { %v635_v43 = vsel %vm316_vm0, %v3261_v55, %v3257_v44  ;;  %v642_v63 = vsel %vm316_vm0, %v3263_v54, %v3259_v46  ;;  %v649_v41 = vsel %vm316_vm0, %v524_v40, %v512_v16  ;;  %v656_v22 = vsel %vm316_vm0, %v530_v58, %v518_v7  ;;  %v3455_v13 = vld [vmem:[#allocation3 + $0x1d0] sm:$0xff] }
  0x9c   :  { %v636_v12 = vsel %vm318_vm1, %v3265_v53, %v635_v43  ;;  %v643_v59 = vsel %vm318_vm1, %v3267_v15, %v642_v63  ;;  %v650_v1 = vsel %vm318_vm1, %v536_v5, %v649_v41  ;;  %v657_v23 = vsel %vm318_vm1, %v542_v0, %v656_v22  ;;  %v3461_v21 = vld [vmem:[#allocation3 + $0x210] sm:$0xff] }
  0x9d   :  { %v637_v44 = vsel %vm320_vm2, %v3269_v38, %v636_v12  ;;  %v644_v46 = vsel %vm320_vm2, %v3271_v52, %v643_v59  ;;  %v651_v55 = vsel %vm320_vm2, %v548_v11, %v650_v1  ;;  %v658_v54 = vsel %vm320_vm2, %v554_v32, %v657_v23  ;;  %v3423_v11 = vld [vmem:[#allocation3 + $0x10] sm:$0xff] }
  0x9e   :  { %v638_v53 = vsel %vm322_vm3, %v3305_v48, %v637_v44  ;;  %v645_v15 = vsel %vm322_vm3, %v3307_v14, %v644_v46  ;;  %v652_v16 = vsel %vm322_vm3, %v560_v56, %v651_v55  ;;  %v659_v7 = vsel %vm322_vm3, %v566_v6, %v658_v54  ;;  %v3469_v35 = vld [vmem:[#allocation3 + $0x290] sm:$0xff] }
  0x9f   :  { %v639_v38 = vsel %vm324_vm4, %v3309_v37, %v638_v53  ;;  %v646_v52 = vsel %vm324_vm4, %v3311_v18, %v645_v15  ;;  %v653_v40 = vsel %vm324_vm4, %v572_v19, %v652_v16  ;;  %v660_v58 = vsel %vm324_vm4, %v578_v24, %v659_v7  ;;  %v3425_v37 = vld [vmem:[#allocation3 + $0x50] sm:$0xff] }
  0xa0   :  { %v640_v48 = vsel %vm326_vm5, %v3313_v27, %v639_v38  ;;  %v647_v14 = vsel %vm326_vm5, %v3315_v47, %v646_v52  ;;  %v654_v5 = vsel %vm326_vm5, %v584_v17, %v653_v40  ;;  %v661_v0 = vsel %vm326_vm5, %v590_v49, %v660_v58  ;;  %v3435_v47 = vld [vmem:[#allocation3 + $0xd0] sm:$0xff] }
  0xa1   :  { %v641_v18 = vsel %vm328_vm6, %v3317_v60, %v640_v48  ;;  %v648_v32 = vsel %vm328_vm6, %v3319_v61, %v647_v14  ;;  %v655_v20 = vsel %vm328_vm6, %v596_v50, %v654_v5  ;;  %v662_v27 = vsel %vm328_vm6, %v602_v62, %v661_v0  ;;  %v3449_v61 = vld [vmem:[#allocation3 + $0x110] sm:$0xff] }
  0xa2   :  { %v3438_v33 = vadd.f32 %v641_v18, %v3189_v39  ;;  %v3441_v8 = vadd.f32 %v648_v32, %v3193_v28  ;;  %v3444_v26 = vadd.f32 %v655_v20, %v3196_v42  ;;  %v3447_v60 = vadd.f32 %v662_v27, %v3199_v57  ;;  %v3463_v57 = vld [vmem:[#allocation3 + $0x250] sm:$0xff] }
  0xa3   :  { %v695_v39 = vunpack.c.l.bf16 %v3423_v11  ;;  %v696_v9 = vunpack.c.h.bf16 %v3423_v11  ;;  %v697_v28 = vunpack.c.l.bf16 %v3425_v37  ;;  %v698_v42 = vunpack.c.h.bf16 %v3425_v37  ;;  %v3471_v10 = vld [vmem:[#allocation3 + $0x2d0] sm:$0xff] }
  0xa4   :  { %v699_v34 = vunpack.c.l.bf16 %v3433_v25  ;;  %v700_v36 = vunpack.c.h.bf16 %v3433_v25  ;;  %v701_v3 = vunpack.c.l.bf16 %v3435_v47  ;;  %v702_v30 = vunpack.c.h.bf16 %v3435_v47  ;;  %v3477_v56 = vld [vmem:[#allocation3 + $0x310] sm:$0xff] }
  0xa5   :  { %v703_v29 = vunpack.c.l.bf16 %v3449_v61  ;;  %v704_v45 = vunpack.c.h.bf16 %v3449_v61  ;;  %v705_v31 = vunpack.c.l.bf16 %v3451_v4  ;;  %v706_v51 = vunpack.c.h.bf16 %v3451_v4  ;;  %v3479_v6 = vld [vmem:[#allocation3 + $0x350] sm:$0xff] }
  0xa6   :  { %v707_v19 = vunpack.c.l.bf16 %v3453_v2  ;;  %v708_v24 = vunpack.c.h.bf16 %v3453_v2  ;;  %v709_v17 = vunpack.c.l.bf16 %v3455_v13  ;;  %v710_v49 = vunpack.c.h.bf16 %v3455_v13  ;;  %v3485_v50 = vld [vmem:[#allocation3 + $0x390] sm:$0xff] }
  0xa7   :  { %v3487_v62 = vld [vmem:[#allocation3 + $0x3d0] sm:$0xff]  ;;  %v711_v43 = vunpack.c.l.bf16 %v3461_v21  ;;  %v712_v63 = vunpack.c.h.bf16 %v3461_v21  ;;  %v713_v41 = vunpack.c.l.bf16 %v3463_v57  ;;  %v714_v22 = vunpack.c.h.bf16 %v3463_v57 }
  0xa8   :  { %v727_v38 = vrot.slane %v695_v39, 4  ;;  %v733_v52 = vrot.slane %v696_v9, 4  ;;  %v739_v40 = vrot.slane %v697_v28, 4  ;;  %v745_v58 = vrot.slane %v698_v42, 4 }
  0xa9   :  { %v751_v48 = vrot.slane %v699_v34, 4  ;;  %v757_v14 = vrot.slane %v700_v36, 4  ;;  %v763_v5 = vrot.slane %v701_v3, 4  ;;  %v769_v0 = vrot.slane %v702_v30, 4 }
  0xaa   :  { %v728_v11 = vadd.f32 %v727_v38, %v695_v39  ;;  %v734_v37 = vadd.f32 %v733_v52, %v696_v9  ;;  %v740_v18 = vadd.f32 %v739_v40, %v697_v28  ;;  %v746_v32 = vadd.f32 %v745_v58, %v698_v42 }
  0xab   :  { %v752_v20 = vadd.f32 %v751_v48, %v699_v34  ;;  %v758_v27 = vadd.f32 %v757_v14, %v700_v36  ;;  %v764_v25 = vadd.f32 %v763_v5, %v701_v3  ;;  %v770_v47 = vadd.f32 %v769_v0, %v702_v30 }
  0xac   :  { %v729_v15 = vrot.slane %v728_v11, 2  ;;  %v735_v16 = vrot.slane %v734_v37, 2  ;;  %v741_v53 = vrot.slane %v740_v18, 2  ;;  %v747_v7 = vrot.slane %v746_v32, 2 }
  0xad   :  { %v753_v54 = vrot.slane %v752_v20, 2  ;;  %v759_v55 = vrot.slane %v758_v27, 2  ;;  %v765_v46 = vrot.slane %v764_v25, 2  ;;  %v771_v44 = vrot.slane %v770_v47, 2 }
  0xae   :  { %v730_v23 = vadd.f32 %v729_v15, %v728_v11  ;;  %v736_v1 = vadd.f32 %v735_v16, %v734_v37  ;;  %v742_v59 = vadd.f32 %v741_v53, %v740_v18  ;;  %v748_v12 = vadd.f32 %v747_v7, %v746_v32 }
  0xaf   :  { %v754_v39 = vadd.f32 %v753_v54, %v752_v20  ;;  %v760_v9 = vadd.f32 %v759_v55, %v758_v27  ;;  %v766_v28 = vadd.f32 %v765_v46, %v764_v25  ;;  %v772_v42 = vadd.f32 %v771_v44, %v770_v47 }
  0xb0   :  { %v731_v34 = vrot.slane %v730_v23, 1  ;;  %v737_v36 = vrot.slane %v736_v1, 1  ;;  %v743_v3 = vrot.slane %v742_v59, 1  ;;  %v749_v30 = vrot.slane %v748_v12, 1 }
  0xb1   :  { %v755_v38 = vrot.slane %v754_v39, 1  ;;  %v761_v52 = vrot.slane %v760_v9, 1  ;;  %v767_v40 = vrot.slane %v766_v28, 1  ;;  %v773_v58 = vrot.slane %v772_v42, 1 }
  0xb2   :  { %v3505_v48 = vadd.f32 %v731_v34, %v730_v23  ;;  %v3507_v14 = vadd.f32 %v737_v36, %v736_v1  ;;  %v3509_v15 = vadd.f32 %v743_v3, %v742_v59  ;;  %v3511_v53 = vadd.f32 %v749_v30, %v748_v12 }
  0xb3   :  { %v3513_v54 = vadd.f32 %v755_v38, %v754_v39  ;;  %v3515_v46 = vadd.f32 %v761_v52, %v760_v9  ;;  %v3517_v44 = vadd.f32 %v767_v40, %v766_v28  ;;  %v3519_v55 = vadd.f32 %v773_v58, %v772_v42 }
  0xb4   :  { %v775_v16 = vrot.slane %v703_v29, 4  ;;  %v781_v23 = vrot.slane %v704_v45, 4  ;;  %v787_v59 = vrot.slane %v705_v31, 4  ;;  %v793_v12 = vrot.slane %v706_v51, 4 }
  0xb5   :  { %v799_v1 = vrot.slane %v707_v19, 4  ;;  %v805_v7 = vrot.slane %v708_v24, 4  ;;  %v811_v5 = vrot.slane %v709_v17, 4  ;;  %v817_v0 = vrot.slane %v710_v49, 4 }
  0xb6   :  { %v776_v11 = vadd.f32 %v775_v16, %v703_v29  ;;  %v782_v37 = vadd.f32 %v781_v23, %v704_v45  ;;  %v788_v18 = vadd.f32 %v787_v59, %v705_v31  ;;  %v794_v32 = vadd.f32 %v793_v12, %v706_v51 }
  0xb7   :  { %v800_v20 = vadd.f32 %v799_v1, %v707_v19  ;;  %v806_v27 = vadd.f32 %v805_v7, %v708_v24  ;;  %v812_v25 = vadd.f32 %v811_v5, %v709_v17  ;;  %v818_v29 = vadd.f32 %v817_v0, %v710_v49 }
  0xb8   :  { %v777_v61 = vrot.slane %v776_v11, 2  ;;  %v783_v45 = vrot.slane %v782_v37, 2  ;;  %v789_v47 = vrot.slane %v788_v18, 2  ;;  %v795_v39 = vrot.slane %v794_v32, 2 }
  0xb9   :  { %v801_v31 = vrot.slane %v800_v20, 2  ;;  %v807_v9 = vrot.slane %v806_v27, 2  ;;  %v813_v4 = vrot.slane %v812_v25, 2  ;;  %v819_v51 = vrot.slane %v818_v29, 2 }
  0xba   :  { %v778_v28 = vadd.f32 %v777_v61, %v776_v11  ;;  %v784_v42 = vadd.f32 %v783_v45, %v782_v37  ;;  %v790_v19 = vadd.f32 %v789_v47, %v788_v18  ;;  %v796_v34 = vadd.f32 %v795_v39, %v794_v32 }
  0xbb   :  { %v802_v2 = vadd.f32 %v801_v31, %v800_v20  ;;  %v808_v24 = vadd.f32 %v807_v9, %v806_v27  ;;  %v814_v36 = vadd.f32 %v813_v4, %v812_v25  ;;  %v820_v3 = vadd.f32 %v819_v51, %v818_v29 }
  0xbc   :  { %v779_v17 = vrot.slane %v778_v28, 1  ;;  %v785_v30 = vrot.slane %v784_v42, 1  ;;  %v791_v13 = vrot.slane %v790_v19, 1  ;;  %v797_v49 = vrot.slane %v796_v34, 1 }
  0xbd   :  { %v803_v38 = vrot.slane %v802_v2, 1  ;;  %v809_v52 = vrot.slane %v808_v24, 1  ;;  %v815_v40 = vrot.slane %v814_v36, 1  ;;  %v821_v58 = vrot.slane %v820_v3, 1 }
  0xbe   :  { %v3553_v16 = vadd.f32 %v779_v17, %v778_v28  ;;  %v3555_v23 = vadd.f32 %v785_v30, %v784_v42  ;;  %v3557_v59 = vadd.f32 %v791_v13, %v790_v19  ;;  %v3559_v12 = vadd.f32 %v797_v49, %v796_v34 }
  0xbf   :  { %v3561_v1 = vadd.f32 %v803_v38, %v802_v2  ;;  %v3563_v7 = vadd.f32 %v809_v52, %v808_v24  ;;  %v3565_v5 = vadd.f32 %v815_v40, %v814_v36  ;;  %v3567_v0 = vadd.f32 %v821_v58, %v820_v3 }
  0xc0   :  { %v823_v11 = vrot.slane %v711_v43, 4  ;;  %v829_v37 = vrot.slane %v712_v63, 4  ;;  %v835_v18 = vrot.slane %v713_v41, 4  ;;  %v841_v32 = vrot.slane %v714_v22, 4 }
  0xc1   :  { %v4998_v20 = vunpack.c.l.bf16 %v3469_v35  ;;  %v4999_v25 = vunpack.c.h.bf16 %v3469_v35  ;;  %v5000_v61 = vunpack.c.l.bf16 %v3471_v10  ;;  %v5001_v47 = vunpack.c.h.bf16 %v3471_v10 }
  0xc2   :  { %v824_v31 = vadd.f32 %v823_v11, %v711_v43  ;;  %v830_v9 = vadd.f32 %v829_v37, %v712_v63  ;;  %v836_v4 = vadd.f32 %v835_v18, %v713_v41  ;;  %v842_v51 = vadd.f32 %v841_v32, %v714_v22 }
  0xc3   :  { %v847_v27 = vrot.slane %v4998_v20, 4  ;;  %v853_v29 = vrot.slane %v4999_v25, 4  ;;  %v859_v45 = vrot.slane %v5000_v61, 4  ;;  %v865_v39 = vrot.slane %v5001_v47, 4 }
  0xc4   :  { %v5002_v28 = vmov %v4998_v20  ;;  %v5003_v19 = vmov %v4999_v25  ;;  %v5004_v2 = vmov %v5000_v61  ;;  %v5005_v43 = vmov %v5001_v47 }
  0xc5   :  { %v848_v42 = vadd.f32 %v847_v27, %v5002_v28  ;;  %v854_v34 = vadd.f32 %v853_v29, %v5003_v19  ;;  %v860_v24 = vadd.f32 %v859_v45, %v5004_v2  ;;  %v866_v36 = vadd.f32 %v865_v39, %v5005_v43 }
  0xc6   :  { %v825_v21 = vrot.slane %v824_v31, 2  ;;  %v831_v63 = vrot.slane %v830_v9, 2  ;;  %v837_v3 = vrot.slane %v836_v4, 2  ;;  %v843_v17 = vrot.slane %v842_v51, 2 }
  0xc7   :  { %v849_v41 = vrot.slane %v848_v42, 2  ;;  %v855_v30 = vrot.slane %v854_v34, 2  ;;  %v861_v57 = vrot.slane %v860_v24, 2  ;;  %v867_v22 = vrot.slane %v866_v36, 2 }
  0xc8   :  { %v826_v13 = vadd.f32 %v825_v21, %v824_v31  ;;  %v832_v49 = vadd.f32 %v831_v63, %v830_v9  ;;  %v838_v38 = vadd.f32 %v837_v3, %v836_v4  ;;  %v844_v52 = vadd.f32 %v843_v17, %v842_v51 }
  0xc9   :  { %v850_v35 = vadd.f32 %v849_v41, %v848_v42  ;;  %v856_v40 = vadd.f32 %v855_v30, %v854_v34  ;;  %v862_v58 = vadd.f32 %v861_v57, %v860_v24  ;;  %v868_v11 = vadd.f32 %v867_v22, %v866_v36 }
  0xca   :  { %v827_v37 = vrot.slane %v826_v13, 1  ;;  %v833_v18 = vrot.slane %v832_v49, 1  ;;  %v839_v10 = vrot.slane %v838_v38, 1  ;;  %v845_v32 = vrot.slane %v844_v52, 1 }
  0xcb   :  { %v851_v20 = vrot.slane %v850_v35, 1  ;;  %v857_v27 = vrot.slane %v856_v40, 1  ;;  %v863_v25 = vrot.slane %v862_v58, 1  ;;  %v869_v29 = vrot.slane %v868_v11, 1 }
  0xcc   :  { %v828_v61 = vadd.f32 %v827_v37, %v826_v13  ;;  %v834_v45 = vadd.f32 %v833_v18, %v832_v49  ;;  %v840_v47 = vadd.f32 %v839_v10, %v838_v38  ;;  %v846_v39 = vadd.f32 %v845_v32, %v844_v52 }
  0xcd   :  { %v852_v31 = vadd.f32 %v851_v20, %v850_v35  ;;  %v858_v9 = vadd.f32 %v857_v27, %v856_v40  ;;  %v864_v4 = vadd.f32 %v863_v25, %v862_v58  ;;  %v870_v51 = vadd.f32 %v869_v29, %v868_v11 }
  0xce   :  { %v5006_v28 = vunpack.c.l.bf16 %v3477_v56  ;;  %v5007_v19 = vunpack.c.h.bf16 %v3477_v56  ;;  %v5008_v2 = vunpack.c.l.bf16 %v3479_v6  ;;  %v5009_v43 = vunpack.c.h.bf16 %v3479_v6 }
  0xcf   :  { %v5010_v21 = vunpack.c.l.bf16 %v3485_v50  ;;  %v5011_v3 = vunpack.c.h.bf16 %v3485_v50  ;;  %v5012_v41 = vunpack.c.l.bf16 %v3487_v62  ;;  %v5013_v57 = vunpack.c.h.bf16 %v3487_v62 }
  0xd0   :  { %v871_v42 = vrot.slane %v5006_v28, 4  ;;  %v877_v34 = vrot.slane %v5007_v19, 4  ;;  %v883_v24 = vrot.slane %v5008_v2, 4  ;;  %v889_v36 = vrot.slane %v5009_v43, 4 }
  0xd1   :  { %v895_v63 = vrot.slane %v5010_v21, 4  ;;  %v901_v17 = vrot.slane %v5011_v3, 4  ;;  %v907_v30 = vrot.slane %v5012_v41, 4  ;;  %v913_v22 = vrot.slane %v5013_v57, 4 }
  0xd2   :  { %v5014_v13 = vmov %v5006_v28  ;;  %v5015_v38 = vmov %v5007_v19  ;;  %v5016_v35 = vmov %v5008_v2  ;;  %v5017_v58 = vmov %v5009_v43 }
  0xd3   :  { %v872_v49 = vadd.f32 %v871_v42, %v5014_v13  ;;  %v878_v52 = vadd.f32 %v877_v34, %v5015_v38  ;;  %v884_v40 = vadd.f32 %v883_v24, %v5016_v35  ;;  %v890_v11 = vadd.f32 %v889_v36, %v5017_v58 }
  0xd4   :  { %v5018_v37 = vmov %v5010_v21  ;;  %v5019_v10 = vmov %v5011_v3  ;;  %v5020_v20 = vmov %v5012_v41  ;;  %v5021_v25 = vmov %v5013_v57 }
  0xd5   :  { %v896_v18 = vadd.f32 %v895_v63, %v5018_v37  ;;  %v902_v32 = vadd.f32 %v901_v17, %v5019_v10  ;;  %v908_v27 = vadd.f32 %v907_v30, %v5020_v20  ;;  %v914_v29 = vadd.f32 %v913_v22, %v5021_v25 }
  0xd6   :  { %v873_v56 = vrot.slane %v872_v49, 2  ;;  %v879_v28 = vrot.slane %v878_v52, 2  ;;  %v885_v42 = vrot.slane %v884_v40, 2  ;;  %v891_v19 = vrot.slane %v890_v11, 2 }
  0xd7   :  { %v897_v34 = vrot.slane %v896_v18, 2  ;;  %v903_v2 = vrot.slane %v902_v32, 2  ;;  %v909_v6 = vrot.slane %v908_v27, 2  ;;  %v915_v24 = vrot.slane %v914_v29, 2 }
  0xd8   :  { %v874_v43 = vadd.f32 %v873_v56, %v872_v49  ;;  %v880_v36 = vadd.f32 %v879_v28, %v878_v52  ;;  %v886_v21 = vadd.f32 %v885_v42, %v884_v40  ;;  %v892_v63 = vadd.f32 %v891_v19, %v890_v11 }
  0xd9   :  { %v898_v50 = vadd.f32 %v897_v34, %v896_v18  ;;  %v904_v3 = vadd.f32 %v903_v2, %v902_v32  ;;  %v910_v17 = vadd.f32 %v909_v6, %v908_v27  ;;  %v916_v41 = vadd.f32 %v915_v24, %v914_v29  ;;  %v3681_v2 = vld [vmem:[#allocation3 + $0x98] sm:$0xff] }
  0xda   :  { %v875_v30 = vrot.slane %v874_v43, 1  ;;  %v881_v57 = vrot.slane %v880_v36, 1  ;;  %v887_v62 = vrot.slane %v886_v21, 1  ;;  %v893_v22 = vrot.slane %v892_v63, 1 }
  0xdb   :  { %v899_v13 = vrot.slane %v898_v50, 1  ;;  %v905_v38 = vrot.slane %v904_v3, 1  ;;  %v911_v35 = vrot.slane %v910_v17, 1  ;;  %v917_v58 = vrot.slane %v916_v41, 1 }
  0xdc   :  { %v876_v37 = vadd.f32 %v875_v30, %v874_v43  ;;  %v882_v10 = vadd.f32 %v881_v57, %v880_v36  ;;  %v888_v20 = vadd.f32 %v887_v62, %v886_v21  ;;  %v894_v25 = vadd.f32 %v893_v22, %v892_v63  ;;  %v3699_v36 = vld [vmem:[#allocation3 + $0x158] sm:$0xff] }
  0xdd   :  { %v900_v49 = vadd.f32 %v899_v13, %v898_v50  ;;  %v906_v52 = vadd.f32 %v905_v38, %v904_v3  ;;  %v912_v40 = vadd.f32 %v911_v35, %v910_v17  ;;  %v918_v11 = vadd.f32 %v917_v58, %v916_v41  ;;  %v3701_v21 = vld [vmem:[#allocation3 + $0x198] sm:$0xff] }
  0xde   :  { %v951_v18 = vsel %vm316_vm0, %v3509_v15, %v3505_v48  ;;  %v958_v32 = vsel %vm316_vm0, %v3511_v53, %v3507_v14  ;;  %v965_v27 = vsel %vm316_vm0, %v840_v47, %v828_v61  ;;  %v972_v29 = vsel %vm316_vm0, %v846_v39, %v834_v45  ;;  %v3703_v63 = vld [vmem:[#allocation3 + $0x1d8] sm:$0xff] }
  0xdf   :  { %v952_v56 = vsel %vm318_vm1, %v3513_v54, %v951_v18  ;;  %v959_v28 = vsel %vm318_vm1, %v3515_v46, %v958_v32  ;;  %v966_v42 = vsel %vm318_vm1, %v852_v31, %v965_v27  ;;  %v973_v19 = vsel %vm318_vm1, %v858_v9, %v972_v29  ;;  %v3709_v3 = vld [vmem:[#allocation3 + $0x218] sm:$0xff] }
  0xe0   :  { %v953_v48 = vsel %vm320_vm2, %v3517_v44, %v952_v56  ;;  %v960_v14 = vsel %vm320_vm2, %v3519_v55, %v959_v28  ;;  %v967_v15 = vsel %vm320_vm2, %v864_v4, %v966_v42  ;;  %v974_v53 = vsel %vm320_vm2, %v870_v51, %v973_v19  ;;  %v3671_v4 = vld [vmem:[#allocation3 + $0x18] sm:$0xff] }
  0xe1   :  { %v954_v54 = vsel %vm322_vm3, %v3553_v16, %v953_v48  ;;  %v961_v46 = vsel %vm322_vm3, %v3555_v23, %v960_v14  ;;  %v968_v61 = vsel %vm322_vm3, %v876_v37, %v967_v15  ;;  %v975_v45 = vsel %vm322_vm3, %v882_v10, %v974_v53  ;;  %v3717_v62 = vld [vmem:[#allocation3 + $0x298] sm:$0xff] }
  0xe2   :  { %v955_v44 = vsel %vm324_vm4, %v3557_v59, %v954_v54  ;;  %v962_v55 = vsel %vm324_vm4, %v3559_v12, %v961_v46  ;;  %v969_v47 = vsel %vm324_vm4, %v888_v20, %v968_v61  ;;  %v976_v39 = vsel %vm324_vm4, %v894_v25, %v975_v45  ;;  %v3673_v59 = vld [vmem:[#allocation3 + $0x58] sm:$0xff] }
  0xe3   :  { %v956_v16 = vsel %vm326_vm5, %v3561_v1, %v955_v44  ;;  %v963_v23 = vsel %vm326_vm5, %v3563_v7, %v962_v55  ;;  %v970_v31 = vsel %vm326_vm5, %v900_v49, %v969_v47  ;;  %v977_v9 = vsel %vm326_vm5, %v906_v52, %v976_v39  ;;  %v3683_v7 = vld [vmem:[#allocation3 + $0xd8] sm:$0xff] }
  0xe4   :  { %v957_v12 = vsel %vm328_vm6, %v3565_v5, %v956_v16  ;;  %v964_v51 = vsel %vm328_vm6, %v3567_v0, %v963_v23  ;;  %v971_v34 = vsel %vm328_vm6, %v912_v40, %v970_v31  ;;  %v978_v1 = vsel %vm328_vm6, %v918_v11, %v977_v9  ;;  %v3697_v0 = vld [vmem:[#allocation3 + $0x118] sm:$0xff] }
  0xe5   :  { %v3686_v6 = vadd.f32 %v957_v12, %v3438_v33  ;;  %v3689_v24 = vadd.f32 %v964_v51, %v3441_v8  ;;  %v3692_v43 = vadd.f32 %v971_v34, %v3444_v26  ;;  %v3695_v5 = vadd.f32 %v978_v1, %v3447_v60  ;;  %v3711_v60 = vld [vmem:[#allocation3 + $0x258] sm:$0xff] }
  0xe6   :  { %v1011_v33 = vunpack.c.l.bf16 %v3671_v4  ;;  %v1012_v50 = vunpack.c.h.bf16 %v3671_v4  ;;  %v1013_v8 = vunpack.c.l.bf16 %v3673_v59  ;;  %v1014_v26 = vunpack.c.h.bf16 %v3673_v59  ;;  %v3719_v22 = vld [vmem:[#allocation3 + $0x2d8] sm:$0xff] }
  0xe7   :  { %v1015_v17 = vunpack.c.l.bf16 %v3681_v2  ;;  %v1016_v41 = vunpack.c.h.bf16 %v3681_v2  ;;  %v1017_v30 = vunpack.c.l.bf16 %v3683_v7  ;;  %v1018_v57 = vunpack.c.h.bf16 %v3683_v7  ;;  %v3725_v37 = vld [vmem:[#allocation3 + $0x318] sm:$0xff] }
  0xe8   :  { %v1019_v13 = vunpack.c.l.bf16 %v3697_v0  ;;  %v1020_v38 = vunpack.c.h.bf16 %v3697_v0  ;;  %v1021_v35 = vunpack.c.l.bf16 %v3699_v36  ;;  %v1022_v58 = vunpack.c.h.bf16 %v3699_v36  ;;  %v3727_v10 = vld [vmem:[#allocation3 + $0x358] sm:$0xff] }
  0xe9   :  { %v1023_v20 = vunpack.c.l.bf16 %v3701_v21  ;;  %v1024_v25 = vunpack.c.h.bf16 %v3701_v21  ;;  %v1025_v49 = vunpack.c.l.bf16 %v3703_v63  ;;  %v1026_v52 = vunpack.c.h.bf16 %v3703_v63  ;;  %v3733_v40 = vld [vmem:[#allocation3 + $0x398] sm:$0xff] }
  0xea   :  { %v3735_v11 = vld [vmem:[#allocation3 + $0x3d8] sm:$0xff]  ;;  %v1027_v18 = vunpack.c.l.bf16 %v3709_v3  ;;  %v1028_v32 = vunpack.c.h.bf16 %v3709_v3  ;;  %v1029_v27 = vunpack.c.l.bf16 %v3711_v60  ;;  %v1030_v29 = vunpack.c.h.bf16 %v3711_v60 }
  0xeb   :  { %v1043_v44 = vrot.slane %v1011_v33, 4  ;;  %v1049_v55 = vrot.slane %v1012_v50, 4  ;;  %v1055_v47 = vrot.slane %v1013_v8, 4  ;;  %v1061_v39 = vrot.slane %v1014_v26, 4 }
  0xec   :  { %v1067_v16 = vrot.slane %v1015_v17, 4  ;;  %v1073_v23 = vrot.slane %v1016_v41, 4  ;;  %v1079_v31 = vrot.slane %v1017_v30, 4  ;;  %v1085_v9 = vrot.slane %v1018_v57, 4 }
  0xed   :  { %v1044_v4 = vadd.f32 %v1043_v44, %v1011_v33  ;;  %v1050_v59 = vadd.f32 %v1049_v55, %v1012_v50  ;;  %v1056_v12 = vadd.f32 %v1055_v47, %v1013_v8  ;;  %v1062_v51 = vadd.f32 %v1061_v39, %v1014_v26 }
  0xee   :  { %v1068_v34 = vadd.f32 %v1067_v16, %v1015_v17  ;;  %v1074_v1 = vadd.f32 %v1073_v23, %v1016_v41  ;;  %v1080_v2 = vadd.f32 %v1079_v31, %v1017_v30  ;;  %v1086_v7 = vadd.f32 %v1085_v9, %v1018_v57 }
  0xef   :  { %v1045_v46 = vrot.slane %v1044_v4, 2  ;;  %v1051_v61 = vrot.slane %v1050_v59, 2  ;;  %v1057_v54 = vrot.slane %v1056_v12, 2  ;;  %v1063_v45 = vrot.slane %v1062_v51, 2 }
  0xf0   :  { %v1069_v53 = vrot.slane %v1068_v34, 2  ;;  %v1075_v15 = vrot.slane %v1074_v1, 2  ;;  %v1081_v14 = vrot.slane %v1080_v2, 2  ;;  %v1087_v48 = vrot.slane %v1086_v7, 2 }
  0xf1   :  { %v1046_v19 = vadd.f32 %v1045_v46, %v1044_v4  ;;  %v1052_v42 = vadd.f32 %v1051_v61, %v1050_v59  ;;  %v1058_v28 = vadd.f32 %v1057_v54, %v1056_v12  ;;  %v1064_v56 = vadd.f32 %v1063_v45, %v1062_v51 }
  0xf2   :  { %v1070_v33 = vadd.f32 %v1069_v53, %v1068_v34  ;;  %v1076_v50 = vadd.f32 %v1075_v15, %v1074_v1  ;;  %v1082_v8 = vadd.f32 %v1081_v14, %v1080_v2  ;;  %v1088_v26 = vadd.f32 %v1087_v48, %v1086_v7 }
  0xf3   :  { %v1047_v17 = vrot.slane %v1046_v19, 1  ;;  %v1053_v41 = vrot.slane %v1052_v42, 1  ;;  %v1059_v30 = vrot.slane %v1058_v28, 1  ;;  %v1065_v57 = vrot.slane %v1064_v56, 1 }
  0xf4   :  { %v1071_v44 = vrot.slane %v1070_v33, 1  ;;  %v1077_v55 = vrot.slane %v1076_v50, 1  ;;  %v1083_v47 = vrot.slane %v1082_v8, 1  ;;  %v1089_v39 = vrot.slane %v1088_v26, 1 }
  0xf5   :  { %v3753_v16 = vadd.f32 %v1047_v17, %v1046_v19  ;;  %v3755_v23 = vadd.f32 %v1053_v41, %v1052_v42  ;;  %v3757_v46 = vadd.f32 %v1059_v30, %v1058_v28  ;;  %v3759_v54 = vadd.f32 %v1065_v57, %v1064_v56 }
  0xf6   :  { %v3761_v53 = vadd.f32 %v1071_v44, %v1070_v33  ;;  %v3763_v14 = vadd.f32 %v1077_v55, %v1076_v50  ;;  %v3765_v48 = vadd.f32 %v1083_v47, %v1082_v8  ;;  %v3767_v15 = vadd.f32 %v1089_v39, %v1088_v26 }
  0xf7   :  { %v1091_v61 = vrot.slane %v1019_v13, 4  ;;  %v1097_v19 = vrot.slane %v1020_v38, 4  ;;  %v1103_v28 = vrot.slane %v1021_v35, 4  ;;  %v1109_v56 = vrot.slane %v1022_v58, 4 }
  0xf8   :  { %v1115_v42 = vrot.slane %v1023_v20, 4  ;;  %v1121_v45 = vrot.slane %v1024_v25, 4  ;;  %v1127_v31 = vrot.slane %v1025_v49, 4  ;;  %v1133_v9 = vrot.slane %v1026_v52, 4 }
  0xf9   :  { %v1092_v4 = vadd.f32 %v1091_v61, %v1019_v13  ;;  %v1098_v59 = vadd.f32 %v1097_v19, %v1020_v38  ;;  %v1104_v12 = vadd.f32 %v1103_v28, %v1021_v35  ;;  %v1110_v51 = vadd.f32 %v1109_v56, %v1022_v58 }
  0xfa   :  { %v1116_v34 = vadd.f32 %v1115_v42, %v1023_v20  ;;  %v1122_v1 = vadd.f32 %v1121_v45, %v1024_v25  ;;  %v1128_v2 = vadd.f32 %v1127_v31, %v1025_v49  ;;  %v1134_v13 = vadd.f32 %v1133_v9, %v1026_v52 }
  0xfb   :  { %v1093_v0 = vrot.slane %v1092_v4, 2  ;;  %v1099_v38 = vrot.slane %v1098_v59, 2  ;;  %v1105_v7 = vrot.slane %v1104_v12, 2  ;;  %v1111_v33 = vrot.slane %v1110_v51, 2 }
  0xfc   :  { %v1117_v35 = vrot.slane %v1116_v34, 2  ;;  %v1123_v50 = vrot.slane %v1122_v1, 2  ;;  %v1129_v36 = vrot.slane %v1128_v2, 2  ;;  %v1135_v58 = vrot.slane %v1134_v13, 2 }
  0xfd   :  { %v1094_v8 = vadd.f32 %v1093_v0, %v1092_v4  ;;  %v1100_v26 = vadd.f32 %v1099_v38, %v1098_v59  ;;  %v1106_v20 = vadd.f32 %v1105_v7, %v1104_v12  ;;  %v1112_v17 = vadd.f32 %v1111_v33, %v1110_v51 }
  0xfe   :  { %v1118_v21 = vadd.f32 %v1117_v35, %v1116_v34  ;;  %v1124_v25 = vadd.f32 %v1123_v50, %v1122_v1  ;;  %v1130_v41 = vadd.f32 %v1129_v36, %v1128_v2  ;;  %v1136_v30 = vadd.f32 %v1135_v58, %v1134_v13 }
  0xff   :  { %v1095_v49 = vrot.slane %v1094_v8, 1  ;;  %v1101_v57 = vrot.slane %v1100_v26, 1  ;;  %v1107_v63 = vrot.slane %v1106_v20, 1  ;;  %v1113_v52 = vrot.slane %v1112_v17, 1 }
 0x100   :  { %v1119_v44 = vrot.slane %v1118_v21, 1  ;;  %v1125_v55 = vrot.slane %v1124_v25, 1  ;;  %v1131_v47 = vrot.slane %v1130_v41, 1  ;;  %v1137_v39 = vrot.slane %v1136_v30, 1 }
 0x101   :  { %v3801_v61 = vadd.f32 %v1095_v49, %v1094_v8  ;;  %v3803_v19 = vadd.f32 %v1101_v57, %v1100_v26  ;;  %v3805_v28 = vadd.f32 %v1107_v63, %v1106_v20  ;;  %v3807_v56 = vadd.f32 %v1113_v52, %v1112_v17 }
 0x102   :  { %v3809_v42 = vadd.f32 %v1119_v44, %v1118_v21  ;;  %v3811_v45 = vadd.f32 %v1125_v55, %v1124_v25  ;;  %v3813_v31 = vadd.f32 %v1131_v47, %v1130_v41  ;;  %v3815_v9 = vadd.f32 %v1137_v39, %v1136_v30 }
 0x103   :  { %v1139_v4 = vrot.slane %v1027_v18, 4  ;;  %v1145_v59 = vrot.slane %v1028_v32, 4  ;;  %v1151_v12 = vrot.slane %v1029_v27, 4  ;;  %v1157_v51 = vrot.slane %v1030_v29, 4 }
 0x104   :  { %v5022_v34 = vunpack.c.l.bf16 %v3717_v62  ;;  %v5023_v2 = vunpack.c.h.bf16 %v3717_v62  ;;  %v5024_v0 = vunpack.c.l.bf16 %v3719_v22  ;;  %v5025_v7 = vunpack.c.h.bf16 %v3719_v22 }
 0x105   :  { %v1140_v35 = vadd.f32 %v1139_v4, %v1027_v18  ;;  %v1146_v50 = vadd.f32 %v1145_v59, %v1028_v32  ;;  %v1152_v36 = vadd.f32 %v1151_v12, %v1029_v27  ;;  %v1158_v58 = vadd.f32 %v1157_v51, %v1030_v29 }
 0x106   :  { %v1163_v1 = vrot.slane %v5022_v34, 4  ;;  %v1169_v13 = vrot.slane %v5023_v2, 4  ;;  %v1175_v38 = vrot.slane %v5024_v0, 4  ;;  %v1181_v33 = vrot.slane %v5025_v7, 4 }
 0x107   :  { %v5026_v8 = vmov %v5022_v34  ;;  %v5027_v20 = vmov %v5023_v2  ;;  %v5028_v21 = vmov %v5024_v0  ;;  %v5029_v18 = vmov %v5025_v7 }
 0x108   :  { %v1164_v26 = vadd.f32 %v1163_v1, %v5026_v8  ;;  %v1170_v17 = vadd.f32 %v1169_v13, %v5027_v20  ;;  %v1176_v25 = vadd.f32 %v1175_v38, %v5028_v21  ;;  %v1182_v41 = vadd.f32 %v1181_v33, %v5029_v18 }
 0x109   :  { %v1141_v3 = vrot.slane %v1140_v35, 2  ;;  %v1147_v32 = vrot.slane %v1146_v50, 2  ;;  %v1153_v30 = vrot.slane %v1152_v36, 2  ;;  %v1159_v49 = vrot.slane %v1158_v58, 2 }
 0x10a   :  { %v1165_v27 = vrot.slane %v1164_v26, 2  ;;  %v1171_v57 = vrot.slane %v1170_v17, 2  ;;  %v1177_v60 = vrot.slane %v1176_v25, 2  ;;  %v1183_v29 = vrot.slane %v1182_v41, 2 }
 0x10b   :  { %v1142_v63 = vadd.f32 %v1141_v3, %v1140_v35  ;;  %v1148_v52 = vadd.f32 %v1147_v32, %v1146_v50  ;;  %v1154_v44 = vadd.f32 %v1153_v30, %v1152_v36  ;;  %v1160_v55 = vadd.f32 %v1159_v49, %v1158_v58 }
 0x10c   :  { %v1166_v62 = vadd.f32 %v1165_v27, %v1164_v26  ;;  %v1172_v47 = vadd.f32 %v1171_v57, %v1170_v17  ;;  %v1178_v39 = vadd.f32 %v1177_v60, %v1176_v25  ;;  %v1184_v4 = vadd.f32 %v1183_v29, %v1182_v41 }
 0x10d   :  { %v1143_v59 = vrot.slane %v1142_v63, 1  ;;  %v1149_v12 = vrot.slane %v1148_v52, 1  ;;  %v1155_v22 = vrot.slane %v1154_v44, 1  ;;  %v1161_v51 = vrot.slane %v1160_v55, 1 }
 0x10e   :  { %v1167_v34 = vrot.slane %v1166_v62, 1  ;;  %v1173_v1 = vrot.slane %v1172_v47, 1  ;;  %v1179_v2 = vrot.slane %v1178_v39, 1  ;;  %v1185_v13 = vrot.slane %v1184_v4, 1 }
 0x10f   :  { %v1144_v0 = vadd.f32 %v1143_v59, %v1142_v63  ;;  %v1150_v38 = vadd.f32 %v1149_v12, %v1148_v52  ;;  %v1156_v7 = vadd.f32 %v1155_v22, %v1154_v44  ;;  %v1162_v33 = vadd.f32 %v1161_v51, %v1160_v55 }
 0x110   :  { %v1168_v35 = vadd.f32 %v1167_v34, %v1166_v62  ;;  %v1174_v50 = vadd.f32 %v1173_v1, %v1172_v47  ;;  %v1180_v36 = vadd.f32 %v1179_v2, %v1178_v39  ;;  %v1186_v58 = vadd.f32 %v1185_v13, %v1184_v4 }
 0x111   :  { %v5030_v8 = vunpack.c.l.bf16 %v3725_v37  ;;  %v5031_v20 = vunpack.c.h.bf16 %v3725_v37  ;;  %v5032_v21 = vunpack.c.l.bf16 %v3727_v10  ;;  %v5033_v18 = vunpack.c.h.bf16 %v3727_v10 }
 0x112   :  { %v5034_v3 = vunpack.c.l.bf16 %v3733_v40  ;;  %v5035_v30 = vunpack.c.h.bf16 %v3733_v40  ;;  %v5036_v27 = vunpack.c.l.bf16 %v3735_v11  ;;  %v5037_v60 = vunpack.c.h.bf16 %v3735_v11 }
 0x113   :  { %v1187_v26 = vrot.slane %v5030_v8, 4  ;;  %v1193_v17 = vrot.slane %v5031_v20, 4  ;;  %v1199_v25 = vrot.slane %v5032_v21, 4  ;;  %v1205_v41 = vrot.slane %v5033_v18, 4 }
 0x114   :  { %v1211_v32 = vrot.slane %v5034_v3, 4  ;;  %v1217_v49 = vrot.slane %v5035_v30, 4  ;;  %v1223_v57 = vrot.slane %v5036_v27, 4  ;;  %v1229_v29 = vrot.slane %v5037_v60, 4 }
 0x115   :  { %v5038_v63 = vmov %v5030_v8  ;;  %v5039_v44 = vmov %v5031_v20  ;;  %v5040_v62 = vmov %v5032_v21  ;;  %v5041_v39 = vmov %v5033_v18 }
 0x116   :  { %v1188_v52 = vadd.f32 %v1187_v26, %v5038_v63  ;;  %v1194_v55 = vadd.f32 %v1193_v17, %v5039_v44  ;;  %v1200_v47 = vadd.f32 %v1199_v25, %v5040_v62  ;;  %v1206_v4 = vadd.f32 %v1205_v41, %v5041_v39 }
 0x117   :  { %v5042_v59 = vmov %v5034_v3  ;;  %v5043_v22 = vmov %v5035_v30  ;;  %v5044_v34 = vmov %v5036_v27  ;;  %v5045_v2 = vmov %v5037_v60 }
 0x118   :  { %v1212_v12 = vadd.f32 %v1211_v32, %v5042_v59  ;;  %v1218_v51 = vadd.f32 %v1217_v49, %v5043_v22  ;;  %v1224_v1 = vadd.f32 %v1223_v57, %v5044_v34  ;;  %v1230_v13 = vadd.f32 %v1229_v29, %v5045_v2 }
 0x119   :  { %v1189_v37 = vrot.slane %v1188_v52, 2  ;;  %v1195_v8 = vrot.slane %v1194_v55, 2  ;;  %v1201_v26 = vrot.slane %v1200_v47, 2  ;;  %v1207_v20 = vrot.slane %v1206_v4, 2 }
 0x11a   :  { %v1213_v17 = vrot.slane %v1212_v12, 2  ;;  %v1219_v21 = vrot.slane %v1218_v51, 2  ;;  %v1225_v10 = vrot.slane %v1224_v1, 2  ;;  %v1231_v25 = vrot.slane %v1230_v13, 2 }
 0x11b   :  { %v1190_v18 = vadd.f32 %v1189_v37, %v1188_v52  ;;  %v1196_v41 = vadd.f32 %v1195_v8, %v1194_v55  ;;  %v1202_v3 = vadd.f32 %v1201_v26, %v1200_v47  ;;  %v1208_v32 = vadd.f32 %v1207_v20, %v1206_v4 }
 0x11c   :  { %v1214_v40 = vadd.f32 %v1213_v17, %v1212_v12  ;;  %v1220_v30 = vadd.f32 %v1219_v21, %v1218_v51  ;;  %v1226_v49 = vadd.f32 %v1225_v10, %v1224_v1  ;;  %v1232_v27 = vadd.f32 %v1231_v25, %v1230_v13  ;;  %v3929_v21 = vld [vmem:[#allocation3 + $0xa0] sm:$0xff] }
 0x11d   :  { %v1191_v57 = vrot.slane %v1190_v18, 1  ;;  %v1197_v60 = vrot.slane %v1196_v41, 1  ;;  %v1203_v11 = vrot.slane %v1202_v3, 1  ;;  %v1209_v29 = vrot.slane %v1208_v32, 1 }
 0x11e   :  { %v1215_v63 = vrot.slane %v1214_v40, 1  ;;  %v1221_v44 = vrot.slane %v1220_v30, 1  ;;  %v1227_v62 = vrot.slane %v1226_v49, 1  ;;  %v1233_v39 = vrot.slane %v1232_v27, 1 }
 0x11f   :  { %v1192_v59 = vadd.f32 %v1191_v57, %v1190_v18  ;;  %v1198_v22 = vadd.f32 %v1197_v60, %v1196_v41  ;;  %v1204_v34 = vadd.f32 %v1203_v11, %v1202_v3  ;;  %v1210_v2 = vadd.f32 %v1209_v29, %v1208_v32  ;;  %v3947_v41 = vld [vmem:[#allocation3 + $0x160] sm:$0xff] }
 0x120   :  { %v1216_v52 = vadd.f32 %v1215_v63, %v1214_v40  ;;  %v1222_v55 = vadd.f32 %v1221_v44, %v1220_v30  ;;  %v1228_v47 = vadd.f32 %v1227_v62, %v1226_v49  ;;  %v1234_v4 = vadd.f32 %v1233_v39, %v1232_v27  ;;  %v3949_v3 = vld [vmem:[#allocation3 + $0x1a0] sm:$0xff] }
 0x121   :  { %v1267_v12 = vsel %vm316_vm0, %v3757_v46, %v3753_v16  ;;  %v1274_v51 = vsel %vm316_vm0, %v3759_v54, %v3755_v23  ;;  %v1281_v1 = vsel %vm316_vm0, %v1156_v7, %v1144_v0  ;;  %v1288_v13 = vsel %vm316_vm0, %v1162_v33, %v1150_v38  ;;  %v3951_v32 = vld [vmem:[#allocation3 + $0x1e0] sm:$0xff] }
 0x122   :  { %v1268_v37 = vsel %vm318_vm1, %v3761_v53, %v1267_v12  ;;  %v1275_v8 = vsel %vm318_vm1, %v3763_v14, %v1274_v51  ;;  %v1282_v26 = vsel %vm318_vm1, %v1168_v35, %v1281_v1  ;;  %v1289_v20 = vsel %vm318_vm1, %v1174_v50, %v1288_v13  ;;  %v3957_v30 = vld [vmem:[#allocation3 + $0x220] sm:$0xff] }
 0x123   :  { %v1269_v16 = vsel %vm320_vm2, %v3765_v48, %v1268_v37  ;;  %v1276_v23 = vsel %vm320_vm2, %v3767_v15, %v1275_v8  ;;  %v1283_v46 = vsel %vm320_vm2, %v1180_v36, %v1282_v26  ;;  %v1290_v54 = vsel %vm320_vm2, %v1186_v58, %v1289_v20  ;;  %v3919_v36 = vld [vmem:[#allocation3 + $0x20] sm:$0xff] }
 0x124   :  { %v1270_v53 = vsel %vm322_vm3, %v3801_v61, %v1269_v16  ;;  %v1277_v14 = vsel %vm322_vm3, %v3803_v19, %v1276_v23  ;;  %v1284_v0 = vsel %vm322_vm3, %v1192_v59, %v1283_v46  ;;  %v1291_v38 = vsel %vm322_vm3, %v1198_v22, %v1290_v54  ;;  %v3965_v11 = vld [vmem:[#allocation3 + $0x2a0] sm:$0xff] }
 0x125   :  { %v1271_v48 = vsel %vm324_vm4, %v3805_v28, %v1270_v53  ;;  %v1278_v15 = vsel %vm324_vm4, %v3807_v56, %v1277_v14  ;;  %v1285_v7 = vsel %vm324_vm4, %v1204_v34, %v1284_v0  ;;  %v1292_v33 = vsel %vm324_vm4, %v1210_v2, %v1291_v38  ;;  %v3921_v28 = vld [vmem:[#allocation3 + $0x60] sm:$0xff] }
 0x126   :  { %v1272_v61 = vsel %vm326_vm5, %v3809_v42, %v1271_v48  ;;  %v1279_v19 = vsel %vm326_vm5, %v3811_v45, %v1278_v15  ;;  %v1286_v35 = vsel %vm326_vm5, %v1216_v52, %v1285_v7  ;;  %v1293_v50 = vsel %vm326_vm5, %v1222_v55, %v1292_v33  ;;  %v3931_v45 = vld [vmem:[#allocation3 + $0xe0] sm:$0xff] }
 0x127   :  { %v1273_v56 = vsel %vm328_vm6, %v3813_v31, %v1272_v61  ;;  %v1280_v58 = vsel %vm328_vm6, %v3815_v9, %v1279_v19  ;;  %v1287_v17 = vsel %vm328_vm6, %v1228_v47, %v1286_v35  ;;  %v1294_v42 = vsel %vm328_vm6, %v1234_v4, %v1293_v50  ;;  %v3945_v9 = vld [vmem:[#allocation3 + $0x120] sm:$0xff] }
 0x128   :  { %v3934_v10 = vadd.f32 %v1273_v56, %v3686_v6  ;;  %v3937_v25 = vadd.f32 %v1280_v58, %v3689_v24  ;;  %v3940_v18 = vadd.f32 %v1287_v17, %v3692_v43  ;;  %v3943_v31 = vadd.f32 %v1294_v42, %v3695_v5  ;;  %v3959_v5 = vld [vmem:[#allocation3 + $0x260] sm:$0xff] }
 0x129   :  { %v1327_v6 = vunpack.c.l.bf16 %v3919_v36  ;;  %v1328_v40 = vunpack.c.h.bf16 %v3919_v36  ;;  %v1329_v24 = vunpack.c.l.bf16 %v3921_v28  ;;  %v1330_v43 = vunpack.c.h.bf16 %v3921_v28  ;;  %v3967_v29 = vld [vmem:[#allocation3 + $0x2e0] sm:$0xff] }
 0x12a   :  { %v1331_v49 = vunpack.c.l.bf16 %v3929_v21  ;;  %v1332_v27 = vunpack.c.h.bf16 %v3929_v21  ;;  %v1333_v57 = vunpack.c.l.bf16 %v3931_v45  ;;  %v1334_v60 = vunpack.c.h.bf16 %v3931_v45  ;;  %v3973_v59 = vld [vmem:[#allocation3 + $0x320] sm:$0xff] }
 0x12b   :  { %v1335_v63 = vunpack.c.l.bf16 %v3945_v9  ;;  %v1336_v44 = vunpack.c.h.bf16 %v3945_v9  ;;  %v1337_v62 = vunpack.c.l.bf16 %v3947_v41  ;;  %v1338_v39 = vunpack.c.h.bf16 %v3947_v41  ;;  %v3975_v22 = vld [vmem:[#allocation3 + $0x360] sm:$0xff] }
 0x12c   :  { %v1339_v34 = vunpack.c.l.bf16 %v3949_v3  ;;  %v1340_v2 = vunpack.c.h.bf16 %v3949_v3  ;;  %v1341_v52 = vunpack.c.l.bf16 %v3951_v32  ;;  %v1342_v55 = vunpack.c.h.bf16 %v3951_v32  ;;  %v3981_v47 = vld [vmem:[#allocation3 + $0x3a0] sm:$0xff] }
 0x12d   :  { %v3983_v4 = vld [vmem:[#allocation3 + $0x3e0] sm:$0xff]  ;;  %v1343_v12 = vunpack.c.l.bf16 %v3957_v30  ;;  %v1344_v51 = vunpack.c.h.bf16 %v3957_v30  ;;  %v1345_v1 = vunpack.c.l.bf16 %v3959_v5  ;;  %v1346_v13 = vunpack.c.h.bf16 %v3959_v5 }
 0x12e   :  { %v1359_v48 = vrot.slane %v1327_v6, 4  ;;  %v1365_v15 = vrot.slane %v1328_v40, 4  ;;  %v1371_v7 = vrot.slane %v1329_v24, 4  ;;  %v1377_v33 = vrot.slane %v1330_v43, 4 }
 0x12f   :  { %v1383_v61 = vrot.slane %v1331_v49, 4  ;;  %v1389_v19 = vrot.slane %v1332_v27, 4  ;;  %v1395_v35 = vrot.slane %v1333_v57, 4  ;;  %v1401_v50 = vrot.slane %v1334_v60, 4 }
 0x130   :  { %v1360_v36 = vadd.f32 %v1359_v48, %v1327_v6  ;;  %v1366_v28 = vadd.f32 %v1365_v15, %v1328_v40  ;;  %v1372_v56 = vadd.f32 %v1371_v7, %v1329_v24  ;;  %v1378_v58 = vadd.f32 %v1377_v33, %v1330_v43 }
 0x131   :  { %v1384_v17 = vadd.f32 %v1383_v61, %v1331_v49  ;;  %v1390_v42 = vadd.f32 %v1389_v19, %v1332_v27  ;;  %v1396_v21 = vadd.f32 %v1395_v35, %v1333_v57  ;;  %v1402_v45 = vadd.f32 %v1401_v50, %v1334_v60 }
 0x132   :  { %v1361_v14 = vrot.slane %v1360_v36, 2  ;;  %v1367_v0 = vrot.slane %v1366_v28, 2  ;;  %v1373_v53 = vrot.slane %v1372_v56, 2  ;;  %v1379_v38 = vrot.slane %v1378_v58, 2 }
 0x133   :  { %v1385_v54 = vrot.slane %v1384_v17, 2  ;;  %v1391_v46 = vrot.slane %v1390_v42, 2  ;;  %v1397_v23 = vrot.slane %v1396_v21, 2  ;;  %v1403_v16 = vrot.slane %v1402_v45, 2 }
 0x134   :  { %v1362_v20 = vadd.f32 %v1361_v14, %v1360_v36  ;;  %v1368_v26 = vadd.f32 %v1367_v0, %v1366_v28  ;;  %v1374_v8 = vadd.f32 %v1373_v53, %v1372_v56  ;;  %v1380_v37 = vadd.f32 %v1379_v38, %v1378_v58 }
 0x135   :  { %v1386_v6 = vadd.f32 %v1385_v54, %v1384_v17  ;;  %v1392_v40 = vadd.f32 %v1391_v46, %v1390_v42  ;;  %v1398_v24 = vadd.f32 %v1397_v23, %v1396_v21  ;;  %v1404_v43 = vadd.f32 %v1403_v16, %v1402_v45 }
 0x136   :  { %v1363_v49 = vrot.slane %v1362_v20, 1  ;;  %v1369_v27 = vrot.slane %v1368_v26, 1  ;;  %v1375_v57 = vrot.slane %v1374_v8, 1  ;;  %v1381_v60 = vrot.slane %v1380_v37, 1 }
 0x137   :  { %v1387_v48 = vrot.slane %v1386_v6, 1  ;;  %v1393_v15 = vrot.slane %v1392_v40, 1  ;;  %v1399_v7 = vrot.slane %v1398_v24, 1  ;;  %v1405_v33 = vrot.slane %v1404_v43, 1 }
 0x138   :  { %v4001_v61 = vadd.f32 %v1363_v49, %v1362_v20  ;;  %v4003_v19 = vadd.f32 %v1369_v27, %v1368_v26  ;;  %v4005_v14 = vadd.f32 %v1375_v57, %v1374_v8  ;;  %v4007_v53 = vadd.f32 %v1381_v60, %v1380_v37 }
 0x139   :  { %v4009_v54 = vadd.f32 %v1387_v48, %v1386_v6  ;;  %v4011_v23 = vadd.f32 %v1393_v15, %v1392_v40  ;;  %v4013_v16 = vadd.f32 %v1399_v7, %v1398_v24  ;;  %v4015_v46 = vadd.f32 %v1405_v33, %v1404_v43 }
 0x13a   :  { %v1407_v0 = vrot.slane %v1335_v63, 4  ;;  %v1413_v20 = vrot.slane %v1336_v44, 4  ;;  %v1419_v8 = vrot.slane %v1337_v62, 4  ;;  %v1425_v37 = vrot.slane %v1338_v39, 4 }
 0x13b   :  { %v1431_v26 = vrot.slane %v1339_v34, 4  ;;  %v1437_v38 = vrot.slane %v1340_v2, 4  ;;  %v1443_v35 = vrot.slane %v1341_v52, 4  ;;  %v1449_v50 = vrot.slane %v1342_v55, 4 }
 0x13c   :  { %v1408_v36 = vadd.f32 %v1407_v0, %v1335_v63  ;;  %v1414_v28 = vadd.f32 %v1413_v20, %v1336_v44  ;;  %v1420_v56 = vadd.f32 %v1419_v8, %v1337_v62  ;;  %v1426_v58 = vadd.f32 %v1425_v37, %v1338_v39 }
 0x13d   :  { %v1432_v17 = vadd.f32 %v1431_v26, %v1339_v34  ;;  %v1438_v42 = vadd.f32 %v1437_v38, %v1340_v2  ;;  %v1444_v21 = vadd.f32 %v1443_v35, %v1341_v52  ;;  %v1450_v63 = vadd.f32 %v1449_v50, %v1342_v55 }
 0x13e   :  { %v1409_v9 = vrot.slane %v1408_v36, 2  ;;  %v1415_v44 = vrot.slane %v1414_v28, 2  ;;  %v1421_v45 = vrot.slane %v1420_v56, 2  ;;  %v1427_v6 = vrot.slane %v1426_v58, 2 }
 0x13f   :  { %v1433_v62 = vrot.slane %v1432_v17, 2  ;;  %v1439_v40 = vrot.slane %v1438_v42, 2  ;;  %v1445_v41 = vrot.slane %v1444_v21, 2  ;;  %v1451_v39 = vrot.slane %v1450_v63, 2 }
 0x140   :  { %v1410_v24 = vadd.f32 %v1409_v9, %v1408_v36  ;;  %v1416_v43 = vadd.f32 %v1415_v44, %v1414_v28  ;;  %v1422_v34 = vadd.f32 %v1421_v45, %v1420_v56  ;;  %v1428_v49 = vadd.f32 %v1427_v6, %v1426_v58 }
 0x141   :  { %v1434_v3 = vadd.f32 %v1433_v62, %v1432_v17  ;;  %v1440_v2 = vadd.f32 %v1439_v40, %v1438_v42  ;;  %v1446_v27 = vadd.f32 %v1445_v41, %v1444_v21  ;;  %v1452_v57 = vadd.f32 %v1451_v39, %v1450_v63 }
 0x142   :  { %v1411_v52 = vrot.slane %v1410_v24, 1  ;;  %v1417_v60 = vrot.slane %v1416_v43, 1  ;;  %v1423_v32 = vrot.slane %v1422_v34, 1  ;;  %v1429_v55 = vrot.slane %v1428_v49, 1 }
 0x143   :  { %v1435_v48 = vrot.slane %v1434_v3, 1  ;;  %v1441_v15 = vrot.slane %v1440_v2, 1  ;;  %v1447_v7 = vrot.slane %v1446_v27, 1  ;;  %v1453_v33 = vrot.slane %v1452_v57, 1 }
 0x144   :  { %v4049_v0 = vadd.f32 %v1411_v52, %v1410_v24  ;;  %v4051_v20 = vadd.f32 %v1417_v60, %v1416_v43  ;;  %v4053_v8 = vadd.f32 %v1423_v32, %v1422_v34  ;;  %v4055_v37 = vadd.f32 %v1429_v55, %v1428_v49 }
 0x145   :  { %v4057_v26 = vadd.f32 %v1435_v48, %v1434_v3  ;;  %v4059_v38 = vadd.f32 %v1441_v15, %v1440_v2  ;;  %v4061_v35 = vadd.f32 %v1447_v7, %v1446_v27  ;;  %v4063_v50 = vadd.f32 %v1453_v33, %v1452_v57 }
 0x146   :  { %v1455_v36 = vrot.slane %v1343_v12, 4  ;;  %v1461_v28 = vrot.slane %v1344_v51, 4  ;;  %v1467_v56 = vrot.slane %v1345_v1, 4  ;;  %v1473_v58 = vrot.slane %v1346_v13, 4 }
 0x147   :  { %v5046_v17 = vunpack.c.l.bf16 %v3965_v11  ;;  %v5047_v21 = vunpack.c.h.bf16 %v3965_v11  ;;  %v5048_v9 = vunpack.c.l.bf16 %v3967_v29  ;;  %v5049_v45 = vunpack.c.h.bf16 %v3967_v29 }
 0x148   :  { %v1456_v62 = vadd.f32 %v1455_v36, %v1343_v12  ;;  %v1462_v40 = vadd.f32 %v1461_v28, %v1344_v51  ;;  %v1468_v41 = vadd.f32 %v1467_v56, %v1345_v1  ;;  %v1474_v39 = vadd.f32 %v1473_v58, %v1346_v13 }
 0x149   :  { %v1479_v42 = vrot.slane %v5046_v17, 4  ;;  %v1485_v63 = vrot.slane %v5047_v21, 4  ;;  %v1491_v44 = vrot.slane %v5048_v9, 4  ;;  %v1497_v6 = vrot.slane %v5049_v45, 4 }
 0x14a   :  { %v5050_v24 = vmov %v5046_v17  ;;  %v5051_v34 = vmov %v5047_v21  ;;  %v5052_v3 = vmov %v5048_v9  ;;  %v5053_v12 = vmov %v5049_v45 }
 0x14b   :  { %v1480_v43 = vadd.f32 %v1479_v42, %v5050_v24  ;;  %v1486_v49 = vadd.f32 %v1485_v63, %v5051_v34  ;;  %v1492_v2 = vadd.f32 %v1491_v44, %v5052_v3  ;;  %v1498_v27 = vadd.f32 %v1497_v6, %v5053_v12 }
 0x14c   :  { %v1457_v30 = vrot.slane %v1456_v62, 2  ;;  %v1463_v51 = vrot.slane %v1462_v40, 2  ;;  %v1469_v57 = vrot.slane %v1468_v41, 2  ;;  %v1475_v52 = vrot.slane %v1474_v39, 2 }
 0x14d   :  { %v1481_v1 = vrot.slane %v1480_v43, 2  ;;  %v1487_v60 = vrot.slane %v1486_v49, 2  ;;  %v1493_v5 = vrot.slane %v1492_v2, 2  ;;  %v1499_v13 = vrot.slane %v1498_v27, 2 }
 0x14e   :  { %v1458_v32 = vadd.f32 %v1457_v30, %v1456_v62  ;;  %v1464_v55 = vadd.f32 %v1463_v51, %v1462_v40  ;;  %v1470_v48 = vadd.f32 %v1469_v57, %v1468_v41  ;;  %v1476_v15 = vadd.f32 %v1475_v52, %v1474_v39 }
 0x14f   :  { %v1482_v11 = vadd.f32 %v1481_v1, %v1480_v43  ;;  %v1488_v7 = vadd.f32 %v1487_v60, %v1486_v49  ;;  %v1494_v33 = vadd.f32 %v1493_v5, %v1492_v2  ;;  %v1500_v36 = vadd.f32 %v1499_v13, %v1498_v27 }
 0x150   :  { %v1459_v28 = vrot.slane %v1458_v32, 1  ;;  %v1465_v56 = vrot.slane %v1464_v55, 1  ;;  %v1471_v29 = vrot.slane %v1470_v48, 1  ;;  %v1477_v58 = vrot.slane %v1476_v15, 1 }
 0x151   :  { %v1483_v17 = vrot.slane %v1482_v11, 1  ;;  %v1489_v42 = vrot.slane %v1488_v7, 1  ;;  %v1495_v21 = vrot.slane %v1494_v33, 1  ;;  %v1501_v63 = vrot.slane %v1500_v36, 1 }
 0x152   :  { %v1460_v9 = vadd.f32 %v1459_v28, %v1458_v32  ;;  %v1466_v44 = vadd.f32 %v1465_v56, %v1464_v55  ;;  %v1472_v45 = vadd.f32 %v1471_v29, %v1470_v48  ;;  %v1478_v6 = vadd.f32 %v1477_v58, %v1476_v15 }
 0x153   :  { %v1484_v62 = vadd.f32 %v1483_v17, %v1482_v11  ;;  %v1490_v40 = vadd.f32 %v1489_v42, %v1488_v7  ;;  %v1496_v41 = vadd.f32 %v1495_v21, %v1494_v33  ;;  %v1502_v39 = vadd.f32 %v1501_v63, %v1500_v36 }
 0x154   :  { %v5054_v24 = vunpack.c.l.bf16 %v3973_v59  ;;  %v5055_v34 = vunpack.c.h.bf16 %v3973_v59  ;;  %v5056_v3 = vunpack.c.l.bf16 %v3975_v22  ;;  %v5057_v12 = vunpack.c.h.bf16 %v3975_v22 }
 0x155   :  { %v5058_v30 = vunpack.c.l.bf16 %v3981_v47  ;;  %v5059_v57 = vunpack.c.h.bf16 %v3981_v47  ;;  %v5060_v1 = vunpack.c.l.bf16 %v3983_v4  ;;  %v5061_v5 = vunpack.c.h.bf16 %v3983_v4 }
 0x156   :  { %v1503_v43 = vrot.slane %v5054_v24, 4  ;;  %v1509_v49 = vrot.slane %v5055_v34, 4  ;;  %v1515_v2 = vrot.slane %v5056_v3, 4  ;;  %v1521_v27 = vrot.slane %v5057_v12, 4 }
 0x157   :  { %v1527_v51 = vrot.slane %v5058_v30, 4  ;;  %v1533_v52 = vrot.slane %v5059_v57, 4  ;;  %v1539_v60 = vrot.slane %v5060_v1, 4  ;;  %v1545_v13 = vrot.slane %v5061_v5, 4 }
 0x158   :  { %v5062_v32 = vmov %v5054_v24  ;;  %v5063_v48 = vmov %v5055_v34  ;;  %v5064_v11 = vmov %v5056_v3  ;;  %v5065_v33 = vmov %v5057_v12 }
 0x159   :  { %v1504_v55 = vadd.f32 %v1503_v43, %v5062_v32  ;;  %v1510_v15 = vadd.f32 %v1509_v49, %v5063_v48  ;;  %v1516_v7 = vadd.f32 %v1515_v2, %v5064_v11  ;;  %v1522_v36 = vadd.f32 %v1521_v27, %v5065_v33 }
 0x15a   :  { %v5066_v28 = vmov %v5058_v30  ;;  %v5067_v29 = vmov %v5059_v57  ;;  %v5068_v17 = vmov %v5060_v1  ;;  %v5069_v21 = vmov %v5061_v5 }
 0x15b   :  { %v1528_v56 = vadd.f32 %v1527_v51, %v5066_v28  ;;  %v1534_v58 = vadd.f32 %v1533_v52, %v5067_v29  ;;  %v1540_v42 = vadd.f32 %v1539_v60, %v5068_v17  ;;  %v1546_v63 = vadd.f32 %v1545_v13, %v5069_v21 }
 0x15c   :  { %v1505_v59 = vrot.slane %v1504_v55, 2  ;;  %v1511_v24 = vrot.slane %v1510_v15, 2  ;;  %v1517_v43 = vrot.slane %v1516_v7, 2  ;;  %v1523_v34 = vrot.slane %v1522_v36, 2 }
 0x15d   :  { %v1529_v49 = vrot.slane %v1528_v56, 2  ;;  %v1535_v3 = vrot.slane %v1534_v58, 2  ;;  %v1541_v22 = vrot.slane %v1540_v42, 2  ;;  %v1547_v2 = vrot.slane %v1546_v63, 2 }
 0x15e   :  { %v1506_v12 = vadd.f32 %v1505_v59, %v1504_v55  ;;  %v1512_v27 = vadd.f32 %v1511_v24, %v1510_v15  ;;  %v1518_v30 = vadd.f32 %v1517_v43, %v1516_v7  ;;  %v1524_v51 = vadd.f32 %v1523_v34, %v1522_v36 }
 0x15f   :  { %v1530_v47 = vadd.f32 %v1529_v49, %v1528_v56  ;;  %v1536_v57 = vadd.f32 %v1535_v3, %v1534_v58  ;;  %v1542_v52 = vadd.f32 %v1541_v22, %v1540_v42  ;;  %v1548_v1 = vadd.f32 %v1547_v2, %v1546_v63  ;;  %v4177_v3 = vld [vmem:[#allocation3 + $0xa8] sm:$0xff] }
 0x160   :  { %v1507_v60 = vrot.slane %v1506_v12, 1  ;;  %v1513_v5 = vrot.slane %v1512_v27, 1  ;;  %v1519_v4 = vrot.slane %v1518_v30, 1  ;;  %v1525_v13 = vrot.slane %v1524_v51, 1 }
 0x161   :  { %v1531_v32 = vrot.slane %v1530_v47, 1  ;;  %v1537_v48 = vrot.slane %v1536_v57, 1  ;;  %v1543_v11 = vrot.slane %v1542_v52, 1  ;;  %v1549_v33 = vrot.slane %v1548_v1, 1 }
 0x162   :  { %v1508_v28 = vadd.f32 %v1507_v60, %v1506_v12  ;;  %v1514_v29 = vadd.f32 %v1513_v5, %v1512_v27  ;;  %v1520_v17 = vadd.f32 %v1519_v4, %v1518_v30  ;;  %v1526_v21 = vadd.f32 %v1525_v13, %v1524_v51  ;;  %v4195_v27 = vld [vmem:[#allocation3 + $0x168] sm:$0xff] }
 0x163   :  { %v1532_v55 = vadd.f32 %v1531_v32, %v1530_v47  ;;  %v1538_v15 = vadd.f32 %v1537_v48, %v1536_v57  ;;  %v1544_v7 = vadd.f32 %v1543_v11, %v1542_v52  ;;  %v1550_v36 = vadd.f32 %v1549_v33, %v1548_v1  ;;  %v4197_v30 = vld [vmem:[#allocation3 + $0x1a8] sm:$0xff] }
 0x164   :  { %v1583_v56 = vsel %vm316_vm0, %v4005_v14, %v4001_v61  ;;  %v1590_v58 = vsel %vm316_vm0, %v4007_v53, %v4003_v19  ;;  %v1597_v42 = vsel %vm316_vm0, %v1472_v45, %v1460_v9  ;;  %v1604_v63 = vsel %vm316_vm0, %v1478_v6, %v1466_v44  ;;  %v4199_v51 = vld [vmem:[#allocation3 + $0x1e8] sm:$0xff] }
 0x165   :  { %v1584_v59 = vsel %vm318_vm1, %v4009_v54, %v1583_v56  ;;  %v1591_v24 = vsel %vm318_vm1, %v4011_v23, %v1590_v58  ;;  %v1598_v43 = vsel %vm318_vm1, %v1484_v62, %v1597_v42  ;;  %v1605_v34 = vsel %vm318_vm1, %v1490_v40, %v1604_v63  ;;  %v4205_v57 = vld [vmem:[#allocation3 + $0x228] sm:$0xff] }
 0x166   :  { %v1585_v61 = vsel %vm320_vm2, %v4013_v16, %v1584_v59  ;;  %v1592_v19 = vsel %vm320_vm2, %v4015_v46, %v1591_v24  ;;  %v1599_v14 = vsel %vm320_vm2, %v1496_v41, %v1598_v43  ;;  %v1606_v53 = vsel %vm320_vm2, %v1502_v39, %v1605_v34  ;;  %v4167_v41 = vld [vmem:[#allocation3 + $0x28] sm:$0xff] }
 0x167   :  { %v1586_v54 = vsel %vm322_vm3, %v4049_v0, %v1585_v61  ;;  %v1593_v23 = vsel %vm322_vm3, %v4051_v20, %v1592_v19  ;;  %v1600_v9 = vsel %vm322_vm3, %v1508_v28, %v1599_v14  ;;  %v1607_v44 = vsel %vm322_vm3, %v1514_v29, %v1606_v53  ;;  %v4213_v4 = vld [vmem:[#allocation3 + $0x2a8] sm:$0xff] }
 0x168   :  { %v1587_v16 = vsel %vm324_vm4, %v4053_v8, %v1586_v54  ;;  %v1594_v46 = vsel %vm324_vm4, %v4055_v37, %v1593_v23  ;;  %v1601_v45 = vsel %vm324_vm4, %v1520_v17, %v1600_v9  ;;  %v1608_v6 = vsel %vm324_vm4, %v1526_v21, %v1607_v44  ;;  %v4169_v8 = vld [vmem:[#allocation3 + $0x68] sm:$0xff] }
 0x169   :  { %v1588_v0 = vsel %vm326_vm5, %v4057_v26, %v1587_v16  ;;  %v1595_v20 = vsel %vm326_vm5, %v4059_v38, %v1594_v46  ;;  %v1602_v62 = vsel %vm326_vm5, %v1532_v55, %v1601_v45  ;;  %v1609_v40 = vsel %vm326_vm5, %v1538_v15, %v1608_v6  ;;  %v4179_v38 = vld [vmem:[#allocation3 + $0xe8] sm:$0xff] }
 0x16a   :  { %v1589_v37 = vsel %vm328_vm6, %v4061_v35, %v1588_v0  ;;  %v1596_v39 = vsel %vm328_vm6, %v4063_v50, %v1595_v20  ;;  %v1603_v49 = vsel %vm328_vm6, %v1544_v7, %v1602_v62  ;;  %v1610_v26 = vsel %vm328_vm6, %v1550_v36, %v1609_v40  ;;  %v4193_v50 = vld [vmem:[#allocation3 + $0x128] sm:$0xff] }
 0x16b   :  { %v4182_v22 = vadd.f32 %v1589_v37, %v3934_v10  ;;  %v4185_v2 = vadd.f32 %v1596_v39, %v3937_v25  ;;  %v4188_v12 = vadd.f32 %v1603_v49, %v3940_v18  ;;  %v4191_v35 = vadd.f32 %v1610_v26, %v3943_v31  ;;  %v4207_v31 = vld [vmem:[#allocation3 + $0x268] sm:$0xff] }
 0x16c   :  { %v1643_v10 = vunpack.c.l.bf16 %v4167_v41  ;;  %v1644_v47 = vunpack.c.h.bf16 %v4167_v41  ;;  %v1645_v25 = vunpack.c.l.bf16 %v4169_v8  ;;  %v1646_v18 = vunpack.c.h.bf16 %v4169_v8  ;;  %v4215_v13 = vld [vmem:[#allocation3 + $0x2e8] sm:$0xff] }
 0x16d   :  { %v1647_v52 = vunpack.c.l.bf16 %v4177_v3  ;;  %v1648_v1 = vunpack.c.h.bf16 %v4177_v3  ;;  %v1649_v60 = vunpack.c.l.bf16 %v4179_v38  ;;  %v1650_v5 = vunpack.c.h.bf16 %v4179_v38  ;;  %v4221_v28 = vld [vmem:[#allocation3 + $0x328] sm:$0xff] }
 0x16e   :  { %v1651_v32 = vunpack.c.l.bf16 %v4193_v50  ;;  %v1652_v48 = vunpack.c.h.bf16 %v4193_v50  ;;  %v1653_v11 = vunpack.c.l.bf16 %v4195_v27  ;;  %v1654_v33 = vunpack.c.h.bf16 %v4195_v27  ;;  %v4223_v29 = vld [vmem:[#allocation3 + $0x368] sm:$0xff] }
 0x16f   :  { %v1655_v17 = vunpack.c.l.bf16 %v4197_v30  ;;  %v1656_v21 = vunpack.c.h.bf16 %v4197_v30  ;;  %v1657_v55 = vunpack.c.l.bf16 %v4199_v51  ;;  %v1658_v15 = vunpack.c.h.bf16 %v4199_v51  ;;  %v4229_v7 = vld [vmem:[#allocation3 + $0x3a8] sm:$0xff] }
 0x170   :  { %v4231_v36 = vld [vmem:[#allocation3 + $0x3e8] sm:$0xff]  ;;  %v1659_v56 = vunpack.c.l.bf16 %v4205_v57  ;;  %v1660_v58 = vunpack.c.h.bf16 %v4205_v57  ;;  %v1661_v42 = vunpack.c.l.bf16 %v4207_v31  ;;  %v1662_v63 = vunpack.c.h.bf16 %v4207_v31 }
 0x171   :  { %v1675_v16 = vrot.slane %v1643_v10, 4  ;;  %v1681_v46 = vrot.slane %v1644_v47, 4  ;;  %v1687_v45 = vrot.slane %v1645_v25, 4  ;;  %v1693_v6 = vrot.slane %v1646_v18, 4 }
 0x172   :  { %v1699_v0 = vrot.slane %v1647_v52, 4  ;;  %v1705_v20 = vrot.slane %v1648_v1, 4  ;;  %v1711_v62 = vrot.slane %v1649_v60, 4  ;;  %v1717_v40 = vrot.slane %v1650_v5, 4 }
 0x173   :  { %v1676_v41 = vadd.f32 %v1675_v16, %v1643_v10  ;;  %v1682_v8 = vadd.f32 %v1681_v46, %v1644_v47  ;;  %v1688_v37 = vadd.f32 %v1687_v45, %v1645_v25  ;;  %v1694_v39 = vadd.f32 %v1693_v6, %v1646_v18 }
 0x174   :  { %v1700_v49 = vadd.f32 %v1699_v0, %v1647_v52  ;;  %v1706_v26 = vadd.f32 %v1705_v20, %v1648_v1  ;;  %v1712_v3 = vadd.f32 %v1711_v62, %v1649_v60  ;;  %v1718_v38 = vadd.f32 %v1717_v40, %v1650_v5 }
 0x175   :  { %v1677_v23 = vrot.slane %v1676_v41, 2  ;;  %v1683_v9 = vrot.slane %v1682_v8, 2  ;;  %v1689_v54 = vrot.slane %v1688_v37, 2  ;;  %v1695_v44 = vrot.slane %v1694_v39, 2 }
 0x176   :  { %v1701_v53 = vrot.slane %v1700_v49, 2  ;;  %v1707_v14 = vrot.slane %v1706_v26, 2  ;;  %v1713_v19 = vrot.slane %v1712_v3, 2  ;;  %v1719_v61 = vrot.slane %v1718_v38, 2 }
 0x177   :  { %v1678_v34 = vadd.f32 %v1677_v23, %v1676_v41  ;;  %v1684_v43 = vadd.f32 %v1683_v9, %v1682_v8  ;;  %v1690_v24 = vadd.f32 %v1689_v54, %v1688_v37  ;;  %v1696_v59 = vadd.f32 %v1695_v44, %v1694_v39 }
 0x178   :  { %v1702_v10 = vadd.f32 %v1701_v53, %v1700_v49  ;;  %v1708_v47 = vadd.f32 %v1707_v14, %v1706_v26  ;;  %v1714_v25 = vadd.f32 %v1713_v19, %v1712_v3  ;;  %v1720_v18 = vadd.f32 %v1719_v61, %v1718_v38 }
 0x179   :  { %v1679_v52 = vrot.slane %v1678_v34, 1  ;;  %v1685_v1 = vrot.slane %v1684_v43, 1  ;;  %v1691_v60 = vrot.slane %v1690_v24, 1  ;;  %v1697_v5 = vrot.slane %v1696_v59, 1 }
 0x17a   :  { %v1703_v16 = vrot.slane %v1702_v10, 1  ;;  %v1709_v46 = vrot.slane %v1708_v47, 1  ;;  %v1715_v45 = vrot.slane %v1714_v25, 1  ;;  %v1721_v6 = vrot.slane %v1720_v18, 1 }
 0x17b   :  { %v4249_v0 = vadd.f32 %v1679_v52, %v1678_v34  ;;  %v4251_v20 = vadd.f32 %v1685_v1, %v1684_v43  ;;  %v4253_v23 = vadd.f32 %v1691_v60, %v1690_v24  ;;  %v4255_v54 = vadd.f32 %v1697_v5, %v1696_v59 }
 0x17c   :  { %v4257_v53 = vadd.f32 %v1703_v16, %v1702_v10  ;;  %v4259_v19 = vadd.f32 %v1709_v46, %v1708_v47  ;;  %v4261_v61 = vadd.f32 %v1715_v45, %v1714_v25  ;;  %v4263_v14 = vadd.f32 %v1721_v6, %v1720_v18 }
 0x17d   :  { %v1723_v9 = vrot.slane %v1651_v32, 4  ;;  %v1729_v34 = vrot.slane %v1652_v48, 4  ;;  %v1735_v24 = vrot.slane %v1653_v11, 4  ;;  %v1741_v59 = vrot.slane %v1654_v33, 4 }
 0x17e   :  { %v1747_v43 = vrot.slane %v1655_v17, 4  ;;  %v1753_v44 = vrot.slane %v1656_v21, 4  ;;  %v1759_v62 = vrot.slane %v1657_v55, 4  ;;  %v1765_v40 = vrot.slane %v1658_v15, 4 }
 0x17f   :  { %v1724_v41 = vadd.f32 %v1723_v9, %v1651_v32  ;;  %v1730_v8 = vadd.f32 %v1729_v34, %v1652_v48  ;;  %v1736_v37 = vadd.f32 %v1735_v24, %v1653_v11  ;;  %v1742_v39 = vadd.f32 %v1741_v59, %v1654_v33 }
 0x180   :  { %v1748_v49 = vadd.f32 %v1747_v43, %v1655_v17  ;;  %v1754_v26 = vadd.f32 %v1753_v44, %v1656_v21  ;;  %v1760_v3 = vadd.f32 %v1759_v62, %v1657_v55  ;;  %v1766_v32 = vadd.f32 %v1765_v40, %v1658_v15 }
 0x181   :  { %v1725_v50 = vrot.slane %v1724_v41, 2  ;;  %v1731_v48 = vrot.slane %v1730_v8, 2  ;;  %v1737_v38 = vrot.slane %v1736_v37, 2  ;;  %v1743_v10 = vrot.slane %v1742_v39, 2 }
 0x182   :  { %v1749_v11 = vrot.slane %v1748_v49, 2  ;;  %v1755_v47 = vrot.slane %v1754_v26, 2  ;;  %v1761_v27 = vrot.slane %v1760_v3, 2  ;;  %v1767_v33 = vrot.slane %v1766_v32, 2 }
 0x183   :  { %v1726_v25 = vadd.f32 %v1725_v50, %v1724_v41  ;;  %v1732_v18 = vadd.f32 %v1731_v48, %v1730_v8  ;;  %v1738_v17 = vadd.f32 %v1737_v38, %v1736_v37  ;;  %v1744_v52 = vadd.f32 %v1743_v10, %v1742_v39 }
 0x184   :  { %v1750_v30 = vadd.f32 %v1749_v11, %v1748_v49  ;;  %v1756_v21 = vadd.f32 %v1755_v47, %v1754_v26  ;;  %v1762_v1 = vadd.f32 %v1761_v27, %v1760_v3  ;;  %v1768_v60 = vadd.f32 %v1767_v33, %v1766_v32 }
 0x185   :  { %v1727_v55 = vrot.slane %v1726_v25, 1  ;;  %v1733_v5 = vrot.slane %v1732_v18, 1  ;;  %v1739_v51 = vrot.slane %v1738_v17, 1  ;;  %v1745_v15 = vrot.slane %v1744_v52, 1 }
 0x186   :  { %v1751_v16 = vrot.slane %v1750_v30, 1  ;;  %v1757_v46 = vrot.slane %v1756_v21, 1  ;;  %v1763_v45 = vrot.slane %v1762_v1, 1  ;;  %v1769_v6 = vrot.slane %v1768_v60, 1 }
 0x187   :  { %v4297_v9 = vadd.f32 %v1727_v55, %v1726_v25  ;;  %v4299_v34 = vadd.f32 %v1733_v5, %v1732_v18  ;;  %v4301_v24 = vadd.f32 %v1739_v51, %v1738_v17  ;;  %v4303_v59 = vadd.f32 %v1745_v15, %v1744_v52  ;;  %v2830_v15 = vld [vmem:[#allocation6 + $0x38] sm:$0xff]  }
 0x188   :  { %v4305_v43 = vadd.f32 %v1751_v16, %v1750_v30  ;;  %v4307_v44 = vadd.f32 %v1757_v46, %v1756_v21  ;;  %v4309_v62 = vadd.f32 %v1763_v45, %v1762_v1  ;;  %v4311_v40 = vadd.f32 %v1769_v6, %v1768_v60 }
 0x189   :  { %v1771_v41 = vrot.slane %v1659_v56, 4  ;;  %v1777_v8 = vrot.slane %v1660_v58, 4  ;;  %v1783_v37 = vrot.slane %v1661_v42, 4  ;;  %v1789_v39 = vrot.slane %v1662_v63, 4 }
 0x18a   :  { %v5070_v49 = vunpack.c.l.bf16 %v4213_v4  ;;  %v5071_v3 = vunpack.c.h.bf16 %v4213_v4  ;;  %v5072_v50 = vunpack.c.l.bf16 %v4215_v13  ;;  %v5073_v38 = vunpack.c.h.bf16 %v4215_v13 }
 0x18b   :  { %v1772_v11 = vadd.f32 %v1771_v41, %v1659_v56  ;;  %v1778_v47 = vadd.f32 %v1777_v8, %v1660_v58  ;;  %v1784_v27 = vadd.f32 %v1783_v37, %v1661_v42  ;;  %v1790_v33 = vadd.f32 %v1789_v39, %v1662_v63  ;;  %v2838_v42 = vld [vmem:[#allocation6 + $0x78] sm:$0xff]  }
 0x18c   :  { %v1795_v26 = vrot.slane %v5070_v49, 4  ;;  %v1801_v32 = vrot.slane %v5071_v3, 4  ;;  %v1807_v48 = vrot.slane %v5072_v50, 4  ;;  %v1813_v10 = vrot.slane %v5073_v38, 4  ;;  %2794 = vmatprep.subr.bf16.mxu0 %v2838_v42  ;;  %v2836_v42 = vld [vmem:[#allocation6 + $0x68] sm:$0xff]  }
 0x18d   :  { %v5074_v25 = vmov %v5070_v49  ;;  %v5075_v17 = vmov %v5071_v3  ;;  %v5076_v30 = vmov %v5072_v50  ;;  %v5077_v56 = vmov %v5073_v38  ;;  %2795 = vmatpush3.bf16.msra.mxu0 %v2830_v15  ;;  %v2837_v3 = vld [vmem:[#allocation6 + $0x70] sm:$0xff]  }
 0x18e   :  { %v1796_v18 = vadd.f32 %v1795_v26, %v5074_v25  ;;  %v1802_v52 = vadd.f32 %v1801_v32, %v5075_v17  ;;  %v1808_v21 = vadd.f32 %v1807_v48, %v5076_v30  ;;  %v1814_v1 = vadd.f32 %v1813_v10, %v5077_v56  ;;  %v2829_v10 = vld [vmem:[#allocation6 + $0x30] sm:$0xff]   ;;  %2796 = vmatprep.subr.bf16.mxu0 %v2837_v3 }
 0x18f   :  { %v1773_v57 = vrot.slane %v1772_v11, 2  ;;  %v1779_v58 = vrot.slane %v1778_v47, 2  ;;  %v1785_v60 = vrot.slane %v1784_v27, 2  ;;  %v1791_v55 = vrot.slane %v1790_v33, 2 }
 0x190   :  { %v1797_v5 = vrot.slane %v1796_v18, 2  ;;  %v1803_v31 = vrot.slane %v1802_v52, 2  ;;  %v1809_v63 = vrot.slane %v1808_v21, 2  ;;  %v1815_v51 = vrot.slane %v1814_v1, 2 }
 0x191   :  { %v1774_v16 = vadd.f32 %v1773_v57, %v1772_v11  ;;  %v1780_v46 = vadd.f32 %v1779_v58, %v1778_v47  ;;  %v1786_v4 = vadd.f32 %v1785_v60, %v1784_v27  ;;  %v1792_v45 = vadd.f32 %v1791_v55, %v1790_v33  ;;  %2797 = vmatpush3.bf16.msra.mxu0 %v2829_v10 }
 0x192   :  { %v1798_v6 = vadd.f32 %v1797_v5, %v1796_v18  ;;  %v1804_v41 = vadd.f32 %v1803_v31, %v1802_v52  ;;  %v1810_v8 = vadd.f32 %v1809_v63, %v1808_v21  ;;  %v1816_v13 = vadd.f32 %v1815_v51, %v1814_v1  ;;  %2798 = vmatprep.subr.bf16.mxu0 %v2836_v42 }
 0x193   :  { %v1775_v37 = vrot.slane %v1774_v16, 1  ;;  %v1781_v39 = vrot.slane %v1780_v46, 1  ;;  %v1787_v49 = vrot.slane %v1786_v4, 1  ;;  %v1793_v26 = vrot.slane %v1792_v45, 1 }
 0x194   :  { %v1799_v32 = vrot.slane %v1798_v6, 1  ;;  %v1805_v50 = vrot.slane %v1804_v41, 1  ;;  %v1811_v48 = vrot.slane %v1810_v8, 1  ;;  %v1817_v38 = vrot.slane %v1816_v13, 1 }
 0x195   :  { %v4345_v11 = vadd.f32 %v1775_v37, %v1774_v16  ;;  %v4347_v47 = vadd.f32 %v1781_v39, %v1780_v46  ;;  %v4349_v27 = vadd.f32 %v1787_v49, %v1786_v4  ;;  %v4351_v33 = vadd.f32 %v1793_v26, %v1792_v45  ;;  %v2828_v45 = vld [vmem:[#allocation6 + $0x28] sm:$0xff]  }
 0x196   :  { %v4353_v25 = vadd.f32 %v1799_v32, %v1798_v6  ;;  %v4355_v18 = vadd.f32 %v1805_v50, %v1804_v41  ;;  %v4357_v17 = vadd.f32 %v1811_v48, %v1810_v8  ;;  %v4359_v52 = vadd.f32 %v1817_v38, %v1816_v13  ;;  %2799 = vmatpush3.bf16.msra.mxu0 %v2828_v45 }
 0x197   :  { %v5078_v30 = vunpack.c.l.bf16 %v4221_v28  ;;  %v5079_v56 = vunpack.c.h.bf16 %v4221_v28  ;;  %v5080_v57 = vunpack.c.l.bf16 %v4223_v29  ;;  %v5081_v60 = vunpack.c.h.bf16 %v4223_v29  ;;  %v2835_v29 = vld [vmem:[#allocation6 + $0x60] sm:$0xff]  }
 0x198   :  { %v5082_v5 = vunpack.c.l.bf16 %v4229_v7  ;;  %v5083_v63 = vunpack.c.h.bf16 %v4229_v7  ;;  %v5084_v15 = vunpack.c.l.bf16 %v4231_v36  ;;  %v5085_v46 = vunpack.c.h.bf16 %v4231_v36  ;;  %2800 = vmatprep.subr.bf16.mxu0 %v2835_v29  ;;  %v2833_v29 = vld [vmem:[#allocation6 + $0x50] sm:$0xff]  }
 0x199   :  { %v1819_v21 = vrot.slane %v5078_v30, 4  ;;  %v1825_v1 = vrot.slane %v5079_v56, 4  ;;  %v1831_v58 = vrot.slane %v5080_v57, 4  ;;  %v1837_v55 = vrot.slane %v5081_v60, 4 }
 0x19a   :  { %v1843_v31 = vrot.slane %v5082_v5, 4  ;;  %v1849_v51 = vrot.slane %v5083_v63, 4  ;;  %v1855_v16 = vrot.slane %v5084_v15, 4  ;;  %v1861_v4 = vrot.slane %v5085_v46, 4 }
 0x19b   :  { %v5086_v6 = vmov %v5078_v30  ;;  %v5087_v8 = vmov %v5079_v56  ;;  %v5088_v37 = vmov %v5080_v57  ;;  %v5089_v49 = vmov %v5081_v60 }
 0x19c   :  { %v1820_v41 = vadd.f32 %v1819_v21, %v5086_v6  ;;  %v1826_v13 = vadd.f32 %v1825_v1, %v5087_v8  ;;  %v1832_v39 = vadd.f32 %v1831_v58, %v5088_v37  ;;  %v1838_v26 = vadd.f32 %v1837_v55, %v5089_v49  ;;  %v2834_v37 = vld [vmem:[#allocation6 + $0x58] sm:$0xff]  }
 0x19d   :  { %v5090_v3 = vmov %v5082_v5  ;;  %v5091_v50 = vmov %v5083_v63  ;;  %v5092_v38 = vmov %v5084_v15  ;;  %v5093_v30 = vmov %v5085_v46  ;;  %v2827_v5 = vld [vmem:[#allocation6 + $0x20] sm:$0xff]  }
 0x19e   :  { %v1844_v32 = vadd.f32 %v1843_v31, %v5090_v3  ;;  %v1850_v48 = vadd.f32 %v1849_v51, %v5091_v50  ;;  %v1856_v10 = vadd.f32 %v1855_v16, %v5092_v38  ;;  %v1862_v28 = vadd.f32 %v1861_v4, %v5093_v30  ;;  %2801 = vmatpush3.bf16.msra.mxu0 %v2827_v5  ;;  %v2826_v30 = vld [vmem:[#allocation6 + $0x18] sm:$0xff]   ;;  %v4439_v5 = vld [vmem:[#allocation3 + $0x30] sm:$0xff] }
 0x19f   :  { %v1821_v21 = vrot.slane %v1820_v41, 2  ;;  %v1827_v56 = vrot.slane %v1826_v13, 2  ;;  %v1833_v1 = vrot.slane %v1832_v39, 2  ;;  %v1839_v57 = vrot.slane %v1838_v26, 2  ;;  %2802 = vmatprep.subr.bf16.mxu0 %v2834_v37  ;;  %v4479_v37 = vld [vmem:[#allocation3 + $0x270] sm:$0xff] }
 0x1a0   :  { %v1845_v58 = vrot.slane %v1844_v32, 2  ;;  %v1851_v60 = vrot.slane %v1850_v48, 2  ;;  %v1857_v55 = vrot.slane %v1856_v10, 2  ;;  %v1863_v42 = vrot.slane %v1862_v28, 2 }
 0x1a1   :  { %v1822_v31 = vadd.f32 %v1821_v21, %v1820_v41  ;;  %v1828_v7 = vadd.f32 %v1827_v56, %v1826_v13  ;;  %v1834_v63 = vadd.f32 %v1833_v1, %v1832_v39  ;;  %v1840_v51 = vadd.f32 %v1839_v57, %v1838_v26 }
 0x1a2   :  { %v1846_v15 = vadd.f32 %v1845_v58, %v1844_v32  ;;  %v1852_v16 = vadd.f32 %v1851_v60, %v1850_v48  ;;  %v1858_v36 = vadd.f32 %v1857_v55, %v1856_v10  ;;  %v1864_v46 = vadd.f32 %v1863_v42, %v1862_v28  ;;  %2803 = vmatpush3.bf16.msra.mxu0 %v2826_v30  ;;  %v2823_v30 = vld [vmem:[#allocation6] sm:$0xff]  }
 0x1a3   :  { %v1823_v4 = vrot.slane %v1822_v31, 1  ;;  %v1829_v45 = vrot.slane %v1828_v7, 1  ;;  %v1835_v6 = vrot.slane %v1834_v63, 1  ;;  %v1841_v8 = vrot.slane %v1840_v51, 1  ;;  %2804 = vmatprep.subr.bf16.mxu0 %v2833_v29  ;;  %v4501_v29 = vld [vmem:[#allocation3 + $0x3b0] sm:$0xff] }
 0x1a4   :  { %v1847_v49 = vrot.slane %v1846_v15, 1  ;;  %v1853_v3 = vrot.slane %v1852_v16, 1  ;;  %v1859_v50 = vrot.slane %v1858_v36, 1  ;;  %v1865_v38 = vrot.slane %v1864_v46, 1 }
 0x1a5   :  { %v1824_v41 = vadd.f32 %v1823_v4, %v1822_v31  ;;  %v1830_v13 = vadd.f32 %v1829_v45, %v1828_v7  ;;  %v1836_v39 = vadd.f32 %v1835_v6, %v1834_v63  ;;  %v1842_v26 = vadd.f32 %v1841_v8, %v1840_v51  ;;  %v4451_v51 = vld [vmem:[#allocation3 + $0xf0] sm:$0xff]  ;;  %v2831_v8 = vld [vmem:[#allocation6 + $0x40] sm:$0xff]  }
 0x1a6   :  { %v1848_v32 = vadd.f32 %v1847_v49, %v1846_v15  ;;  %v1854_v48 = vadd.f32 %v1853_v3, %v1852_v16  ;;  %v1860_v10 = vadd.f32 %v1859_v50, %v1858_v36  ;;  %v1866_v28 = vadd.f32 %v1865_v38, %v1864_v46  ;;  %v4465_v36 = vld [vmem:[#allocation3 + $0x130] sm:$0xff] }
 0x1a7   :  { %v1899_v21 = vsel %vm316_vm0, %v4253_v23, %v4249_v0  ;;  %v1906_v56 = vsel %vm316_vm0, %v4255_v54, %v4251_v20  ;;  %v1913_v1 = vsel %vm316_vm0, %v4349_v27, %v4345_v11  ;;  %v1920_v57 = vsel %vm316_vm0, %v4351_v33, %v4347_v47  ;;  %v2825_v23 = vld [vmem:[#allocation6 + $0x10] sm:$0xff]  }
 0x1a8   :  { %v1900_v58 = vsel %vm318_vm1, %v4257_v53, %v1899_v21  ;;  %v1907_v60 = vsel %vm318_vm1, %v4259_v19, %v1906_v56  ;;  %v1914_v0 = vsel %vm318_vm1, %v4353_v25, %v1913_v1  ;;  %v1921_v20 = vsel %vm318_vm1, %v4355_v18, %v1920_v57  ;;  %2805 = vmatpush3.bf16.msra.mxu0 %v2825_v23  ;;  %v4467_v46 = vld [vmem:[#allocation3 + $0x170] sm:$0xff] }
 0x1a9   :  { %v1901_v54 = vsel %vm320_vm2, %v4261_v61, %v1900_v58  ;;  %v1908_v11 = vsel %vm320_vm2, %v4263_v14, %v1907_v60  ;;  %v1915_v47 = vsel %vm320_vm2, %v4357_v17, %v1914_v0  ;;  %v1922_v53 = vsel %vm320_vm2, %v4359_v52, %v1921_v20  ;;  %v2832_v52 = vld [vmem:[#allocation6 + $0x48] sm:$0xff]   ;;  %v4469_v4 = vld [vmem:[#allocation3 + $0x1b0] sm:$0xff] }
 0x1aa   :  { %v1902_v19 = vsel %vm322_vm3, %v4297_v9, %v1901_v54  ;;  %v1909_v27 = vsel %vm322_vm3, %v4299_v34, %v1908_v11  ;;  %v1916_v33 = vsel %vm322_vm3, %v1824_v41, %v1915_v47  ;;  %v1923_v61 = vsel %vm322_vm3, %v1830_v13, %v1922_v53  ;;  %2806 = vmatprep.subr.bf16.mxu0 %v2832_v52  ;;  %v4471_v45 = vld [vmem:[#allocation3 + $0x1f0] sm:$0xff] }
 0x1ab   :  { %v1903_v14 = vsel %vm324_vm4, %v4301_v24, %v1902_v19  ;;  %v1910_v25 = vsel %vm324_vm4, %v4303_v59, %v1909_v27  ;;  %v1917_v18 = vsel %vm324_vm4, %v1836_v39, %v1916_v33  ;;  %v1924_v17 = vsel %vm324_vm4, %v1842_v26, %v1923_v61  ;;  %v4441_v24 = vld [vmem:[#allocation3 + $0x70] sm:$0xff]  ;;  %v2824_v59 = vld [vmem:[#allocation6 + $0x8] sm:$0xff]  }
 0x1ac   :  { %v1904_v9 = vsel %vm326_vm5, %v4305_v43, %v1903_v14  ;;  %v1911_v34 = vsel %vm326_vm5, %v4307_v44, %v1910_v25  ;;  %v1918_v55 = vsel %vm326_vm5, %v1848_v32, %v1917_v18  ;;  %v1925_v42 = vsel %vm326_vm5, %v1854_v48, %v1924_v17  ;;  %v4449_v44 = vld [vmem:[#allocation3 + $0xb0] sm:$0xff]  ;;  %2807 = vmatpush3.bf16.msra.mxu0 %v2824_v59 }
 0x1ad   :  { %v1905_v31 = vsel %vm328_vm6, %v4309_v62, %v1904_v9  ;;  %v1912_v7 = vsel %vm328_vm6, %v4311_v40, %v1911_v34  ;;  %v1919_v43 = vsel %vm328_vm6, %v1860_v10, %v1918_v55  ;;  %v1926_v63 = vsel %vm328_vm6, %v1866_v28, %v1925_v42  ;;  %v4485_v41 = vld [vmem:[#allocation3 + $0x2b0] sm:$0xff]  ;;  %2808 = vmatprep.subr.bf16.mxu0 %v2831_v8 }
 0x1ae   :  { %v4454_v15 = vadd.f32 %v1905_v31, %v4182_v22  ;;  %v4457_v16 = vadd.f32 %v1912_v7, %v4185_v2  ;;  %v4460_v62 = vadd.f32 %v1919_v43, %v4188_v12  ;;  %v4463_v40 = vadd.f32 %v1926_v63, %v4191_v35  ;;  %v4477_v35 = vld [vmem:[#allocation3 + $0x230] sm:$0xff] }
 0x1af   :  { %v1959_v22 = vunpack.c.l.bf16 %v4439_v5  ;;  %v1960_v2 = vunpack.c.h.bf16 %v4439_v5  ;;  %v1961_v6 = vunpack.c.l.bf16 %v4441_v24  ;;  %v1962_v12 = vunpack.c.h.bf16 %v4441_v24  ;;  %v4487_v13 = vld [vmem:[#allocation3 + $0x2f0] sm:$0xff] }
 0x1b0   :  { %v1963_v49 = vunpack.c.l.bf16 %v4449_v44  ;;  %v1964_v3 = vunpack.c.h.bf16 %v4449_v44  ;;  %v1965_v50 = vunpack.c.l.bf16 %v4451_v51  ;;  %v1966_v38 = vunpack.c.h.bf16 %v4451_v51  ;;  %v4493_v10 = vld [vmem:[#allocation3 + $0x330] sm:$0xff]  ;;  %2809 = vmatpush3.bf16.msra.mxu0 %v2823_v30 }
 0x1b1   :  { %v1967_v39 = vunpack.c.l.bf16 %v4465_v36  ;;  %v1968_v26 = vunpack.c.h.bf16 %v4465_v36  ;;  %v1969_v32 = vunpack.c.l.bf16 %v4467_v46  ;;  %v1970_v48 = vunpack.c.h.bf16 %v4467_v46  ;;  %v4495_v28 = vld [vmem:[#allocation3 + $0x370] sm:$0xff] }
 0x1b2   :  { %v1971_v21 = vunpack.c.l.bf16 %v4469_v4  ;;  %v1972_v56 = vunpack.c.h.bf16 %v4469_v4  ;;  %v1973_v1 = vunpack.c.l.bf16 %v4471_v45  ;;  %v1974_v57 = vunpack.c.h.bf16 %v4471_v45  ;;  %v4503_v58 = vld [vmem:[#allocation3 + $0x3f0] sm:$0xff] }
 0x1b3   :  { %v1975_v60 = vunpack.c.l.bf16 %v4477_v35  ;;  %v1976_v0 = vunpack.c.h.bf16 %v4477_v35  ;;  %v1977_v20 = vunpack.c.l.bf16 %v4479_v37  ;;  %v1978_v23 = vunpack.c.h.bf16 %v4479_v37 }
 0x1b4   :  { %v1991_v52 = vrot.slane %v1959_v22, 4  ;;  %v1997_v9 = vrot.slane %v1960_v2, 4  ;;  %v2003_v34 = vrot.slane %v1961_v6, 4  ;;  %v2009_v55 = vrot.slane %v1962_v12, 4 }
 0x1b5   :  { %v2015_v42 = vrot.slane %v1963_v49, 4  ;;  %v2021_v5 = vrot.slane %v1964_v3, 4  ;;  %v2027_v24 = vrot.slane %v1965_v50, 4  ;;  %v2033_v59 = vrot.slane %v1966_v38, 4 }
 0x1b6   :  { %v1992_v31 = vadd.f32 %v1991_v52, %v1959_v22  ;;  %v1998_v7 = vadd.f32 %v1997_v9, %v1960_v2  ;;  %v2004_v43 = vadd.f32 %v2003_v34, %v1961_v6  ;;  %v2010_v63 = vadd.f32 %v2009_v55, %v1962_v12 }
 0x1b7   :  { %v2016_v44 = vadd.f32 %v2015_v42, %v1963_v49  ;;  %v2022_v51 = vadd.f32 %v2021_v5, %v1964_v3  ;;  %v2028_v8 = vadd.f32 %v2027_v24, %v1965_v50  ;;  %v2034_v30 = vadd.f32 %v2033_v59, %v1966_v38 }
 0x1b8   :  { %v1993_v25 = vrot.slane %v1992_v31, 2  ;;  %v1999_v18 = vrot.slane %v1998_v7, 2  ;;  %v2005_v14 = vrot.slane %v2004_v43, 2  ;;  %v2011_v17 = vrot.slane %v2010_v63, 2 }
 0x1b9   :  { %v2017_v61 = vrot.slane %v2016_v44, 2  ;;  %v2023_v33 = vrot.slane %v2022_v51, 2  ;;  %v2029_v27 = vrot.slane %v2028_v8, 2  ;;  %v2035_v19 = vrot.slane %v2034_v30, 2 }
 0x1ba   :  { %v1994_v53 = vadd.f32 %v1993_v25, %v1992_v31  ;;  %v2000_v47 = vadd.f32 %v1999_v18, %v1998_v7  ;;  %v2006_v11 = vadd.f32 %v2005_v14, %v2004_v43  ;;  %v2012_v54 = vadd.f32 %v2011_v17, %v2010_v63 }
 0x1bb   :  { %v2018_v22 = vadd.f32 %v2017_v61, %v2016_v44  ;;  %v2024_v2 = vadd.f32 %v2023_v33, %v2022_v51  ;;  %v2030_v6 = vadd.f32 %v2029_v27, %v2028_v8  ;;  %v2036_v12 = vadd.f32 %v2035_v19, %v2034_v30 }
 0x1bc   :  { %v1995_v49 = vrot.slane %v1994_v53, 1  ;;  %v2001_v3 = vrot.slane %v2000_v47, 1  ;;  %v2007_v50 = vrot.slane %v2006_v11, 1  ;;  %v2013_v38 = vrot.slane %v2012_v54, 1 }
 0x1bd   :  { %v2019_v52 = vrot.slane %v2018_v22, 1  ;;  %v2025_v9 = vrot.slane %v2024_v2, 1  ;;  %v2031_v34 = vrot.slane %v2030_v6, 1  ;;  %v2037_v55 = vrot.slane %v2036_v12, 1 }
 0x1be   :  { %v4521_v42 = vadd.f32 %v1995_v49, %v1994_v53  ;;  %v4523_v5 = vadd.f32 %v2001_v3, %v2000_v47  ;;  %v4525_v25 = vadd.f32 %v2007_v50, %v2006_v11  ;;  %v4527_v14 = vadd.f32 %v2013_v38, %v2012_v54 }
 0x1bf   :  { %v4529_v61 = vadd.f32 %v2019_v52, %v2018_v22  ;;  %v4531_v27 = vadd.f32 %v2025_v9, %v2024_v2  ;;  %v4533_v19 = vadd.f32 %v2031_v34, %v2030_v6  ;;  %v4535_v33 = vadd.f32 %v2037_v55, %v2036_v12 }
 0x1c0   :  { %v2039_v18 = vrot.slane %v1967_v39, 4  ;;  %v2045_v53 = vrot.slane %v1968_v26, 4  ;;  %v2051_v11 = vrot.slane %v1969_v32, 4  ;;  %v2057_v54 = vrot.slane %v1970_v48, 4 }
 0x1c1   :  { %v2063_v47 = vrot.slane %v1971_v21, 4  ;;  %v2069_v17 = vrot.slane %v1972_v56, 4  ;;  %v2075_v24 = vrot.slane %v1973_v1, 4  ;;  %v2081_v59 = vrot.slane %v1974_v57, 4 }
 0x1c2   :  { %v2040_v31 = vadd.f32 %v2039_v18, %v1967_v39  ;;  %v2046_v7 = vadd.f32 %v2045_v53, %v1968_v26  ;;  %v2052_v43 = vadd.f32 %v2051_v11, %v1969_v32  ;;  %v2058_v63 = vadd.f32 %v2057_v54, %v1970_v48 }
 0x1c3   :  { %v2064_v44 = vadd.f32 %v2063_v47, %v1971_v21  ;;  %v2070_v51 = vadd.f32 %v2069_v17, %v1972_v56  ;;  %v2076_v8 = vadd.f32 %v2075_v24, %v1973_v1  ;;  %v2082_v39 = vadd.f32 %v2081_v59, %v1974_v57 }
 0x1c4   :  { %v2041_v36 = vrot.slane %v2040_v31, 2  ;;  %v2047_v26 = vrot.slane %v2046_v7, 2  ;;  %v2053_v30 = vrot.slane %v2052_v43, 2  ;;  %v2059_v22 = vrot.slane %v2058_v63, 2 }
 0x1c5   :  { %v2065_v32 = vrot.slane %v2064_v44, 2  ;;  %v2071_v2 = vrot.slane %v2070_v51, 2  ;;  %v2077_v46 = vrot.slane %v2076_v8, 2  ;;  %v2083_v48 = vrot.slane %v2082_v39, 2 }
 0x1c6   :  { %v2042_v6 = vadd.f32 %v2041_v36, %v2040_v31  ;;  %v2048_v12 = vadd.f32 %v2047_v26, %v2046_v7  ;;  %v2054_v21 = vadd.f32 %v2053_v30, %v2052_v43  ;;  %v2060_v49 = vadd.f32 %v2059_v22, %v2058_v63 }
 0x1c7   :  { %v2066_v4 = vadd.f32 %v2065_v32, %v2064_v44  ;;  %v2072_v56 = vadd.f32 %v2071_v2, %v2070_v51  ;;  %v2078_v3 = vadd.f32 %v2077_v46, %v2076_v8  ;;  %v2084_v50 = vadd.f32 %v2083_v48, %v2082_v39 }
 0x1c8   :  { %v2043_v1 = vrot.slane %v2042_v6, 1  ;;  %v2049_v38 = vrot.slane %v2048_v12, 1  ;;  %v2055_v45 = vrot.slane %v2054_v21, 1  ;;  %v2061_v57 = vrot.slane %v2060_v49, 1 }
 0x1c9   :  { %v2067_v52 = vrot.slane %v2066_v4, 1  ;;  %v2073_v9 = vrot.slane %v2072_v56, 1  ;;  %v2079_v34 = vrot.slane %v2078_v3, 1  ;;  %v2085_v55 = vrot.slane %v2084_v50, 1 }
 0x1ca   :  { %v4569_v18 = vadd.f32 %v2043_v1, %v2042_v6  ;;  %v4571_v53 = vadd.f32 %v2049_v38, %v2048_v12  ;;  %v4573_v11 = vadd.f32 %v2055_v45, %v2054_v21  ;;  %v4575_v54 = vadd.f32 %v2061_v57, %v2060_v49 }
 0x1cb   :  { %v4577_v47 = vadd.f32 %v2067_v52, %v2066_v4  ;;  %v4579_v17 = vadd.f32 %v2073_v9, %v2072_v56  ;;  %v4581_v24 = vadd.f32 %v2079_v34, %v2078_v3  ;;  %v4583_v59 = vadd.f32 %v2085_v55, %v2084_v50 }
 0x1cc   :  { %v2087_v31 = vrot.slane %v1975_v60, 4  ;;  %v2093_v7 = vrot.slane %v1976_v0, 4  ;;  %v2099_v43 = vrot.slane %v1977_v20, 4  ;;  %v2105_v63 = vrot.slane %v1978_v23, 4 }
 0x1cd   :  { %v5094_v44 = vunpack.c.l.bf16 %v4485_v41  ;;  %v5095_v8 = vunpack.c.h.bf16 %v4485_v41  ;;  %v5096_v36 = vunpack.c.l.bf16 %v4487_v13  ;;  %v5097_v30 = vunpack.c.h.bf16 %v4487_v13 }
 0x1ce   :  { %v2088_v32 = vadd.f32 %v2087_v31, %v1975_v60  ;;  %v2094_v2 = vadd.f32 %v2093_v7, %v1976_v0  ;;  %v2100_v46 = vadd.f32 %v2099_v43, %v1977_v20  ;;  %v2106_v48 = vadd.f32 %v2105_v63, %v1978_v23 }
 0x1cf   :  { %v2111_v51 = vrot.slane %v5094_v44, 4  ;;  %v2117_v39 = vrot.slane %v5095_v8, 4  ;;  %v2123_v26 = vrot.slane %v5096_v36, 4  ;;  %v2129_v22 = vrot.slane %v5097_v30, 4 }
 0x1d0   :  { %v5098_v6 = vmov %v5094_v44  ;;  %v5099_v21 = vmov %v5095_v8  ;;  %v5100_v4 = vmov %v5096_v36  ;;  %v5101_v60 = vmov %v5097_v30 }
 0x1d1   :  { %v2112_v12 = vadd.f32 %v2111_v51, %v5098_v6  ;;  %v2118_v49 = vadd.f32 %v2117_v39, %v5099_v21  ;;  %v2124_v56 = vadd.f32 %v2123_v26, %v5100_v4  ;;  %v2130_v3 = vadd.f32 %v2129_v22, %v5101_v60 }
 0x1d2   :  { %v2089_v35 = vrot.slane %v2088_v32, 2  ;;  %v2095_v0 = vrot.slane %v2094_v2, 2  ;;  %v2101_v50 = vrot.slane %v2100_v46, 2  ;;  %v2107_v1 = vrot.slane %v2106_v48, 2 }
 0x1d3   :  { %v2113_v20 = vrot.slane %v2112_v12, 2  ;;  %v2119_v38 = vrot.slane %v2118_v49, 2  ;;  %v2125_v37 = vrot.slane %v2124_v56, 2  ;;  %v2131_v23 = vrot.slane %v2130_v3, 2 }
 0x1d4   :  { %v2090_v45 = vadd.f32 %v2089_v35, %v2088_v32  ;;  %v2096_v57 = vadd.f32 %v2095_v0, %v2094_v2  ;;  %v2102_v52 = vadd.f32 %v2101_v50, %v2100_v46  ;;  %v2108_v9 = vadd.f32 %v2107_v1, %v2106_v48 }
 0x1d5   :  { %v2114_v41 = vadd.f32 %v2113_v20, %v2112_v12  ;;  %v2120_v34 = vadd.f32 %v2119_v38, %v2118_v49  ;;  %v2126_v55 = vadd.f32 %v2125_v37, %v2124_v56  ;;  %v2132_v31 = vadd.f32 %v2131_v23, %v2130_v3 }
 0x1d6   :  { %v2091_v7 = vrot.slane %v2090_v45, 1  ;;  %v2097_v43 = vrot.slane %v2096_v57, 1  ;;  %v2103_v13 = vrot.slane %v2102_v52, 1  ;;  %v2109_v63 = vrot.slane %v2108_v9, 1 }
 0x1d7   :  { %v2115_v44 = vrot.slane %v2114_v41, 1  ;;  %v2121_v51 = vrot.slane %v2120_v34, 1  ;;  %v2127_v8 = vrot.slane %v2126_v55, 1  ;;  %v2133_v39 = vrot.slane %v2132_v31, 1 }
 0x1d8   :  { %v2092_v36 = vadd.f32 %v2091_v7, %v2090_v45  ;;  %v2098_v26 = vadd.f32 %v2097_v43, %v2096_v57  ;;  %v2104_v30 = vadd.f32 %v2103_v13, %v2102_v52  ;;  %v2110_v22 = vadd.f32 %v2109_v63, %v2108_v9 }
 0x1d9   :  { %v2116_v32 = vadd.f32 %v2115_v44, %v2114_v41  ;;  %v2122_v2 = vadd.f32 %v2121_v51, %v2120_v34  ;;  %v2128_v46 = vadd.f32 %v2127_v8, %v2126_v55  ;;  %v2134_v48 = vadd.f32 %v2133_v39, %v2132_v31 }
 0x1da   :  { %v5102_v6 = vunpack.c.l.bf16 %v4493_v10  ;;  %v5103_v21 = vunpack.c.h.bf16 %v4493_v10  ;;  %v5104_v4 = vunpack.c.l.bf16 %v4495_v28  ;;  %v5105_v60 = vunpack.c.h.bf16 %v4495_v28 }
 0x1db   :  { %v5106_v35 = vunpack.c.l.bf16 %v4501_v29  ;;  %v5107_v50 = vunpack.c.h.bf16 %v4501_v29  ;;  %v5108_v20 = vunpack.c.l.bf16 %v4503_v58  ;;  %v5109_v37 = vunpack.c.h.bf16 %v4503_v58 }
 0x1dc   :  { %v2135_v12 = vrot.slane %v5102_v6, 4  ;;  %v2141_v49 = vrot.slane %v5103_v21, 4  ;;  %v2147_v56 = vrot.slane %v5104_v4, 4  ;;  %v2153_v3 = vrot.slane %v5105_v60, 4 }
 0x1dd   :  { %v2159_v0 = vrot.slane %v5106_v35, 4  ;;  %v2165_v1 = vrot.slane %v5107_v50, 4  ;;  %v2171_v38 = vrot.slane %v5108_v20, 4  ;;  %v2177_v23 = vrot.slane %v5109_v37, 4 }
 0x1de   :  { %v5110_v45 = vmov %v5102_v6  ;;  %v5111_v52 = vmov %v5103_v21  ;;  %v5112_v41 = vmov %v5104_v4  ;;  %v5113_v55 = vmov %v5105_v60 }
 0x1df   :  { %v2136_v57 = vadd.f32 %v2135_v12, %v5110_v45  ;;  %v2142_v9 = vadd.f32 %v2141_v49, %v5111_v52  ;;  %v2148_v34 = vadd.f32 %v2147_v56, %v5112_v41  ;;  %v2154_v31 = vadd.f32 %v2153_v3, %v5113_v55 }
 0x1e0   :  { %v5114_v7 = vmov %v5106_v35  ;;  %v5115_v13 = vmov %v5107_v50  ;;  %v5116_v44 = vmov %v5108_v20  ;;  %v5117_v8 = vmov %v5109_v37 }
 0x1e1   :  { %v2160_v43 = vadd.f32 %v2159_v0, %v5114_v7  ;;  %v2166_v63 = vadd.f32 %v2165_v1, %v5115_v13  ;;  %v2172_v51 = vadd.f32 %v2171_v38, %v5116_v44  ;;  %v2178_v39 = vadd.f32 %v2177_v23, %v5117_v8 }
 0x1e2   :  { %v2137_v10 = vrot.slane %v2136_v57, 2  ;;  %v2143_v6 = vrot.slane %v2142_v9, 2  ;;  %v2149_v12 = vrot.slane %v2148_v34, 2  ;;  %v2155_v21 = vrot.slane %v2154_v31, 2 }
 0x1e3   :  { %v2161_v49 = vrot.slane %v2160_v43, 2  ;;  %v2167_v4 = vrot.slane %v2166_v63, 2  ;;  %v2173_v28 = vrot.slane %v2172_v51, 2  ;;  %v2179_v56 = vrot.slane %v2178_v39, 2 }
 0x1e4   :  { %v2138_v60 = vadd.f32 %v2137_v10, %v2136_v57  ;;  %v2144_v3 = vadd.f32 %v2143_v6, %v2142_v9  ;;  %v2150_v35 = vadd.f32 %v2149_v12, %v2148_v34  ;;  %v2156_v0 = vadd.f32 %v2155_v21, %v2154_v31 }
 0x1e5   :  { %v2162_v29 = vadd.f32 %v2161_v49, %v2160_v43  ;;  %v2168_v50 = vadd.f32 %v2167_v4, %v2166_v63  ;;  %v2174_v1 = vadd.f32 %v2173_v28, %v2172_v51  ;;  %v2180_v20 = vadd.f32 %v2179_v56, %v2178_v39  ;;  %v4697_v4 = vld [vmem:[#allocation3 + $0xb8] sm:$0xff] }
 0x1e6   :  { %v2139_v38 = vrot.slane %v2138_v60, 1  ;;  %v2145_v37 = vrot.slane %v2144_v3, 1  ;;  %v2151_v58 = vrot.slane %v2150_v35, 1  ;;  %v2157_v23 = vrot.slane %v2156_v0, 1 }
 0x1e7   :  { %v2163_v45 = vrot.slane %v2162_v29, 1  ;;  %v2169_v52 = vrot.slane %v2168_v50, 1  ;;  %v2175_v41 = vrot.slane %v2174_v1, 1  ;;  %v2181_v55 = vrot.slane %v2180_v20, 1 }
 0x1e8   :  { %v2140_v7 = vadd.f32 %v2139_v38, %v2138_v60  ;;  %v2146_v13 = vadd.f32 %v2145_v37, %v2144_v3  ;;  %v2152_v44 = vadd.f32 %v2151_v58, %v2150_v35  ;;  %v2158_v8 = vadd.f32 %v2157_v23, %v2156_v0  ;;  %v4715_v3 = vld [vmem:[#allocation3 + $0x178] sm:$0xff] }
 0x1e9   :  { %v2164_v57 = vadd.f32 %v2163_v45, %v2162_v29  ;;  %v2170_v9 = vadd.f32 %v2169_v52, %v2168_v50  ;;  %v2176_v34 = vadd.f32 %v2175_v41, %v2174_v1  ;;  %v2182_v31 = vadd.f32 %v2181_v55, %v2180_v20  ;;  %v4717_v35 = vld [vmem:[#allocation3 + $0x1b8] sm:$0xff] }
 0x1ea   :  { %v2215_v43 = vsel %vm316_vm0, %v4525_v25, %v4521_v42  ;;  %v2222_v63 = vsel %vm316_vm0, %v4527_v14, %v4523_v5  ;;  %v2229_v51 = vsel %vm316_vm0, %v2104_v30, %v2092_v36  ;;  %v2236_v39 = vsel %vm316_vm0, %v2110_v22, %v2098_v26  ;;  %v4719_v0 = vld [vmem:[#allocation3 + $0x1f8] sm:$0xff] }
 0x1eb   :  { %v2216_v10 = vsel %vm318_vm1, %v4529_v61, %v2215_v43  ;;  %v2223_v6 = vsel %vm318_vm1, %v4531_v27, %v2222_v63  ;;  %v2230_v12 = vsel %vm318_vm1, %v2116_v32, %v2229_v51  ;;  %v2237_v21 = vsel %vm318_vm1, %v2122_v2, %v2236_v39  ;;  %v4725_v50 = vld [vmem:[#allocation3 + $0x238] sm:$0xff] }
 0x1ec   :  { %v2217_v42 = vsel %vm320_vm2, %v4533_v19, %v2216_v10  ;;  %v2224_v5 = vsel %vm320_vm2, %v4535_v33, %v2223_v6  ;;  %v2231_v25 = vsel %vm320_vm2, %v2128_v46, %v2230_v12  ;;  %v2238_v14 = vsel %vm320_vm2, %v2134_v48, %v2237_v21  ;;  %v4687_v46 = vld [vmem:[#allocation3 + $0x38] sm:$0xff] }
 0x1ed   :  { %v2218_v61 = vsel %vm322_vm3, %v4569_v18, %v2217_v42  ;;  %v2225_v27 = vsel %vm322_vm3, %v4571_v53, %v2224_v5  ;;  %v2232_v36 = vsel %vm322_vm3, %v2140_v7, %v2231_v25  ;;  %v2239_v26 = vsel %vm322_vm3, %v2146_v13, %v2238_v14  ;;  %v4733_v58 = vld [vmem:[#allocation3 + $0x2b8] sm:$0xff] }
 0x1ee   :  { %v2219_v19 = vsel %vm324_vm4, %v4573_v11, %v2218_v61  ;;  %v2226_v33 = vsel %vm324_vm4, %v4575_v54, %v2225_v27  ;;  %v2233_v30 = vsel %vm324_vm4, %v2152_v44, %v2232_v36  ;;  %v2240_v22 = vsel %vm324_vm4, %v2158_v8, %v2239_v26  ;;  %v4689_v11 = vld [vmem:[#allocation3 + $0x78] sm:$0xff] }
 0x1ef   :  { %v2220_v18 = vsel %vm326_vm5, %v4577_v47, %v2219_v19  ;;  %v2227_v53 = vsel %vm326_vm5, %v4579_v17, %v2226_v33  ;;  %v2234_v32 = vsel %vm326_vm5, %v2164_v57, %v2233_v30  ;;  %v2241_v2 = vsel %vm326_vm5, %v2170_v9, %v2240_v22  ;;  %v4699_v17 = vld [vmem:[#allocation3 + $0xf8] sm:$0xff] }
 0x1f0   :  { %v2221_v54 = vsel %vm328_vm6, %v4581_v24, %v2220_v18  ;;  %v2228_v48 = vsel %vm328_vm6, %v4583_v59, %v2227_v53  ;;  %v2235_v49 = vsel %vm328_vm6, %v2176_v34, %v2234_v32  ;;  %v2242_v47 = vsel %vm328_vm6, %v2182_v31, %v2241_v2  ;;  %v4713_v59 = vld [vmem:[#allocation3 + $0x138] sm:$0xff] }
 0x1f1   :  { %v4702_v28 = vadd.f32 %v2221_v54, %v4454_v15  ;;  %v4705_v56 = vadd.f32 %v2228_v48, %v4457_v16  ;;  %v4708_v60 = vadd.f32 %v2235_v49, %v4460_v62  ;;  %v4711_v24 = vadd.f32 %v2242_v47, %v4463_v40  ;;  %v4727_v40 = vld [vmem:[#allocation3 + $0x278] sm:$0xff] }
 0x1f2   :  { %v2275_v15 = vunpack.c.l.bf16 %v4687_v46  ;;  %v2276_v29 = vunpack.c.h.bf16 %v4687_v46  ;;  %v2277_v16 = vunpack.c.l.bf16 %v4689_v11  ;;  %v2278_v62 = vunpack.c.h.bf16 %v4689_v11  ;;  %v4735_v23 = vld [vmem:[#allocation3 + $0x2f8] sm:$0xff] }
 0x1f3   :  { %v2279_v1 = vunpack.c.l.bf16 %v4697_v4  ;;  %v2280_v20 = vunpack.c.h.bf16 %v4697_v4  ;;  %v2281_v38 = vunpack.c.l.bf16 %v4699_v17  ;;  %v2282_v37 = vunpack.c.h.bf16 %v4699_v17  ;;  %v4741_v7 = vld [vmem:[#allocation3 + $0x338] sm:$0xff] }
 0x1f4   :  { %v2283_v45 = vunpack.c.l.bf16 %v4713_v59  ;;  %v2284_v52 = vunpack.c.h.bf16 %v4713_v59  ;;  %v2285_v41 = vunpack.c.l.bf16 %v4715_v3  ;;  %v2286_v55 = vunpack.c.h.bf16 %v4715_v3  ;;  %v4743_v13 = vld [vmem:[#allocation3 + $0x378] sm:$0xff] }
 0x1f5   :  { %v2287_v44 = vunpack.c.l.bf16 %v4717_v35  ;;  %v2288_v8 = vunpack.c.h.bf16 %v4717_v35  ;;  %v2289_v57 = vunpack.c.l.bf16 %v4719_v0  ;;  %v2290_v9 = vunpack.c.h.bf16 %v4719_v0  ;;  %v4749_v34 = vld [vmem:[#allocation3 + $0x3b8] sm:$0xff] }
 0x1f6   :  { %v4751_v31 = vld [vmem:[#allocation3 + $0x3f8] sm:$0xff]  ;;  %v2291_v43 = vunpack.c.l.bf16 %v4725_v50  ;;  %v2292_v63 = vunpack.c.h.bf16 %v4725_v50  ;;  %v2293_v51 = vunpack.c.l.bf16 %v4727_v40  ;;  %v2294_v39 = vunpack.c.h.bf16 %v4727_v40 }
 0x1f7   :  { %v2307_v19 = vrot.slane %v2275_v15, 4  ;;  %v2313_v33 = vrot.slane %v2276_v29, 4  ;;  %v2319_v30 = vrot.slane %v2277_v16, 4  ;;  %v2325_v22 = vrot.slane %v2278_v62, 4 }
 0x1f8   :  { %v2331_v18 = vrot.slane %v2279_v1, 4  ;;  %v2337_v53 = vrot.slane %v2280_v20, 4  ;;  %v2343_v32 = vrot.slane %v2281_v38, 4  ;;  %v2349_v2 = vrot.slane %v2282_v37, 4 }
 0x1f9   :  { %v2308_v46 = vadd.f32 %v2307_v19, %v2275_v15  ;;  %v2314_v11 = vadd.f32 %v2313_v33, %v2276_v29  ;;  %v2320_v54 = vadd.f32 %v2319_v30, %v2277_v16  ;;  %v2326_v48 = vadd.f32 %v2325_v22, %v2278_v62 }
 0x1fa   :  { %v2332_v49 = vadd.f32 %v2331_v18, %v2279_v1  ;;  %v2338_v47 = vadd.f32 %v2337_v53, %v2280_v20  ;;  %v2344_v4 = vadd.f32 %v2343_v32, %v2281_v38  ;;  %v2350_v17 = vadd.f32 %v2349_v2, %v2282_v37 }
 0x1fb   :  { %v2309_v27 = vrot.slane %v2308_v46, 2  ;;  %v2315_v36 = vrot.slane %v2314_v11, 2  ;;  %v2321_v61 = vrot.slane %v2320_v54, 2  ;;  %v2327_v26 = vrot.slane %v2326_v48, 2 }
 0x1fc   :  { %v2333_v14 = vrot.slane %v2332_v49, 2  ;;  %v2339_v25 = vrot.slane %v2338_v47, 2  ;;  %v2345_v5 = vrot.slane %v2344_v4, 2  ;;  %v2351_v42 = vrot.slane %v2350_v17, 2 }
 0x1fd   :  { %v2310_v21 = vadd.f32 %v2309_v27, %v2308_v46  ;;  %v2316_v12 = vadd.f32 %v2315_v36, %v2314_v11  ;;  %v2322_v6 = vadd.f32 %v2321_v61, %v2320_v54  ;;  %v2328_v10 = vadd.f32 %v2327_v26, %v2326_v48 }
 0x1fe   :  { %v2334_v15 = vadd.f32 %v2333_v14, %v2332_v49  ;;  %v2340_v29 = vadd.f32 %v2339_v25, %v2338_v47  ;;  %v2346_v16 = vadd.f32 %v2345_v5, %v2344_v4  ;;  %v2352_v62 = vadd.f32 %v2351_v42, %v2350_v17 }
 0x1ff   :  { %v2311_v1 = vrot.slane %v2310_v21, 1  ;;  %v2317_v20 = vrot.slane %v2316_v12, 1  ;;  %v2323_v38 = vrot.slane %v2322_v6, 1  ;;  %v2329_v37 = vrot.slane %v2328_v10, 1 }
 0x200   :  { %v2335_v19 = vrot.slane %v2334_v15, 1  ;;  %v2341_v33 = vrot.slane %v2340_v29, 1  ;;  %v2347_v30 = vrot.slane %v2346_v16, 1  ;;  %v2353_v22 = vrot.slane %v2352_v62, 1 }
 0x201   :  { %v4769_v18 = vadd.f32 %v2311_v1, %v2310_v21  ;;  %v4771_v53 = vadd.f32 %v2317_v20, %v2316_v12  ;;  %v4773_v27 = vadd.f32 %v2323_v38, %v2322_v6  ;;  %v4775_v61 = vadd.f32 %v2329_v37, %v2328_v10 }
 0x202   :  { %v4777_v14 = vadd.f32 %v2335_v19, %v2334_v15  ;;  %v4779_v5 = vadd.f32 %v2341_v33, %v2340_v29  ;;  %v4781_v42 = vadd.f32 %v2347_v30, %v2346_v16  ;;  %v4783_v25 = vadd.f32 %v2353_v22, %v2352_v62 }
 0x203   :  { %v2355_v36 = vrot.slane %v2283_v45, 4  ;;  %v2361_v21 = vrot.slane %v2284_v52, 4  ;;  %v2367_v6 = vrot.slane %v2285_v41, 4  ;;  %v2373_v10 = vrot.slane %v2286_v55, 4 }
 0x204   :  { %v2379_v12 = vrot.slane %v2287_v44, 4  ;;  %v2385_v26 = vrot.slane %v2288_v8, 4  ;;  %v2391_v32 = vrot.slane %v2289_v57, 4  ;;  %v2397_v2 = vrot.slane %v2290_v9, 4 }
 0x205   :  { %v2356_v46 = vadd.f32 %v2355_v36, %v2283_v45  ;;  %v2362_v11 = vadd.f32 %v2361_v21, %v2284_v52  ;;  %v2368_v54 = vadd.f32 %v2367_v6, %v2285_v41  ;;  %v2374_v48 = vadd.f32 %v2373_v10, %v2286_v55 }
 0x206   :  { %v2380_v49 = vadd.f32 %v2379_v12, %v2287_v44  ;;  %v2386_v47 = vadd.f32 %v2385_v26, %v2288_v8  ;;  %v2392_v4 = vadd.f32 %v2391_v32, %v2289_v57  ;;  %v2398_v45 = vadd.f32 %v2397_v2, %v2290_v9 }
 0x207   :  { %v2357_v59 = vrot.slane %v2356_v46, 2  ;;  %v2363_v52 = vrot.slane %v2362_v11, 2  ;;  %v2369_v17 = vrot.slane %v2368_v54, 2  ;;  %v2375_v15 = vrot.slane %v2374_v48, 2 }
 0x208   :  { %v2381_v41 = vrot.slane %v2380_v49, 2  ;;  %v2387_v29 = vrot.slane %v2386_v47, 2  ;;  %v2393_v3 = vrot.slane %v2392_v4, 2  ;;  %v2399_v55 = vrot.slane %v2398_v45, 2 }
 0x209   :  { %v2358_v16 = vadd.f32 %v2357_v59, %v2356_v46  ;;  %v2364_v62 = vadd.f32 %v2363_v52, %v2362_v11  ;;  %v2370_v44 = vadd.f32 %v2369_v17, %v2368_v54  ;;  %v2376_v1 = vadd.f32 %v2375_v15, %v2374_v48 }
 0x20a   :  { %v2382_v35 = vadd.f32 %v2381_v41, %v2380_v49  ;;  %v2388_v8 = vadd.f32 %v2387_v29, %v2386_v47  ;;  %v2394_v20 = vadd.f32 %v2393_v3, %v2392_v4  ;;  %v2400_v38 = vadd.f32 %v2399_v55, %v2398_v45 }
 0x20b   :  { %v2359_v57 = vrot.slane %v2358_v16, 1  ;;  %v2365_v37 = vrot.slane %v2364_v62, 1  ;;  %v2371_v0 = vrot.slane %v2370_v44, 1  ;;  %v2377_v9 = vrot.slane %v2376_v1, 1 }
 0x20c   :  { %v2383_v19 = vrot.slane %v2382_v35, 1  ;;  %v2389_v33 = vrot.slane %v2388_v8, 1  ;;  %v2395_v30 = vrot.slane %v2394_v20, 1  ;;  %v2401_v22 = vrot.slane %v2400_v38, 1 }
 0x20d   :  { %v4817_v36 = vadd.f32 %v2359_v57, %v2358_v16  ;;  %v4819_v21 = vadd.f32 %v2365_v37, %v2364_v62  ;;  %v4821_v6 = vadd.f32 %v2371_v0, %v2370_v44  ;;  %v4823_v10 = vadd.f32 %v2377_v9, %v2376_v1 }
 0x20e   :  { %v4825_v12 = vadd.f32 %v2383_v19, %v2382_v35  ;;  %v4827_v26 = vadd.f32 %v2389_v33, %v2388_v8  ;;  %v4829_v32 = vadd.f32 %v2395_v30, %v2394_v20  ;;  %v4831_v2 = vadd.f32 %v2401_v22, %v2400_v38 }
 0x20f   :  { %v2403_v46 = vrot.slane %v2291_v43, 4  ;;  %v2409_v11 = vrot.slane %v2292_v63, 4  ;;  %v2415_v54 = vrot.slane %v2293_v51, 4  ;;  %v2421_v48 = vrot.slane %v2294_v39, 4 }
 0x210   :  { %v5118_v49 = vunpack.c.l.bf16 %v4733_v58  ;;  %v5119_v4 = vunpack.c.h.bf16 %v4733_v58  ;;  %v5120_v59 = vunpack.c.l.bf16 %v4735_v23  ;;  %v5121_v17 = vunpack.c.h.bf16 %v4735_v23 }
 0x211   :  { %v2404_v41 = vadd.f32 %v2403_v46, %v2291_v43  ;;  %v2410_v29 = vadd.f32 %v2409_v11, %v2292_v63  ;;  %v2416_v3 = vadd.f32 %v2415_v54, %v2293_v51  ;;  %v2422_v55 = vadd.f32 %v2421_v48, %v2294_v39 }
 0x212   :  { %v2427_v47 = vrot.slane %v5118_v49, 4  ;;  %v2433_v45 = vrot.slane %v5119_v4, 4  ;;  %v2439_v52 = vrot.slane %v5120_v59, 4  ;;  %v2445_v15 = vrot.slane %v5121_v17, 4 }
 0x213   :  { %v5122_v16 = vmov %v5118_v49  ;;  %v5123_v44 = vmov %v5119_v4  ;;  %v5124_v35 = vmov %v5120_v59  ;;  %v5125_v43 = vmov %v5121_v17 }
 0x214   :  { %v2428_v62 = vadd.f32 %v2427_v47, %v5122_v16  ;;  %v2434_v1 = vadd.f32 %v2433_v45, %v5123_v44  ;;  %v2440_v8 = vadd.f32 %v2439_v52, %v5124_v35  ;;  %v2446_v20 = vadd.f32 %v2445_v15, %v5125_v43 }
 0x215   :  { %v2405_v50 = vrot.slane %v2404_v41, 2  ;;  %v2411_v63 = vrot.slane %v2410_v29, 2  ;;  %v2417_v38 = vrot.slane %v2416_v3, 2  ;;  %v2423_v57 = vrot.slane %v2422_v55, 2 }
 0x216   :  { %v2429_v51 = vrot.slane %v2428_v62, 2  ;;  %v2435_v37 = vrot.slane %v2434_v1, 2  ;;  %v2441_v40 = vrot.slane %v2440_v8, 2  ;;  %v2447_v39 = vrot.slane %v2446_v20, 2 }
 0x217   :  { %v2406_v0 = vadd.f32 %v2405_v50, %v2404_v41  ;;  %v2412_v9 = vadd.f32 %v2411_v63, %v2410_v29  ;;  %v2418_v19 = vadd.f32 %v2417_v38, %v2416_v3  ;;  %v2424_v33 = vadd.f32 %v2423_v57, %v2422_v55 }
 0x218   :  { %v2430_v58 = vadd.f32 %v2429_v51, %v2428_v62  ;;  %v2436_v30 = vadd.f32 %v2435_v37, %v2434_v1  ;;  %v2442_v22 = vadd.f32 %v2441_v40, %v2440_v8  ;;  %v2448_v46 = vadd.f32 %v2447_v39, %v2446_v20 }
 0x219   :  { %v2407_v11 = vrot.slane %v2406_v0, 1  ;;  %v2413_v54 = vrot.slane %v2412_v9, 1  ;;  %v2419_v23 = vrot.slane %v2418_v19, 1  ;;  %v2425_v48 = vrot.slane %v2424_v33, 1 }
 0x21a   :  { %v2431_v49 = vrot.slane %v2430_v58, 1  ;;  %v2437_v47 = vrot.slane %v2436_v30, 1  ;;  %v2443_v4 = vrot.slane %v2442_v22, 1  ;;  %v2449_v45 = vrot.slane %v2448_v46, 1 }
 0x21b   :  { %v2408_v59 = vadd.f32 %v2407_v11, %v2406_v0  ;;  %v2414_v52 = vadd.f32 %v2413_v54, %v2412_v9  ;;  %v2420_v17 = vadd.f32 %v2419_v23, %v2418_v19  ;;  %v2426_v15 = vadd.f32 %v2425_v48, %v2424_v33 }
 0x21c   :  { %v2432_v41 = vadd.f32 %v2431_v49, %v2430_v58  ;;  %v2438_v29 = vadd.f32 %v2437_v47, %v2436_v30  ;;  %v2444_v3 = vadd.f32 %v2443_v4, %v2442_v22  ;;  %v2450_v55 = vadd.f32 %v2449_v45, %v2448_v46 }
 0x21d   :  { %v5126_v16 = vunpack.c.l.bf16 %v4741_v7  ;;  %v5127_v44 = vunpack.c.h.bf16 %v4741_v7  ;;  %v5128_v35 = vunpack.c.l.bf16 %v4743_v13  ;;  %v5129_v43 = vunpack.c.h.bf16 %v4743_v13 }
 0x21e   :  { %v5130_v50 = vunpack.c.l.bf16 %v4749_v34  ;;  %v5131_v38 = vunpack.c.h.bf16 %v4749_v34  ;;  %v5132_v51 = vunpack.c.l.bf16 %v4751_v31  ;;  %v5133_v40 = vunpack.c.h.bf16 %v4751_v31 }
 0x21f   :  { %v2451_v62 = vrot.slane %v5126_v16, 4  ;;  %v2457_v1 = vrot.slane %v5127_v44, 4  ;;  %v2463_v8 = vrot.slane %v5128_v35, 4  ;;  %v2469_v20 = vrot.slane %v5129_v43, 4 }
 0x220   :  { %v2475_v63 = vrot.slane %v5130_v50, 4  ;;  %v2481_v57 = vrot.slane %v5131_v38, 4  ;;  %v2487_v37 = vrot.slane %v5132_v51, 4  ;;  %v2493_v39 = vrot.slane %v5133_v40, 4 }
 0x221   :  { %v5134_v0 = vmov %v5126_v16  ;;  %v5135_v19 = vmov %v5127_v44  ;;  %v5136_v58 = vmov %v5128_v35  ;;  %v5137_v22 = vmov %v5129_v43 }
 0x222   :  { %v2452_v9 = vadd.f32 %v2451_v62, %v5134_v0  ;;  %v2458_v33 = vadd.f32 %v2457_v1, %v5135_v19  ;;  %v2464_v30 = vadd.f32 %v2463_v8, %v5136_v58  ;;  %v2470_v46 = vadd.f32 %v2469_v20, %v5137_v22 }
 0x223   :  { %v5138_v11 = vmov %v5130_v50  ;;  %v5139_v23 = vmov %v5131_v38  ;;  %v5140_v49 = vmov %v5132_v51  ;;  %v5141_v4 = vmov %v5133_v40 }
 0x224   :  { %v2476_v54 = vadd.f32 %v2475_v63, %v5138_v11  ;;  %v2482_v48 = vadd.f32 %v2481_v57, %v5139_v23  ;;  %v2488_v47 = vadd.f32 %v2487_v37, %v5140_v49  ;;  %v2494_v45 = vadd.f32 %v2493_v39, %v5141_v4 }
 0x225   :  { %v2453_v7 = vrot.slane %v2452_v9, 2  ;;  %v2459_v16 = vrot.slane %v2458_v33, 2  ;;  %v2465_v62 = vrot.slane %v2464_v30, 2  ;;  %v2471_v44 = vrot.slane %v2470_v46, 2 }
 0x226   :  { %v2477_v1 = vrot.slane %v2476_v54, 2  ;;  %v2483_v35 = vrot.slane %v2482_v48, 2  ;;  %v2489_v13 = vrot.slane %v2488_v47, 2  ;;  %v2495_v8 = vrot.slane %v2494_v45, 2 }
 0x227   :  { %v2454_v43 = vadd.f32 %v2453_v7, %v2452_v9  ;;  %v2460_v20 = vadd.f32 %v2459_v16, %v2458_v33  ;;  %v2466_v50 = vadd.f32 %v2465_v62, %v2464_v30  ;;  %v2472_v63 = vadd.f32 %v2471_v44, %v2470_v46 }
 0x228   :  { %v2478_v34 = vadd.f32 %v2477_v1, %v2476_v54  ;;  %v2484_v38 = vadd.f32 %v2483_v35, %v2482_v48  ;;  %v2490_v57 = vadd.f32 %v2489_v13, %v2488_v47  ;;  %v2496_v51 = vadd.f32 %v2495_v8, %v2494_v45 }
 0x229   :  { %v2455_v37 = vrot.slane %v2454_v43, 1  ;;  %v2461_v40 = vrot.slane %v2460_v20, 1  ;;  %v2467_v31 = vrot.slane %v2466_v50, 1  ;;  %v2473_v39 = vrot.slane %v2472_v63, 1 }
 0x22a   :  { %v2479_v0 = vrot.slane %v2478_v34, 1  ;;  %v2485_v19 = vrot.slane %v2484_v38, 1  ;;  %v2491_v58 = vrot.slane %v2490_v57, 1  ;;  %v2497_v22 = vrot.slane %v2496_v51, 1 }
 0x22b   :  { %v2456_v11 = vadd.f32 %v2455_v37, %v2454_v43  ;;  %v2462_v23 = vadd.f32 %v2461_v40, %v2460_v20  ;;  %v2468_v49 = vadd.f32 %v2467_v31, %v2466_v50  ;;  %v2474_v4 = vadd.f32 %v2473_v39, %v2472_v63  ;;  %v2777_v63 = vld [vmem:[%s4956_s2] ss:$0 sm:$0xff] }
 0x22c   :  { %v2480_v9 = vadd.f32 %v2479_v0, %v2478_v34  ;;  %v2486_v33 = vadd.f32 %v2485_v19, %v2484_v38  ;;  %v2492_v30 = vadd.f32 %v2491_v58, %v2490_v57  ;;  %v2498_v46 = vadd.f32 %v2497_v22, %v2496_v51 }
 0x22d   :  { %v2531_v54 = vsel %vm316_vm0, %v4773_v27, %v4769_v18  ;;  %v2538_v48 = vsel %vm316_vm0, %v4775_v61, %v4771_v53  ;;  %v2545_v47 = vsel %vm316_vm0, %v2420_v17, %v2408_v59  ;;  %v2552_v45 = vsel %vm316_vm0, %v2426_v15, %v2414_v52 }
 0x22e   :  { %v2532_v7 = vsel %vm318_vm1, %v4777_v14, %v2531_v54  ;;  %v2539_v16 = vsel %vm318_vm1, %v4779_v5, %v2538_v48  ;;  %v2546_v62 = vsel %vm318_vm1, %v2432_v41, %v2545_v47  ;;  %v2553_v44 = vsel %vm318_vm1, %v2438_v29, %v2552_v45 }
 0x22f   :  { %v2533_v18 = vsel %vm320_vm2, %v4781_v42, %v2532_v7  ;;  %v2540_v53 = vsel %vm320_vm2, %v4783_v25, %v2539_v16  ;;  %v2547_v27 = vsel %vm320_vm2, %v2444_v3, %v2546_v62  ;;  %v2554_v61 = vsel %vm320_vm2, %v2450_v55, %v2553_v44 }
 0x230   :  { %v2534_v14 = vsel %vm322_vm3, %v4817_v36, %v2533_v18  ;;  %v2541_v5 = vsel %vm322_vm3, %v4819_v21, %v2540_v53  ;;  %v2548_v59 = vsel %vm322_vm3, %v2456_v11, %v2547_v27  ;;  %v2555_v52 = vsel %vm322_vm3, %v2462_v23, %v2554_v61 }
 0x231   :  { %v2535_v42 = vsel %vm324_vm4, %v4821_v6, %v2534_v14  ;;  %v2542_v25 = vsel %vm324_vm4, %v4823_v10, %v2541_v5  ;;  %v2549_v17 = vsel %vm324_vm4, %v2468_v49, %v2548_v59  ;;  %v2556_v15 = vsel %vm324_vm4, %v2474_v4, %v2555_v52 }
 0x232   :  { %v2536_v36 = vsel %vm326_vm5, %v4825_v12, %v2535_v42  ;;  %v2543_v21 = vsel %vm326_vm5, %v4827_v26, %v2542_v25  ;;  %v2550_v41 = vsel %vm326_vm5, %v2480_v9, %v2549_v17  ;;  %v2557_v29 = vsel %vm326_vm5, %v2486_v33, %v2556_v15 }
 0x233   :  { %v2537_v6 = vsel %vm328_vm6, %v4829_v32, %v2536_v36  ;;  %v2544_v10 = vsel %vm328_vm6, %v4831_v2, %v2543_v21  ;;  %v2551_v3 = vsel %vm328_vm6, %v2492_v30, %v2550_v41  ;;  %v2558_v55 = vsel %vm328_vm6, %v2498_v46, %v2557_v29 }
 0x234   :  { %v2563_v1 = vadd.f32 %v2537_v6, %v4702_v28  ;;  %v2564_v12 = vadd.f32 %v2544_v10, %v4705_v56  ;;  %v2565_v26 = vadd.f32 %v2551_v3, %v4708_v60  ;;  %v2566_v35 = vadd.f32 %v2558_v55, %v4711_v24 }
 0x236   :  { %v2575_v13 = vmul.f32 0.015625, %v2563_v1  ;;  %v2576_v8 = vmul.f32 0.015625, %v2564_v12  ;;  %v2577_v43 = vmul.f32 0.015625, %v2565_v26  ;;  %v2578_v20 = vmul.f32 0.015625, %v2566_v35 }
 0x238   :  { %v2579_v32 = vpack.c.bf16 %v2577_v43, %v2575_v13  ;;  %v2580_v50 = vpack.c.bf16 %v2578_v20, %v2576_v8 }
 0x23a   :  { %2748 = vmatprep.mubr.bf16.mxu0 %v2580_v50 }
 0x23b   :  { %2749 = vmatmul.mubr.bf16.vlgmr.msra.gmra.mxu0 %v2579_v32 }
 0x2fb   :  { %v2810_v2 = vpop.f32.mrf.mxu0 }
 0x2fd   :  { %v2811_v28 = vpop.f32.mrf.mxu0 }
 0x2fe   :  { %v2812_v34 = vadd.f32 %v2811_v28, %v2810_v2 }
 0x2ff   :  { %v2813_v56 = vpop.f32.mrf.mxu0 }
 0x300   :  { %v2751_v38 = vadd.f32 %v2812_v34, %v2777_v63 }
 0x301   :  { %v2814_v60 = vpop.f32.mrf.mxu0 }
 0x302   :  { %2757 = vst [vmem:[#allocation8] sm:$0xff] %v2751_v38  ;;  %v2815_v24 = vadd.f32 %v2814_v60, %v2813_v56 }
 0x304   :  { %v2754_v57 = vadd.f32 %v2815_v24, %v2777_v63 }
 0x306   :  { %2758 = vst [vmem:[#allocation8 + $0x8] sm:$0xff] %v2754_v57 }
 0x307   :  { %2890 = shalt.err (!%p2887_p0)
}
 0x308   :  { %2770 = dma.vmem_to_hbm [thread:$0]  %s2765_s27, 256, %s4957_s3, [#allocation5], %s2906_s15, %s2906_s15, %s2907_s16  }
 0x309   :  { %2903 = dma.done.wait [#allocation5], 256  }
 0x30a   :  { %2904 = vsyncadd [#allocation5], 4294967040 }
 0x30b   :  { %2774 = vsyncpa [#allocation4], 1 }
 0x30c   :  { %2775 = vsyncpa [#allocation7], 1 }
 0x30d   :  { %2776 = vsyncpa [#allocation5], 1 }

</bundles_post_ra>
